<compile_context>
chip_gen: v5e
topology: v5e:2x2
jax: 0.10.0
libtpu: 0.0.40
codegen_flags: <defaults>
</compile_context>

<pallas_src>
import functools

import jax
import jax.numpy as jnp
from jax.experimental import pallas as pl
from jax.experimental.pallas import tpu as pltpu


def _round_up(x, m):
    return ((x + m - 1) // m) * m


def _device_kind():
    try:
        return jax.devices()[0].device_kind.lower()
    except Exception:
        return ""


def _select_mxu_dtypes():
    """Operand / accumulator dtype per TPU generation.

    int8 -> int32 on v5e/v6e (integer MXU mode, 2x rate, half operand bytes);
    bf16 -> f32 everywhere else (v7x MXU has no integer mode).  Both exact
    for {0,1} operands.
    """
    kind = _device_kind()
    if ("v5" in kind) or ("v6" in kind):
        return jnp.int8, jnp.int32
    return jnp.bfloat16, jnp.float32


def _is_v7():
    return "v7" in _device_kind()


def _bitlinear_kernel(x_ref, wt_ref, b_ref, o_ref, rsum_ref, *, op_dtype, acc_dtype):
    """One (tb, to, tp) tile of the packed binary matmul.

    x_ref   : (tb, tp) uint8  packed input bytes
    wt_ref  : (tp, to) uint8  packed weight bytes, pre-transposed to (K, N)
    b_ref   : (1, to)  float32 folded bias: bias - 2*colsum(w) + in_features
    o_ref   : (tb, to) float32 (resident across k; used as the accumulator)
    rsum_ref: (tb, 1)  float32 running row-popcount of x
    """
    k = pl.program_id(2)

    @pl.when(k == 0)
    def _():
        o_ref[...] = jnp.zeros_like(o_ref)
        rsum_ref[...] = jnp.zeros_like(rsum_ref)

    # Widen the small packed tiles AFTER the narrow VMEM load (shift/and need ints).
    x = x_ref[...].astype(jnp.int32)   # (tb, tp)
    w = wt_ref[...].astype(jnp.int32)  # (tp, to)

    x_planes = [(x >> b) & 1 for b in range(8)]
    w_planes = [(w >> b) & 1 for b in range(8)]

    # Row popcount of this K-tile: sum the 8 small planes (VPU adds on a
    # (tb, tp) tile) then reduce along lanes (XLU slot, otherwise idle).
    bit_count = x_planes[0]
    for p in x_planes[1:]:
        bit_count = bit_count + p
    rsum_ref[...] += jnp.sum(bit_count, axis=-1, keepdims=True).astype(jnp.float32)

    # Early narrow cast per plane, THEN concatenate along the contraction axis
    # (bit-major / byte-minor ordering, identical for both operands).
    xk = jnp.concatenate([p.astype(op_dtype) for p in x_planes], axis=1)  # (tb, 8*tp)
    wk = jnp.concatenate([p.astype(op_dtype) for p in w_planes], axis=0)  # (8*tp, to)

    # Raw {0,1} bits on the MXU; accumulate straight into the resident output.
    o_ref[...] += jnp.dot(xk, wk, preferred_element_type=acc_dtype).astype(jnp.float32)

    @pl.when(k == pl.num_programs(2) - 1)
    def _():
        # popcount identity finalize: 4*dot - 2*rowsum(x) + (bias - 2*colsum(w) + K)
        o_ref[...] = 4.0 * o_ref[...] - 2.0 * rsum_ref[...] + b_ref[...]


def prepare_bitlinear_weights(weight_packed, bias, in_features, *, to=512, tp=256):
    """Static per-weight preparation (cacheable).

    Masks pad bits of the last byte, pads to tile multiples, transposes to an
    MXU-ready (K, N) layout, and folds -2*colsum(w) + in_features into the bias.
    """
    O, P = weight_packed.shape
    assert P == (in_features + 7) // 8

    op_dtype, acc_dtype = _select_mxu_dtypes()

    # Tile clamps: lane dims multiples of 128, uint8 sublane dim multiple of 32.
    to = min(to, _round_up(O, 128))
    tp = min(tp, _round_up(P, 128))
    Op, Pp = _round_up(O, to), _round_up(P, tp)

    # v7x has 2 TensorCores: keep >= 2 output-column tiles so both get work
    # even when the batch fits in one row tile.
    if _is_v7() and (Op // to) < 2 and Op >= 256:
        to = max(128, ((Op // 2) // 128) * 128)
        Op = _round_up(O, to)

    w = weight_packed.astype(jnp.uint8)
    rem = in_features % 8
    if rem:
        w = w.at[:, P - 1].set(w[:, P - 1] & jnp.uint8((1 << rem) - 1))

    # Per-output-row popcount over the valid bits (colsum of the {0,1} weights).
    wcount = jnp.sum(
        jax.lax.population_count(w.astype(jnp.uint32)).astype(jnp.int32),
        axis=1).astype(jnp.float32)

    b = jnp.zeros((O,), jnp.float32) if bias is None else bias.astype(jnp.float32)
    b_eff = b - 2.0 * wcount + jnp.float32(in_features)
    b_eff = jnp.pad(b_eff, (0, Op - O)).reshape(1, Op)

    # Pad (zeros -> pad bits contribute nothing to dot/colsum) and transpose
    # once to (K, N) so the kernel feeds an MXU-ready RHS.
    wt = jnp.pad(w, ((0, Op - O), (0, Pp - P))).T   # (Pp, Op) uint8

    return dict(wt=wt, b_eff=b_eff, to=to, tp=tp, Op=Op, Pp=Pp,
                O=O, P=P, in_features=in_features,
                op_dtype=op_dtype, acc_dtype=acc_dtype)


def bitlinear_apply(input_packed, prep, *, tb=512):
    """Run the packed binary matmul with prepared (cached) weights."""
    B, P = input_packed.shape
    assert P == prep["P"]
    to, tp, Op, Pp = prep["to"], prep["tp"], prep["Op"], prep["Pp"]
    in_features = prep["in_features"]

    tb = min(tb, _round_up(B, 32))   # uint8 sublane granularity, f32-out safe
    Bp = _round_up(B, tb)

    x = input_packed.astype(jnp.uint8)
    rem = in_features % 8
    if rem:
        # Zero the unused high bits of the last byte so the in-kernel row
        # popcount only counts valid features.
        x = x.at[:, P - 1].set(x[:, P - 1] & jnp.uint8((1 << rem) - 1))
    x = jnp.pad(x, ((0, Bp - B), (0, Pp - P)))

    grid = (Bp // tb, Op // to, Pp // tp)
    kernel = functools.partial(_bitlinear_kernel,
                               op_dtype=prep["op_dtype"],
                               acc_dtype=prep["acc_dtype"])

    out = pl.pallas_call(
        kernel,
        out_shape=jax.ShapeDtypeStruct((Bp, Op), jnp.float32),
        grid_spec=pltpu.PrefetchScalarGridSpec(
            num_scalar_prefetch=0,
            grid=grid,
            in_specs=[
                pl.BlockSpec((tb, tp), lambda i, j, k: (i, k)),   # packed x
                pl.BlockSpec((tp, to), lambda i, j, k: (k, j)),   # packed w.T
                pl.BlockSpec((1, to), lambda i, j, k: (0, j)),    # folded bias
            ],
            out_specs=pl.BlockSpec((tb, to), lambda i, j, k: (i, j)),
            scratch_shapes=[pltpu.VMEM((tb, 1), jnp.float32)],    # x row popcounts
        ),
        compiler_params=pltpu.CompilerParams(
            dimension_semantics=("parallel", "parallel", "arbitrary"),
            vmem_limit_bytes=48 * 1024 * 1024),
        cost_estimate=pl.CostEstimate(
            flops=int(2 * B * prep["O"] * in_features),
            transcendentals=0,
            bytes_accessed=int(Bp * Pp + Pp * Op + 4 * Op + 4 * Bp * Op)),
    )(x, prep["wt"], prep["b_eff"])

    return out[:B, :prep["O"]]


def bitlinear_forward(input_packed, weight_packed, bias, in_features,
                      *, tb=512, to=512, tp=256):
    """Functional packed 1-bit linear: sign(x) @ sign(w).T + bias."""
    prep = prepare_bitlinear_weights(weight_packed, bias, in_features, to=to, tp=tp)
    return bitlinear_apply(input_packed, prep, tb=tb)


class BitLinearLayer:
    """JAX mirror of the PyTorch BitLinearLayer (forward only).

    Weight prep (mask/pad/transpose/bias fold) is cached across calls.
    """

    def __init__(self, in_features, out_features, bias=True,
                 *, tb=512, to=512, tp=256):
        self.in_features = in_features
        self.out_features = out_features
        packed_len = (in_features + 7) // 8
        # Matches the PyTorch module's zero init; overwrite before use.
        self.weight_packed = jnp.zeros((out_features, packed_len), jnp.uint8)
        self.bias = jnp.zeros((out_features,), jnp.float32) if bias else None
        self._tb, self._to, self._tp = tb, to, tp
        self._prep = None
        self._prep_key = None

    def _prepare(self):
        key = (id(self.weight_packed), id(self.bias))
        if self._prep is None or self._prep_key != key:
            self._prep = prepare_bitlinear_weights(
                self.weight_packed, self.bias, self.in_features,
                to=self._to, tp=self._tp)
            self._prep_key = key
        return self._prep

    def __call__(self, input_packed):
        return bitlinear_apply(input_packed, self._prepare(), tb=self._tb)


# ----------------------------- test helpers --------------------------------

def _pack_bits_lsb(bits):
    """bits: (..., F) in {0,1} -> (..., ceil(F/8)) uint8, LSB-first."""
    n = bits.shape[-1]
    P = (n + 7) // 8
    pad = P * 8 - n
    b = jnp.pad(bits, [(0, 0)] * (bits.ndim - 1) + [(0, pad)])
    b = b.reshape(bits.shape[:-1] + (P, 8)).astype(jnp.int32)
    weights = (1 << jnp.arange(8, dtype=jnp.int32))
    return jnp.sum(b * weights, axis=-1).astype(jnp.uint8)


def _reference(x_bits, w_bits, bias):
    xs = (2 * x_bits - 1).astype(jnp.float32)
    ws = (2 * w_bits - 1).astype(jnp.float32)
    out = xs @ ws.T
    return out + bias[None, :] if bias is not None else out


if __name__ == "__main__":
    key = jax.random.PRNGKey(0)
    k_w, k_b, k_x, k_w2, k_x2 = jax.random.split(key, 5)

    # ---- Test 1: small shapes, non-multiple-of-8 in_features ----------------
    batch, in_features, out_features = 8, 200, 192

    w_bits = jax.random.bernoulli(k_w, 0.5, (out_features, in_features)).astype(jnp.int32)
    x_bits = jax.random.bernoulli(k_x, 0.5, (batch, in_features)).astype(jnp.int32)
    bias = jax.random.normal(k_b, (out_features,), jnp.float32)

    layer = BitLinearLayer(in_features, out_features, bias=True)
    layer.weight_packed = _pack_bits_lsb(w_bits)
    layer.bias = bias

    out = jax.block_until_ready(layer(_pack_bits_lsb(x_bits)))
    ref = _reference(x_bits, w_bits, bias)
    assert out.shape == (batch, out_features) and out.dtype == jnp.float32
    assert jnp.allclose(out, ref, atol=1e-4), (out, ref)

    # ---- Test 2: multi-tile grid (output-column tiles x K tiles), no bias ---
    in_f2, out_f2 = 2000, 192
    w_bits2 = jax.random.bernoulli(k_w2, 0.5, (out_f2, in_f2)).astype(jnp.int32)
    x_bits2 = jax.random.bernoulli(k_x2, 0.5, (batch, in_f2)).astype(jnp.int32)

    out2 = jax.block_until_ready(
        bitlinear_forward(_pack_bits_lsb(x_bits2), _pack_bits_lsb(w_bits2),
                          None, in_f2, tb=256, to=128, tp=128))
    ref2 = _reference(x_bits2, w_bits2, None)
    assert out2.shape == (batch, out_f2)
    assert jnp.allclose(out2, ref2, atol=1e-3), (out2, ref2)

    print("KERNEL_OK")
</pallas_src>

<mosaic_0001>
module attributes {stable_mosaic.version = 11 : i64} {
  func.func @_bitlinear_kernel(%arg0: i32, %arg1: i32, %arg2: i32, %arg3: memref<32x128xi8, #tpu.memory_space<vmem>>, %arg4: memref<128x256xi8, #tpu.memory_space<vmem>>, %arg5: memref<1x256xf32, #tpu.memory_space<vmem>>, %arg6: memref<32x256xf32, #tpu.memory_space<vmem>>, %arg7: memref<32x1xf32, #tpu.memory_space<vmem>>) attributes {dimension_semantics = [#tpu.dimension_semantics<parallel>, #tpu.dimension_semantics<parallel>, #tpu.dimension_semantics<arbitrary>], iteration_bounds = array<i64: 1, 1, 1>, scalar_prefetch = 0 : i64, scratch_operands = 1 : i64, tpu.core_type = #tpu.core_type<tc>, window_params = [{transform_indices = @transform_0, window_bounds = array<i64: 32, 128>}, {transform_indices = @transform_1, window_bounds = array<i64: 128, 256>}, {transform_indices = @transform_2, window_bounds = array<i64: 1, 256>}, {transform_indices = @transform_3, window_bounds = array<i64: 32, 256>}]} {
    %c0_i32 = arith.constant 0 : i32
    %0 = arith.cmpi eq, %arg2, %c0_i32 : i32
    %1 = arith.extui %0 : i1 to i32
    %c0_i32_0 = arith.constant 0 : i32
    %2 = arith.cmpi ne, %1, %c0_i32_0 : i32
    scf.if %2 {
      %cst_40 = arith.constant 0.000000e+00 : f32
      %109 = vector.broadcast %cst_40 : f32 to vector<32x256xf32>
      %c0_41 = arith.constant 0 : index
      %c0_42 = arith.constant 0 : index
      %110 = vector.load %arg6[%c0_41, %c0_42] : memref<32x256xf32, #tpu.memory_space<vmem>>, vector<32x256xf32>
      tpu.vector_store %arg6[%c0_41, %c0_42], %109 {strides = array<i32>} : memref<32x256xf32, #tpu.memory_space<vmem>>, vector<32x256xf32>,
      %cst_43 = arith.constant 0.000000e+00 : f32
      %111 = vector.broadcast %cst_43 : f32 to vector<32x1xf32>
      %c0_44 = arith.constant 0 : index
      %c0_45 = arith.constant 0 : index
      %112 = vector.load %arg7[%c0_44, %c0_45] : memref<32x1xf32, #tpu.memory_space<vmem>>, vector<32x1xf32>
      tpu.vector_store %arg7[%c0_44, %c0_45], %111 {strides = array<i32>} : memref<32x1xf32, #tpu.memory_space<vmem>>, vector<32x1xf32>,
    } else {
    }
    %c0 = arith.constant 0 : index
    %c0_1 = arith.constant 0 : index
    %3 = vector.load %arg3[%c0, %c0_1] : memref<32x128xi8, #tpu.memory_space<vmem>>, vector<32x128xi8>
    %4 = arith.extui %3 : vector<32x128xi8> to vector<32x128xi32>
    %c0_2 = arith.constant 0 : index
    %c0_3 = arith.constant 0 : index
    %5 = vector.load %arg4[%c0_2, %c0_3] : memref<128x256xi8, #tpu.memory_space<vmem>>, vector<128x256xi8>
    %6 = arith.extui %5 : vector<128x256xi8> to vector<128x256xi32>
    %c0_i32_4 = arith.constant 0 : i32
    %7 = vector.broadcast %c0_i32_4 : i32 to vector<32x128xi32>
    %8 = arith.shrsi %4, %7 : vector<32x128xi32>
    %c1_i32 = arith.constant 1 : i32
    %9 = vector.broadcast %c1_i32 : i32 to vector<32x128xi32>
    %10 = arith.andi %8, %9 : vector<32x128xi32>
    %c1_i32_5 = arith.constant 1 : i32
    %11 = vector.broadcast %c1_i32_5 : i32 to vector<32x128xi32>
    %12 = arith.shrsi %4, %11 : vector<32x128xi32>
    %c1_i32_6 = arith.constant 1 : i32
    %13 = vector.broadcast %c1_i32_6 : i32 to vector<32x128xi32>
    %14 = arith.andi %12, %13 : vector<32x128xi32>
    %c2_i32 = arith.constant 2 : i32
    %15 = vector.broadcast %c2_i32 : i32 to vector<32x128xi32>
    %16 = arith.shrsi %4, %15 : vector<32x128xi32>
    %c1_i32_7 = arith.constant 1 : i32
    %17 = vector.broadcast %c1_i32_7 : i32 to vector<32x128xi32>
    %18 = arith.andi %16, %17 : vector<32x128xi32>
    %c3_i32 = arith.constant 3 : i32
    %19 = vector.broadcast %c3_i32 : i32 to vector<32x128xi32>
    %20 = arith.shrsi %4, %19 : vector<32x128xi32>
    %c1_i32_8 = arith.constant 1 : i32
    %21 = vector.broadcast %c1_i32_8 : i32 to vector<32x128xi32>
    %22 = arith.andi %20, %21 : vector<32x128xi32>
    %c4_i32 = arith.constant 4 : i32
    %23 = vector.broadcast %c4_i32 : i32 to vector<32x128xi32>
    %24 = arith.shrsi %4, %23 : vector<32x128xi32>
    %c1_i32_9 = arith.constant 1 : i32
    %25 = vector.broadcast %c1_i32_9 : i32 to vector<32x128xi32>
    %26 = arith.andi %24, %25 : vector<32x128xi32>
    %c5_i32 = arith.constant 5 : i32
    %27 = vector.broadcast %c5_i32 : i32 to vector<32x128xi32>
    %28 = arith.shrsi %4, %27 : vector<32x128xi32>
    %c1_i32_10 = arith.constant 1 : i32
    %29 = vector.broadcast %c1_i32_10 : i32 to vector<32x128xi32>
    %30 = arith.andi %28, %29 : vector<32x128xi32>
    %c6_i32 = arith.constant 6 : i32
    %31 = vector.broadcast %c6_i32 : i32 to vector<32x128xi32>
    %32 = arith.shrsi %4, %31 : vector<32x128xi32>
    %c1_i32_11 = arith.constant 1 : i32
    %33 = vector.broadcast %c1_i32_11 : i32 to vector<32x128xi32>
    %34 = arith.andi %32, %33 : vector<32x128xi32>
    %c7_i32 = arith.constant 7 : i32
    %35 = vector.broadcast %c7_i32 : i32 to vector<32x128xi32>
    %36 = arith.shrsi %4, %35 : vector<32x128xi32>
    %c1_i32_12 = arith.constant 1 : i32
    %37 = vector.broadcast %c1_i32_12 : i32 to vector<32x128xi32>
    %38 = arith.andi %36, %37 : vector<32x128xi32>
    %c0_i32_13 = arith.constant 0 : i32
    %39 = vector.broadcast %c0_i32_13 : i32 to vector<128x256xi32>
    %40 = arith.shrsi %6, %39 : vector<128x256xi32>
    %c1_i32_14 = arith.constant 1 : i32
    %41 = vector.broadcast %c1_i32_14 : i32 to vector<128x256xi32>
    %42 = arith.andi %40, %41 : vector<128x256xi32>
    %c1_i32_15 = arith.constant 1 : i32
    %43 = vector.broadcast %c1_i32_15 : i32 to vector<128x256xi32>
    %44 = arith.shrsi %6, %43 : vector<128x256xi32>
    %c1_i32_16 = arith.constant 1 : i32
    %45 = vector.broadcast %c1_i32_16 : i32 to vector<128x256xi32>
    %46 = arith.andi %44, %45 : vector<128x256xi32>
    %c2_i32_17 = arith.constant 2 : i32
    %47 = vector.broadcast %c2_i32_17 : i32 to vector<128x256xi32>
    %48 = arith.shrsi %6, %47 : vector<128x256xi32>
    %c1_i32_18 = arith.constant 1 : i32
    %49 = vector.broadcast %c1_i32_18 : i32 to vector<128x256xi32>
    %50 = arith.andi %48, %49 : vector<128x256xi32>
    %c3_i32_19 = arith.constant 3 : i32
    %51 = vector.broadcast %c3_i32_19 : i32 to vector<128x256xi32>
    %52 = arith.shrsi %6, %51 : vector<128x256xi32>
    %c1_i32_20 = arith.constant 1 : i32
    %53 = vector.broadcast %c1_i32_20 : i32 to vector<128x256xi32>
    %54 = arith.andi %52, %53 : vector<128x256xi32>
    %c4_i32_21 = arith.constant 4 : i32
    %55 = vector.broadcast %c4_i32_21 : i32 to vector<128x256xi32>
    %56 = arith.shrsi %6, %55 : vector<128x256xi32>
    %c1_i32_22 = arith.constant 1 : i32
    %57 = vector.broadcast %c1_i32_22 : i32 to vector<128x256xi32>
    %58 = arith.andi %56, %57 : vector<128x256xi32>
    %c5_i32_23 = arith.constant 5 : i32
    %59 = vector.broadcast %c5_i32_23 : i32 to vector<128x256xi32>
    %60 = arith.shrsi %6, %59 : vector<128x256xi32>
    %c1_i32_24 = arith.constant 1 : i32
    %61 = vector.broadcast %c1_i32_24 : i32 to vector<128x256xi32>
    %62 = arith.andi %60, %61 : vector<128x256xi32>
    %c6_i32_25 = arith.constant 6 : i32
    %63 = vector.broadcast %c6_i32_25 : i32 to vector<128x256xi32>
    %64 = arith.shrsi %6, %63 : vector<128x256xi32>
    %c1_i32_26 = arith.constant 1 : i32
    %65 = vector.broadcast %c1_i32_26 : i32 to vector<128x256xi32>
    %66 = arith.andi %64, %65 : vector<128x256xi32>
    %c7_i32_27 = arith.constant 7 : i32
    %67 = vector.broadcast %c7_i32_27 : i32 to vector<128x256xi32>
    %68 = arith.shrsi %6, %67 : vector<128x256xi32>
    %c1_i32_28 = arith.constant 1 : i32
    %69 = vector.broadcast %c1_i32_28 : i32 to vector<128x256xi32>
    %70 = arith.andi %68, %69 : vector<128x256xi32>
    %71 = arith.addi %10, %14 : vector<32x128xi32>
    %72 = arith.addi %71, %18 : vector<32x128xi32>
    %73 = arith.addi %72, %22 : vector<32x128xi32>
    %74 = arith.addi %73, %26 : vector<32x128xi32>
    %75 = arith.addi %74, %30 : vector<32x128xi32>
    %76 = arith.addi %75, %34 : vector<32x128xi32>
    %77 = arith.addi %76, %38 : vector<32x128xi32>
    %c0_29 = arith.constant 0 : index
    %c0_30 = arith.constant 0 : index
    %78 = vector.load %arg7[%c0_29, %c0_30] : memref<32x1xf32, #tpu.memory_space<vmem>>, vector<32x1xf32>
    %cst = arith.constant dense<0> : vector<32xi32>
    %79 = vector.multi_reduction <add>, %77, %cst [1] : vector<32x128xi32> to vector<32xi32>
    %80 = vector.shape_cast %79 : vector<32xi32> to vector<32x1xi32>
    %81 = arith.sitofp %80 : vector<32x1xi32> to vector<32x1xf32>
    %82 = arith.addf %78, %81 : vector<32x1xf32>
    %c0_31 = arith.constant 0 : index
    %c0_32 = arith.constant 0 : index
    %83 = vector.load %arg7[%c0_31, %c0_32] : memref<32x1xf32, #tpu.memory_space<vmem>>, vector<32x1xf32>
    tpu.vector_store %arg7[%c0_31, %c0_32], %82 {strides = array<i32>} : memref<32x1xf32, #tpu.memory_space<vmem>>, vector<32x1xf32>,
    %84 = arith.sitofp %10 : vector<32x128xi32> to vector<32x128xbf16>
    %85 = arith.sitofp %14 : vector<32x128xi32> to vector<32x128xbf16>
    %86 = arith.sitofp %18 : vector<32x128xi32> to vector<32x128xbf16>
    %87 = arith.sitofp %22 : vector<32x128xi32> to vector<32x128xbf16>
    %88 = arith.sitofp %26 : vector<32x128xi32> to vector<32x128xbf16>
    %89 = arith.sitofp %30 : vector<32x128xi32> to vector<32x128xbf16>
    %90 = arith.sitofp %34 : vector<32x128xi32> to vector<32x128xbf16>
    %91 = arith.sitofp %38 : vector<32x128xi32> to vector<32x128xbf16>
    %92 = tpu.concatenate %84, %85, %86, %87, %88, %89, %90, %91 in 1 : vector<32x128xbf16>, vector<32x128xbf16>, vector<32x128xbf16>, vector<32x128xbf16>, vector<32x128xbf16>, vector<32x128xbf16>, vector<32x128xbf16>, vector<32x128xbf16> -> vector<32x1024xbf16>
    %93 = arith.sitofp %42 : vector<128x256xi32> to vector<128x256xbf16>
    %94 = arith.sitofp %46 : vector<128x256xi32> to vector<128x256xbf16>
    %95 = arith.sitofp %50 : vector<128x256xi32> to vector<128x256xbf16>
    %96 = arith.sitofp %54 : vector<128x256xi32> to vector<128x256xbf16>
    %97 = arith.sitofp %58 : vector<128x256xi32> to vector<128x256xbf16>
    %98 = arith.sitofp %62 : vector<128x256xi32> to vector<128x256xbf16>
    %99 = arith.sitofp %66 : vector<128x256xi32> to vector<128x256xbf16>
    %100 = arith.sitofp %70 : vector<128x256xi32> to vector<128x256xbf16>
    %101 = tpu.concatenate %93, %94, %95, %96, %97, %98, %99, %100 in 0 : vector<128x256xbf16>, vector<128x256xbf16>, vector<128x256xbf16>, vector<128x256xbf16>, vector<128x256xbf16>, vector<128x256xbf16>, vector<128x256xbf16>, vector<128x256xbf16> -> vector<1024x256xbf16>
    %c0_33 = arith.constant 0 : index
    %c0_34 = arith.constant 0 : index
    %102 = vector.load %arg6[%c0_33, %c0_34] : memref<32x256xf32, #tpu.memory_space<vmem>>, vector<32x256xf32>
    %cst_35 = arith.constant dense<0.000000e+00> : vector<32x256xf32>
    %103 = tpu.matmul %92, %101, %cst_35 {dimension_numbers = #tpu.dot_dimension_numbers<[1], [0], [0], [1], [0, 0, 1, 1], [], []>} : vector<32x1024xbf16>, vector<1024x256xbf16>, vector<32x256xf32> -> vector<32x256xf32>
    %104 = arith.addf %102, %103 : vector<32x256xf32>
    %c0_36 = arith.constant 0 : index
    %c0_37 = arith.constant 0 : index
    %105 = vector.load %arg6[%c0_36, %c0_37] : memref<32x256xf32, #tpu.memory_space<vmem>>, vector<32x256xf32>
    tpu.vector_store %arg6[%c0_36, %c0_37], %104 {strides = array<i32>} : memref<32x256xf32, #tpu.memory_space<vmem>>, vector<32x256xf32>,
    %c0_i32_38 = arith.constant 0 : i32
    %106 = arith.cmpi eq, %arg2, %c0_i32_38 : i32
    %107 = arith.extui %106 : i1 to i32
    %c0_i32_39 = arith.constant 0 : i32
    %108 = arith.cmpi ne, %107, %c0_i32_39 : i32
    scf.if %108 {
      %c0_40 = arith.constant 0 : index
      %c0_41 = arith.constant 0 : index
      %109 = vector.load %arg6[%c0_40, %c0_41] : memref<32x256xf32, #tpu.memory_space<vmem>>, vector<32x256xf32>
      %cst_42 = arith.constant 4.000000e+00 : f32
      %110 = vector.broadcast %cst_42 : f32 to vector<32x256xf32>
      %111 = arith.mulf %110, %109 : vector<32x256xf32>
      %c0_43 = arith.constant 0 : index
      %c0_44 = arith.constant 0 : index
      %112 = vector.load %arg7[%c0_43, %c0_44] : memref<32x1xf32, #tpu.memory_space<vmem>>, vector<32x1xf32>
      %cst_45 = arith.constant 2.000000e+00 : f32
      %113 = vector.broadcast %cst_45 : f32 to vector<32x1xf32>
      %114 = arith.mulf %113, %112 : vector<32x1xf32>
      %115 = vector.broadcast %114 : vector<32x1xf32> to vector<32x256xf32>
      %116 = arith.subf %111, %115 : vector<32x256xf32>
      %c0_46 = arith.constant 0 : index
      %c0_47 = arith.constant 0 : index
      %117 = vector.load %arg5[%c0_46, %c0_47] : memref<1x256xf32, #tpu.memory_space<vmem>>, vector<1x256xf32>
      %118 = vector.broadcast %117 : vector<1x256xf32> to vector<32x256xf32>
      %119 = arith.addf %116, %118 : vector<32x256xf32>
      %c0_48 = arith.constant 0 : index
      %c0_49 = arith.constant 0 : index
      %120 = vector.load %arg6[%c0_48, %c0_49] : memref<32x256xf32, #tpu.memory_space<vmem>>, vector<32x256xf32>
      tpu.vector_store %arg6[%c0_48, %c0_49], %119 {strides = array<i32>} : memref<32x256xf32, #tpu.memory_space<vmem>>, vector<32x256xf32>,
    } else {
    }
    return
  }
  func.func @transform_0(%arg0: i32, %arg1: i32, %arg2: i32) -> (i32, i32) {
    %c0_i32 = arith.constant 0 : i32
    return %arg0, %arg2 : i32, i32
  }
  func.func @transform_1(%arg0: i32, %arg1: i32, %arg2: i32) -> (i32, i32) {
    %c0_i32 = arith.constant 0 : i32
    return %arg2, %arg1 : i32, i32
  }
  func.func @transform_2(%arg0: i32, %arg1: i32, %arg2: i32) -> (i32, i32) {
    %c0_i32 = arith.constant 0 : i32
    %c0_i32_0 = arith.constant 0 : i32
    return %c0_i32, %arg1 : i32, i32
  }
  func.func @transform_3(%arg0: i32, %arg1: i32, %arg2: i32) -> (i32, i32) {
    %c0_i32 = arith.constant 0 : i32
    return %arg0, %arg1 : i32, i32
  }
}

</mosaic_0001>

<bundles_post_ra>
// kernel: tpu_custom_call.1
= control target key start
LH: loop header
LB: loop body
LE: loop exit
PB: predicated region body
PF: predicated region fallthrough
CT: control target
= control target key end

     0   :  { %8 = vsyncpa [#allocation4], 0  ;;  %s3745_s0 = inlined_call_operand.hbm [shape: u8[32,128], index: 0, kind: input, shape index: {}]   ;;  %s3746_s1 = inlined_call_operand.hbm [shape: u8[128,256], index: 1, kind: input, shape index: {}]   ;;  %s3747_s2 = inlined_call_operand.hbm [shape: f32[1,256], index: 2, kind: input, shape index: {}]   ;;  %s3748_s3 = inlined_call_operand.hbm [shape: f32[32,256], index: 3, kind: output, shape index: {}]  }
   0x1   :  { %9 = vsyncpa [#allocation7], 0  ;;  %s26_s14 = sshll.u32 %s3746_s1, 4  ;;  %s27_s14 = int_to_ptr.hbm [resolvable:$true] %s26_s14 }
   0x2   :  { %10 = vsyncpa [#allocation5], 0  ;;  %s2511_s15 = smov [#allocation6]   ;;  %s16_s19 = sshll.u32 %s3745_s0, 4  ;;  %s17_s19 = int_to_ptr.hbm [resolvable:$true] %s16_s19 }
   0x3   :  { %s28_s16 = sshll.u32 %s2511_s15, 4  ;;  %s2512_s20 = smov 256   ;;  %s29_s16 = int_to_ptr.vmem [resolvable:$true] %s28_s16 }
   0x4   :  { %s2513_s21 = smov 16   ;;  %s2514_s22 = smov [#allocation3]  }
   0x5   :  { %34 = dma.hbm_to_vmem [thread:$0]  %s27_s14, 1024, %s29_s16, [#allocation7], %s2512_s20, %s2512_s20, %s2513_s21  }
   0x6   :  { %s18_s23 = sshll.u32 %s2514_s22, 4  ;;  %s40_s25 = sshll.u32 %s3747_s2, 4  ;;  %s19_s23 = int_to_ptr.vmem [resolvable:$true] %s18_s23  ;;  %s41_s25 = int_to_ptr.hbm [resolvable:$true] %s40_s25 }
   0x7   :  { %21 = dma.hbm_to_vmem [thread:$0]  %s17_s19, 128, %s19_s23, [#allocation4]  }
   0x8   :  { %s2515_s26 = smov [#allocation8]  }
   0x9   :  { %s42_s27 = sshll.u32 %s2515_s26, 4  ;;  %s43_s27 = int_to_ptr.vmem [resolvable:$true] %s42_s27 }
   0xa   :  { %45 = dma.hbm_to_vmem [thread:$0]  %s41_s25, 32, %s43_s27, [#allocation7]  }
   0xb   :  { %2505 = dma.done.wait [#allocation4], 128  }
   0xc   :  { %2506 = vsyncadd [#allocation4], 4294967168 }
   0xd   :  { %2507 = dma.done.wait [#allocation7], 1056  }
   0xe   :  { %2508 = vsyncadd [#allocation7], 4294966240  ;;  %v90_v0 = vld [vmem:[#allocation6 + $0x30] sm:$0xff]  ;;  %v91_v1 = vld [vmem:[#allocation6 + $0x38] sm:$0xff]  ;;  %vm70_vm0 = vcmask 7168   ;;  %s2518_s0 = smov [#allocation9]  }
   0xf   :  { %v120_v2 = vunpack.c.2.s8 %v90_v0  ;;  %v121_v3 = vunpack.c.2.s8 %v91_v1  ;;  %v122_v4 = vunpack.c.3.s8 %v90_v0  ;;  %v123_v5 = vunpack.c.3.s8 %v91_v1  ;;  %s2382_s2 = sshll.u32 %s2518_s0, 4  ;;  %s2384_s30 = sshll.u32 %s3748_s3, 4  ;;  %s2383_s2 = int_to_ptr.vmem [resolvable:$true] %s2382_s2  ;;  %s2385_s30 = int_to_ptr.hbm [resolvable:$true] %s2384_s30 }
  0x10   :  { %v116_v6 = vunpack.c.0.s8 %v90_v0  ;;  %v117_v7 = vunpack.c.0.s8 %v91_v1  ;;  %v118_v8 = vunpack.c.1.s8 %v90_v0  ;;  %v119_v9 = vunpack.c.1.s8 %v91_v1 }
  0x11   :  { %v2551_v10 = vand.u32 255, %v120_v2  ;;  %v2553_v11 = vand.u32 255, %v121_v3  ;;  %v2555_v12 = vand.u32 255, %v122_v4  ;;  %v2557_v13 = vand.u32 255, %v123_v5 }
  0x12   :  { %v2559_v14 = vand.u32 255, %v116_v6  ;;  %v2561_v15 = vand.u32 255, %v117_v7  ;;  %v2563_v16 = vand.u32 255, %v118_v8  ;;  %v2565_v17 = vand.u32 255, %v119_v9 }
  0x13   :  { %v244_v18 = vand.u32 1, %v2551_v10  ;;  %v245_v19 = vand.u32 1, %v2553_v11  ;;  %v246_v20 = vand.u32 1, %v2555_v12  ;;  %v247_v21 = vand.u32 1, %v2557_v13 }
  0x14   :  { %v276_v22 = vshra.s32 %v2551_v10, 1  ;;  %v277_v23 = vshra.s32 %v2553_v11, 1  ;;  %v278_v24 = vshra.s32 %v2555_v12, 1  ;;  %v279_v25 = vshra.s32 %v2557_v13, 1 }
  0x15   :  { %v977_v26 = vcvt.s32.f32 %v244_v18  ;;  %v978_v27 = vcvt.s32.f32 %v245_v19  ;;  %v979_v28 = vcvt.s32.f32 %v246_v20  ;;  %v980_v29 = vcvt.s32.f32 %v247_v21 }
  0x16   :  { %v308_v30 = vand.u32 1, %v276_v22  ;;  %v309_v31 = vand.u32 1, %v277_v23  ;;  %v310_v32 = vand.u32 1, %v278_v24  ;;  %v311_v33 = vand.u32 1, %v279_v25 }
  0x17   :  { %v2575_v34 = vpack.c.bf16 %v978_v27, %v977_v26  ;;  %v2577_v35 = vpack.c.bf16 %v980_v29, %v979_v28  ;;  %v340_v36 = vshra.s32 %v2551_v10, 2  ;;  %v341_v37 = vshra.s32 %v2553_v11, 2 }
  0x18   :  { %v1025_v38 = vcvt.s32.f32 %v308_v30  ;;  %v1026_v39 = vcvt.s32.f32 %v309_v31  ;;  %v1027_v40 = vcvt.s32.f32 %v310_v32  ;;  %v1028_v41 = vcvt.s32.f32 %v311_v33 }
  0x19   :  { %3885 = vst [vmem:[#allocation13_spill] sm:$0xff] %v2575_v34  ;;  %v1377_v42 = vunpack.c.l.b16 %v2575_v34  ;;  %v1379_v44 = vunpack.c.l.b16 %v2577_v35  ;;  %v342_v48 = vshra.s32 %v2555_v12, 2  ;;  %v343_v49 = vshra.s32 %v2557_v13, 2 }
  0x1a   :  { %3886 = vst [vmem:[#allocation14_spill] sm:$0xff] %v2577_v35  ;;  %v2585_v46 = vpack.c.bf16 %v1026_v39, %v1025_v38  ;;  %v2587_v47 = vpack.c.bf16 %v1028_v41, %v1027_v40  ;;  %v372_v51 = vand.u32 1, %v340_v36  ;;  %v373_v52 = vand.u32 1, %v341_v37 }
  0x1b   :  { %v1395_v50 = vpack.c.b16 %v1379_v44, %v1377_v42  ;;  %v404_v53 = vshra.s32 %v2551_v10, 3  ;;  %v374_v58 = vand.u32 1, %v342_v48  ;;  %v375_v59 = vand.u32 1, %v343_v49 }
  0x1c   :  { %3887 = vst [vmem:[#allocation15_spill] sm:$0xff] %v2585_v46  ;;  %v1457_v54 = vunpack.c.l.b16 %v2585_v46  ;;  %v1459_v56 = vunpack.c.l.b16 %v2587_v47  ;;  %v1073_v60 = vcvt.s32.f32 %v372_v51  ;;  %v1074_v61 = vcvt.s32.f32 %v373_v52 }
  0x1d   :  { %3888 = vst [vmem:[#allocation16_spill] sm:$0xff] %v2587_v47  ;;  %1981 = vmatpush.bf16.msra.mxu0 %v1395_v50  ;;  %v405_v63 = vshra.s32 %v2553_v11, 3  ;;  %v406_v0 = vshra.s32 %v2555_v12, 3  ;;  %v407_v1 = vshra.s32 %v2557_v13, 3  ;;  %v1075_v2 = vcvt.s32.f32 %v374_v58 }
  0x1e   :  { %v1475_v62 = vpack.c.b16 %v1459_v56, %v1457_v54  ;;  %v1076_v3 = vcvt.s32.f32 %v375_v59  ;;  %v2599_v4 = vpack.c.bf16 %v1074_v61, %v1073_v60  ;;  %v436_v5 = vand.u32 1, %v404_v53 }
  0x1f   :  { %v437_v6 = vand.u32 1, %v405_v63  ;;  %v438_v7 = vand.u32 1, %v406_v0  ;;  %v439_v8 = vand.u32 1, %v407_v1  ;;  %v240_v9 = vand.u32 1, %v2559_v14 }
  0x20   :  { %3889 = vst [vmem:[#allocation17_spill] sm:$0xff] %v2599_v4  ;;  %2000 = vmatpush.bf16.msra.mxu1 %v1475_v62  ;;  %v2602_v18 = vpack.c.bf16 %v1076_v3, %v1075_v2  ;;  %v1537_v19 = vunpack.c.l.b16 %v2599_v4  ;;  %v1121_v21 = vcvt.s32.f32 %v436_v5  ;;  %v241_v25 = vand.u32 1, %v2561_v15 }
  0x21   :  { %v1122_v22 = vcvt.s32.f32 %v437_v6  ;;  %v1123_v23 = vcvt.s32.f32 %v438_v7  ;;  %v1124_v24 = vcvt.s32.f32 %v439_v8  ;;  %v242_v28 = vand.u32 1, %v2563_v16 }
  0x22   :  { %3890 = vst [vmem:[#allocation18_spill] sm:$0xff] %v2602_v18  ;;  %v1539_v26 = vunpack.c.l.b16 %v2602_v18  ;;  %v243_v29 = vand.u32 1, %v2565_v17  ;;  %v973_v32 = vcvt.s32.f32 %v240_v9  ;;  %v974_v33 = vcvt.s32.f32 %v241_v25 }
  0x23   :  { %v2611_v30 = vpack.c.bf16 %v1122_v22, %v1121_v21  ;;  %v2613_v31 = vpack.c.bf16 %v1124_v24, %v1123_v23  ;;  %v975_v37 = vcvt.s32.f32 %v242_v28  ;;  %v272_v39 = vshra.s32 %v2559_v14, 1 }
  0x24   :  { %v1555_v36 = vpack.c.b16 %v1539_v26, %v1537_v19  ;;  %v976_v38 = vcvt.s32.f32 %v243_v29  ;;  %v2620_v48 = vpack.c.bf16 %v974_v33, %v973_v32  ;;  %v273_v50 = vshra.s32 %v2561_v15, 1  ;;  %v2639_v32 = vld [vmem:[#allocation6 + $0x20] sm:$0xff] }
  0x25   :  { %3891 = vst [vmem:[#allocation19_spill] sm:$0xff] %v2611_v30  ;;  %v1617_v40 = vunpack.c.l.b16 %v2611_v30  ;;  %v1619_v42 = vunpack.c.l.b16 %v2613_v31  ;;  %v274_v51 = vshra.s32 %v2563_v16, 1  ;;  %v275_v53 = vshra.s32 %v2565_v17, 1 }
  0x26   :  { %3892 = vst [vmem:[#allocation20_spill] sm:$0xff] %v2613_v31  ;;  %2019 = vmatpush.bf16.msra.mxu2 %v1555_v36  ;;  %v2622_v49 = vpack.c.bf16 %v976_v38, %v975_v37  ;;  %v304_v54 = vand.u32 1, %v272_v39  ;;  %v336_v56 = vshra.s32 %v2559_v14, 2  ;;  %v1373_v58 = vunpack.c.l.b16 %v2620_v48 }
  0x27   :  { %3893 = vst [vmem:[#allocation21_spill] sm:$0xff] %v2620_v48  ;;  %v1635_v52 = vpack.c.b16 %v1619_v42, %v1617_v40  ;;  %v305_v60 = vand.u32 1, %v273_v50  ;;  %v306_v61 = vand.u32 1, %v274_v51  ;;  %v307_v62 = vand.u32 1, %v275_v53  ;;  %v2647_v51 = vld [vmem:[#allocation6 + $0x28] sm:$0xff] }
  0x28   :  { %3894 = vst [vmem:[#allocation22_spill] sm:$0xff] %v2622_v49  ;;  %v1375_v59 = vunpack.c.l.b16 %v2622_v49  ;;  %v1021_v63 = vcvt.s32.f32 %v304_v54  ;;  %v337_v0 = vshra.s32 %v2561_v15, 2  ;;  %v338_v1 = vshra.s32 %v2563_v16, 2 }
  0x29   :  { %2038 = vmatpush.bf16.msra.mxu3 %v1635_v52  ;;  %v1022_v3 = vcvt.s32.f32 %v305_v60  ;;  %v1023_v5 = vcvt.s32.f32 %v306_v61  ;;  %v339_v6 = vshra.s32 %v2565_v17, 2  ;;  %v1024_v7 = vcvt.s32.f32 %v307_v62 }
  0x2a   :  { %v1393_v2 = vpack.c.b16 %v1375_v59, %v1373_v58  ;;  %v368_v8 = vand.u32 1, %v336_v56  ;;  %v369_v9 = vand.u32 1, %v337_v0  ;;  %v370_v19 = vand.u32 1, %v338_v1 }
  0x2b   :  { %v2633_v21 = vpack.c.bf16 %v1022_v3, %v1021_v63  ;;  %v371_v22 = vand.u32 1, %v339_v6  ;;  %v400_v23 = vshra.s32 %v2559_v14, 3  ;;  %v401_v24 = vshra.s32 %v2561_v15, 3 }
  0x2c   :  { %1982 = vmatpush.bf16.msra.mxu0 %v1393_v2  ;;  %v2637_v25 = vpack.c.bf16 %v1024_v7, %v1023_v5  ;;  %v1069_v26 = vcvt.s32.f32 %v368_v8  ;;  %v1070_v28 = vcvt.s32.f32 %v369_v9  ;;  %v1071_v29 = vcvt.s32.f32 %v370_v19 }
  0x2d   :  { %3895 = vst [vmem:[#allocation23_spill] sm:$0xff] %v2633_v21  ;;  %v1453_v33 = vunpack.c.l.b16 %v2633_v21  ;;  %v1072_v36 = vcvt.s32.f32 %v371_v22  ;;  %v402_v37 = vshra.s32 %v2563_v16, 3  ;;  %v403_v38 = vshra.s32 %v2565_v17, 3 }
  0x2e   :  { %3896 = vst [vmem:[#allocation24_spill] sm:$0xff] %v2637_v25  ;;  %v1455_v39 = vunpack.c.l.b16 %v2637_v25  ;;  %v2645_v40 = vpack.c.bf16 %v1070_v28, %v1069_v26  ;;  %v432_v42 = vand.u32 1, %v400_v23  ;;  %v433_v50 = vand.u32 1, %v401_v24 }
  0x2f   :  { %v2649_v52 = vpack.c.bf16 %v1072_v36, %v1071_v29  ;;  %v434_v53 = vand.u32 1, %v402_v37  ;;  %v435_v54 = vand.u32 1, %v403_v38  ;;  %v112_v56 = vunpack.c.2.s8 %v2639_v32 }
  0x30   :  { %3897 = vst [vmem:[#allocation25_spill] sm:$0xff] %v2645_v40  ;;  %v1473_v58 = vpack.c.b16 %v1455_v39, %v1453_v33  ;;  %v1533_v59 = vunpack.c.l.b16 %v2645_v40  ;;  %v1117_v60 = vcvt.s32.f32 %v432_v42  ;;  %v1118_v61 = vcvt.s32.f32 %v433_v50 }
  0x31   :  { %3898 = vst [vmem:[#allocation26_spill] sm:$0xff] %v2649_v52  ;;  %v1535_v62 = vunpack.c.l.b16 %v2649_v52  ;;  %v1119_v63 = vcvt.s32.f32 %v434_v53  ;;  %v1120_v0 = vcvt.s32.f32 %v435_v54  ;;  %v113_v1 = vunpack.c.2.s8 %v2647_v51 }
  0x32   :  { %2001 = vmatpush.bf16.msra.mxu1 %v1473_v58  ;;  %v2655_v2 = vpack.c.bf16 %v1118_v61, %v1117_v60  ;;  %v114_v3 = vunpack.c.3.s8 %v2639_v32  ;;  %v115_v5 = vunpack.c.3.s8 %v2647_v51  ;;  %v2659_v6 = vand.u32 255, %v112_v56 }
  0x33   :  { %v1553_v7 = vpack.c.b16 %v1535_v62, %v1533_v59  ;;  %v2661_v8 = vpack.c.bf16 %v1120_v0, %v1119_v63  ;;  %v2663_v9 = vand.u32 255, %v113_v1  ;;  %v108_v19 = vunpack.c.0.s8 %v2639_v32 }
  0x34   :  { %3899 = vst [vmem:[#allocation27_spill] sm:$0xff] %v2655_v2  ;;  %v1613_v22 = vunpack.c.l.b16 %v2655_v2  ;;  %v2667_v23 = vand.u32 255, %v114_v3  ;;  %v2669_v24 = vand.u32 255, %v115_v5  ;;  %v236_v26 = vand.u32 1, %v2659_v6 }
  0x35   :  { %3900 = vst [vmem:[#allocation28_spill] sm:$0xff] %v2661_v8  ;;  %2020 = vmatpush.bf16.msra.mxu2 %v1553_v7  ;;  %v1615_v28 = vunpack.c.l.b16 %v2661_v8  ;;  %v237_v29 = vand.u32 1, %v2663_v9  ;;  %v268_v33 = vshra.s32 %v2659_v6, 1  ;;  %v269_v36 = vshra.s32 %v2663_v9, 1 }
  0x36   :  { %v238_v37 = vand.u32 1, %v2667_v23  ;;  %v239_v38 = vand.u32 1, %v2669_v24  ;;  %v969_v39 = vcvt.s32.f32 %v236_v26  ;;  %v270_v42 = vshra.s32 %v2667_v23, 1 }
  0x37   :  { %v1633_v50 = vpack.c.b16 %v1615_v28, %v1613_v22  ;;  %v970_v53 = vcvt.s32.f32 %v237_v29  ;;  %v271_v54 = vshra.s32 %v2669_v24, 1  ;;  %v300_v56 = vand.u32 1, %v268_v33 }
  0x38   :  { %v971_v58 = vcvt.s32.f32 %v238_v37  ;;  %v972_v59 = vcvt.s32.f32 %v239_v38  ;;  %v301_v60 = vand.u32 1, %v269_v36  ;;  %v302_v61 = vand.u32 1, %v270_v42 }
  0x39   :  { %2039 = vmatpush.bf16.msra.mxu3 %v1633_v50  ;;  %v2680_v62 = vpack.c.bf16 %v970_v53, %v969_v39  ;;  %v303_v63 = vand.u32 1, %v271_v54  ;;  %v1017_v0 = vcvt.s32.f32 %v300_v56  ;;  %v332_v1 = vshra.s32 %v2659_v6, 2 }
  0x3a   :  { %v2683_v3 = vpack.c.bf16 %v972_v59, %v971_v58  ;;  %v1018_v5 = vcvt.s32.f32 %v301_v60  ;;  %v1019_v7 = vcvt.s32.f32 %v302_v61  ;;  %v333_v22 = vshra.s32 %v2663_v9, 2 }
  0x3b   :  { %3901 = vst [vmem:[#allocation29_spill] sm:$0xff] %v2680_v62  ;;  %v1369_v26 = vunpack.c.l.b16 %v2680_v62  ;;  %v1020_v28 = vcvt.s32.f32 %v303_v63  ;;  %v334_v29 = vshra.s32 %v2667_v23, 2  ;;  %v335_v33 = vshra.s32 %v2669_v24, 2 }
  0x3c   :  { %3902 = vst [vmem:[#allocation30_spill] sm:$0xff] %v2683_v3  ;;  %v1371_v36 = vunpack.c.l.b16 %v2683_v3  ;;  %v2690_v37 = vpack.c.bf16 %v1018_v5, %v1017_v0  ;;  %v364_v38 = vand.u32 1, %v332_v1  ;;  %v365_v39 = vand.u32 1, %v333_v22 }
  0x3d   :  { %v2692_v42 = vpack.c.bf16 %v1020_v28, %v1019_v7  ;;  %v366_v50 = vand.u32 1, %v334_v29  ;;  %v367_v53 = vand.u32 1, %v335_v33  ;;  %v396_v54 = vshra.s32 %v2659_v6, 3 }
  0x3e   :  { %3903 = vst [vmem:[#allocation31_spill] sm:$0xff] %v2690_v37  ;;  %v1391_v56 = vpack.c.b16 %v1371_v36, %v1369_v26  ;;  %v1449_v58 = vunpack.c.l.b16 %v2690_v37  ;;  %v1065_v59 = vcvt.s32.f32 %v364_v38  ;;  %v1066_v60 = vcvt.s32.f32 %v365_v39 }
  0x3f   :  { %3904 = vst [vmem:[#allocation32_spill] sm:$0xff] %v2692_v42  ;;  %v1451_v61 = vunpack.c.l.b16 %v2692_v42  ;;  %v1067_v63 = vcvt.s32.f32 %v366_v50  ;;  %v1068_v44 = vcvt.s32.f32 %v367_v53  ;;  %v397_v0 = vshra.s32 %v2663_v9, 3 }
  0x40   :  { %1983 = vmatpush.bf16.msra.mxu0 %v1391_v56  ;;  %v2698_v1 = vpack.c.bf16 %v1066_v60, %v1065_v59  ;;  %v398_v5 = vshra.s32 %v2667_v23, 3  ;;  %v399_v7 = vshra.s32 %v2669_v24, 3  ;;  %v428_v22 = vand.u32 1, %v396_v54  ;;  %v2709_v54 = vld [vmem:[#allocation3] sm:$0xff] }
  0x41   :  { %v1471_v28 = vpack.c.b16 %v1451_v61, %v1449_v58  ;;  %v2702_v26 = vpack.c.bf16 %v1068_v44, %v1067_v63  ;;  %v429_v29 = vand.u32 1, %v397_v0  ;;  %v109_v33 = vunpack.c.0.s8 %v2647_v51 }
  0x42   :  { %3905 = vst [vmem:[#allocation33_spill] sm:$0xff] %v2698_v1  ;;  %v1529_v36 = vunpack.c.l.b16 %v2698_v1  ;;  %v430_v38 = vand.u32 1, %v398_v5  ;;  %v431_v39 = vand.u32 1, %v399_v7  ;;  %v1113_v50 = vcvt.s32.f32 %v428_v22 }
  0x43   :  { %3906 = vst [vmem:[#allocation34_spill] sm:$0xff] %v2702_v26  ;;  %2002 = vmatpush.bf16.msra.mxu1 %v1471_v28  ;;  %v1531_v53 = vunpack.c.l.b16 %v2702_v26  ;;  %v1114_v56 = vcvt.s32.f32 %v429_v29  ;;  %v110_v59 = vunpack.c.1.s8 %v2639_v32  ;;  %v111_v60 = vunpack.c.1.s8 %v2647_v51 }
  0x44   :  { %v1115_v44 = vcvt.s32.f32 %v430_v38  ;;  %v1116_v58 = vcvt.s32.f32 %v431_v39  ;;  %v2713_v61 = vand.u32 255, %v108_v19  ;;  %v2715_v63 = vand.u32 255, %v109_v33 }
  0x45   :  { %v1551_v0 = vpack.c.b16 %v1531_v53, %v1529_v36  ;;  %v2717_v5 = vpack.c.bf16 %v1114_v56, %v1113_v50  ;;  %v2719_v7 = vand.u32 255, %v110_v59  ;;  %v2721_v22 = vand.u32 255, %v111_v60 }
  0x46   :  { %v2723_v28 = vpack.c.bf16 %v1116_v58, %v1115_v44  ;;  %v232_v51 = vand.u32 1, %v2713_v61  ;;  %v233_v29 = vand.u32 1, %v2715_v63  ;;  %v78_v38 = vunpack.c.2.s8 %v2709_v54 }
  0x47   :  { %3907 = vst [vmem:[#allocation35_spill] sm:$0xff] %v2717_v5  ;;  %2021 = vmatpush.bf16.msra.mxu2 %v1551_v0  ;;  %v1609_v32 = vunpack.c.l.b16 %v2717_v5  ;;  %v234_v19 = vand.u32 1, %v2719_v7  ;;  %v235_v33 = vand.u32 1, %v2721_v22  ;;  %v76_v36 = vunpack.c.0.s8 %v2709_v54 }
  0x48   :  { %3908 = vst [vmem:[#allocation36_spill] sm:$0xff] %v2723_v28  ;;  %v1611_v39 = vunpack.c.l.b16 %v2723_v28  ;;  %v965_v50 = vcvt.s32.f32 %v232_v51  ;;  %v966_v53 = vcvt.s32.f32 %v233_v29  ;;  %v2733_v56 = vand.u32 255, %v78_v38 }
  0x49   :  { %v967_v59 = vcvt.s32.f32 %v234_v19  ;;  %v968_v60 = vcvt.s32.f32 %v235_v33  ;;  %v2735_v44 = vand.u32 255, %v76_v36  ;;  %v264_v58 = vshra.s32 %v2713_v61, 1 }
  0x4a   :  { %v1631_v0 = vpack.c.b16 %v1611_v39, %v1609_v32  ;;  %v2738_v41 = vpack.c.bf16 %v966_v53, %v965_v50  ;;  %v3752_v57 = vand.u32 1, %v2733_v56  ;;  %v162_v55 = vshra.s32 %v2733_v56, 1 }
  0x4b   :  { %v2742_v27 = vpack.c.bf16 %v968_v60, %v967_v59  ;;  %v170_v51 = vshra.s32 %v2733_v56, 2  ;;  %v178_v29 = vshra.s32 %v2733_v56, 3  ;;  %v186_v38 = vshra.s32 %v2733_v56, 4 }
  0x4c   :  { %3909 = vst [vmem:[#allocation37_spill] sm:$0xff] %v2738_v41  ;;  %2040 = vmatpush.bf16.msra.mxu3 %v1631_v0  ;;  %v1365_v19 = vunpack.c.l.b16 %v2738_v41  ;;  %v2748_v33 = vand.u32 1, %v162_v55  ;;  %v194_v32 = vshra.s32 %v2733_v56, 5  ;;  %v202_v36 = vshra.s32 %v2733_v56, 6 }
  0x4d   :  { %3910 = vst [vmem:[#allocation38_spill] sm:$0xff] %v2742_v27  ;;  %v1367_v39 = vunpack.c.l.b16 %v2742_v27  ;;  %v2753_v50 = vand.u32 1, %v170_v51  ;;  %v2755_v53 = vand.u32 1, %v178_v29  ;;  %v2757_v59 = vand.u32 1, %v186_v38 }
  0x4e   :  { %v2759_v60 = vand.u32 1, %v194_v32  ;;  %v2761_v20 = vand.u32 1, %v202_v36  ;;  %v210_v0 = vshra.s32 %v2733_v56, 7  ;;  %v698_v55 = vadd.s32 %v2748_v33, %v3752_v57 }
  0x4f   :  { %3911 = vst [vmem:[#allocation39_spill] sm:$0xff] %v2753_v50  ;;  %v1389_v45 = vpack.c.b16 %v1367_v39, %v1365_v19  ;;  %v160_v51 = vshra.s32 %v2735_v44, 1  ;;  %v168_v29 = vshra.s32 %v2735_v44, 2  ;;  %v176_v32 = vshra.s32 %v2735_v44, 3 }
  0x50   :  { %3912 = vst [vmem:[#allocation40_spill] sm:$0xff] %v2755_v53  ;;  %v2770_v27 = vand.u32 1, %v210_v0  ;;  %v702_v38 = vadd.s32 %v698_v55, %v2753_v50  ;;  %v184_v36 = vshra.s32 %v2735_v44, 4  ;;  %v192_v19 = vshra.s32 %v2735_v44, 5 }
  0x51   :  { %3913 = vst [vmem:[#allocation41_spill] sm:$0xff] %v2757_v59  ;;  %1984 = vmatpush.bf16.msra.mxu0 %v1389_v45  ;;  %v2775_v41 = vand.u32 1, %v160_v51  ;;  %v2777_v28 = vand.u32 1, %v168_v29  ;;  %v200_v39 = vshra.s32 %v2735_v44, 6  ;;  %v2782_v43 = vand.u32 1, %v176_v32 }
  0x52   :  { %3914 = vst [vmem:[#allocation42_spill] sm:$0xff] %v2759_v60  ;;  %v706_v57 = vadd.s32 %v702_v38, %v2755_v53  ;;  %v2784_v0 = vand.u32 1, %v184_v36  ;;  %v208_v55 = vshra.s32 %v2735_v44, 7  ;;  %v2787_v5 = vand.u32 1, %v192_v19 }
  0x53   :  { %3915 = vst [vmem:[#allocation43_spill] sm:$0xff] %v2761_v20  ;;  %v2789_v42 = vand.u32 1, %v200_v39  ;;  %v3920_v45 = vand.u32 1, %v2735_v44  ;;  %v265_v29 = vshra.s32 %v2715_v63, 1  ;;  %v266_v38 = vshra.s32 %v2719_v7, 1 }
  0x54   :  { %3916 = vst [vmem:[#allocation44_spill] sm:$0xff] %v2770_v27  ;;  %v710_v37 = vadd.s32 %v706_v57, %v2757_v59  ;;  %v2796_v26 = vand.u32 1, %v208_v55  ;;  %v267_v32 = vshra.s32 %v2721_v22, 1  ;;  %v296_v19 = vand.u32 1, %v264_v58 }
  0x55   :  { %3917 = vst [vmem:[#allocation45_spill] sm:$0xff] %v2784_v0  ;;  %v696_v51 = vadd.s32 %v2775_v41, %v3920_v45  ;;  %v297_v1 = vand.u32 1, %v265_v29  ;;  %v328_v39 = vshra.s32 %v2713_v61, 2  ;;  %v298_v62 = vand.u32 1, %v266_v38 }
  0x56   :  { %3918 = vst [vmem:[#allocation46_spill] sm:$0xff] %v2787_v5  ;;  %v714_v3 = vadd.s32 %v710_v37, %v2759_v60  ;;  %v299_v8 = vand.u32 1, %v267_v32  ;;  %v1013_v55 = vcvt.s32.f32 %v296_v19  ;;  %v329_v2 = vshra.s32 %v2715_v63, 2 }
  0x57   :  { %3919 = vst [vmem:[#allocation47_spill] sm:$0xff] %v2789_v42  ;;  %v700_v36 = vadd.s32 %v696_v51, %v2777_v28  ;;  %v1014_v59 = vcvt.s32.f32 %v297_v1  ;;  %v1015_v21 = vcvt.s32.f32 %v298_v62  ;;  %v330_v58 = vshra.s32 %v2719_v7, 2 }
  0x58   :  { %3921 = vst [vmem:[#allocation48_spill] sm:$0xff] %v2796_v26  ;;  %v718_v25 = vadd.s32 %v714_v3, %v2761_v20  ;;  %v1016_v51 = vcvt.s32.f32 %v299_v8  ;;  %v331_v37 = vshra.s32 %v2721_v22, 2  ;;  %v360_v38 = vand.u32 1, %v328_v39 }
  0x59   :  { %v704_v57 = vadd.s32 %v700_v36, %v2782_v43  ;;  %v2809_v52 = vpack.c.bf16 %v1014_v59, %v1013_v55  ;;  %v361_v1 = vand.u32 1, %v329_v2  ;;  %v362_v19 = vand.u32 1, %v330_v58 }
  0x5a   :  { %v2813_v32 = vadd.s32 %v718_v25, %v2770_v27  ;;  %v2815_v36 = vpack.c.bf16 %v1016_v51, %v1015_v21  ;;  %v363_v62 = vand.u32 1, %v331_v37  ;;  %v1061_v45 = vcvt.s32.f32 %v360_v38  ;;  %v2824_v51 = vld [vmem:[#allocation6 + $0x10] sm:$0xff] }
  0x5b   :  { %v708_v29 = vadd.s32 %v704_v57, %v2784_v0  ;;  %3922 = vst [vmem:[#allocation49_spill] sm:$0xff] %v2809_v52  ;;  %v1445_v8 = vunpack.c.l.b16 %v2809_v52  ;;  %v1062_v55 = vcvt.s32.f32 %v361_v1  ;;  %v1063_v20 = vcvt.s32.f32 %v362_v19 }
  0x5c   :  { %3923 = vst [vmem:[#allocation50_spill] sm:$0xff] %v2815_v36  ;;  %v753_v57 = vshrl.u32 %v2813_v32, 16  ;;  %v1447_v59 = vunpack.c.l.b16 %v2815_v36  ;;  %v1064_v25 = vcvt.s32.f32 %v363_v62  ;;  %v392_v21 = vshra.s32 %v2713_v61, 3 }
  0x5d   :  { %v712_v3 = vadd.s32 %v708_v29, %v2787_v5  ;;  %v393_v2 = vshra.s32 %v2715_v63, 3  ;;  %v2826_v27 = vpack.c.bf16 %v1062_v55, %v1061_v45  ;;  %v394_v37 = vshra.s32 %v2719_v7, 3 }
  0x5e   :  { %v755_v58 = vcvt.s32.f32 %v753_v57  ;;  %v1469_v29 = vpack.c.b16 %v1447_v59, %v1445_v8  ;;  %v2830_v60 = vpack.c.bf16 %v1064_v25, %v1063_v20  ;;  %v395_v1 = vshra.s32 %v2721_v22, 3 }
  0x5f   :  { %v716_v39 = vadd.s32 %v712_v3, %v2789_v42  ;;  %3924 = vst [vmem:[#allocation51_spill] sm:$0xff] %v2826_v27  ;;  %v424_v19 = vand.u32 1, %v392_v21  ;;  %v2833_v3 = vld [vmem:[#allocation6 + $0x18] sm:$0xff]  ;;  %v1525_v62 = vunpack.c.l.b16 %v2826_v27  ;;  %v425_v36 = vand.u32 1, %v393_v2 }
  0x60   :  { %3925 = vst [vmem:[#allocation52_spill] sm:$0xff] %v2830_v60  ;;  %758 = vadd.xlane.f32.xlu1 %v755_v58  ;;  %2003 = vmatpush.bf16.msra.mxu1 %v1469_v29  ;;  %v426_v57 = vand.u32 1, %v394_v37  ;;  %v104_v45 = vunpack.c.2.s8 %v2824_v51  ;;  %v1527_v59 = vunpack.c.l.b16 %v2830_v60  ;;  %v427_v55 = vand.u32 1, %v395_v1 }
  0x61   :  { %v720_v38 = vadd.s32 %v716_v39, %v2796_v26  ;;  %v1109_v39 = vcvt.s32.f32 %v424_v19  ;;  %v1110_v20 = vcvt.s32.f32 %v425_v36  ;;  %v105_v21 = vunpack.c.2.s8 %v2833_v3 }
  0x62   :  { %v1111_v25 = vcvt.s32.f32 %v426_v57  ;;  %v1549_v49 = vpack.c.b16 %v1527_v59, %v1525_v62  ;;  %v1112_v58 = vcvt.s32.f32 %v427_v55  ;;  %v106_v29 = vunpack.c.3.s8 %v2824_v51 }
  0x63   :  { %v729_v8 = vshrl.u32 %v720_v38, 16  ;;  %v728_v52 = vand.u32 65535, %v720_v38  ;;  %v2840_v27 = vpack.c.bf16 %v1110_v20, %v1109_v39  ;;  %v107_v37 = vunpack.c.3.s8 %v2833_v3 }
  0x64   :  { %v2843_v48 = vand.u32 255, %v104_v45  ;;  %2022 = vmatpush.bf16.msra.mxu2 %v1549_v49  ;;  %v2845_v1 = vpack.c.bf16 %v1112_v58, %v1111_v25  ;;  %v2847_v36 = vand.u32 255, %v105_v21  ;;  %v2849_v38 = vand.u32 255, %v106_v29 }
  0x65   :  { %v731_v40 = vcvt.s32.f32 %v729_v8  ;;  %3926 = vst [vmem:[#allocation53_spill] sm:$0xff] %v2840_v27  ;;  %v730_v2 = vcvt.s32.f32 %v728_v52  ;;  %v1605_v62 = vunpack.c.l.b16 %v2840_v27  ;;  %v2853_v57 = vand.u32 255, %v107_v37 }
  0x66   :  { %3927 = vst [vmem:[#allocation54_spill] sm:$0xff] %v2845_v1  ;;  %v228_v52 = vand.u32 1, %v2843_v48  ;;  %v260_v45 = vshra.s32 %v2843_v48, 1  ;;  %v229_v49 = vand.u32 1, %v2847_v36  ;;  %v230_v8 = vand.u32 1, %v2849_v38 }
  0x67   :  { %734 = vadd.xlane.f32.xlu0 %v731_v40  ;;  %732 = vadd.xlane.f32.xlu2 %v730_v2  ;;  %v1607_v40 = vunpack.c.l.b16 %v2845_v1  ;;  %v261_v59 = vshra.s32 %v2847_v36, 1  ;;  %v231_v55 = vand.u32 1, %v2853_v57  ;;  %v262_v20 = vshra.s32 %v2849_v38, 1 }
  0x68   :  { %v961_v39 = vcvt.s32.f32 %v228_v52  ;;  %v263_v25 = vshra.s32 %v2853_v57, 1  ;;  %v962_v58 = vcvt.s32.f32 %v229_v49  ;;  %v963_v29 = vcvt.s32.f32 %v230_v8 }
  0x69   :  { %v1629_v21 = vpack.c.b16 %v1607_v40, %v1605_v62  ;;  %v292_v2 = vand.u32 1, %v260_v45  ;;  %v964_v37 = vcvt.s32.f32 %v231_v55  ;;  %v293_v19 = vand.u32 1, %v261_v59 }
  0x6a   :  { %v294_v1 = vand.u32 1, %v262_v20  ;;  %v295_v27 = vand.u32 1, %v263_v25  ;;  %v2864_v60 = vpack.c.bf16 %v962_v58, %v961_v39  ;;  %v324_v30 = vshra.s32 %v2843_v48, 2 }
  0x6b   :  { %2041 = vmatpush.bf16.msra.mxu3 %v1629_v21  ;;  %v1009_v31 = vcvt.s32.f32 %v292_v2  ;;  %v325_v52 = vshra.s32 %v2847_v36, 2  ;;  %v2868_v47 = vpack.c.bf16 %v964_v37, %v963_v29  ;;  %v1010_v46 = vcvt.s32.f32 %v293_v19 }
  0x6c   :  { %3928 = vst [vmem:[#allocation55_spill] sm:$0xff] %v2864_v60  ;;  %v1011_v18 = vcvt.s32.f32 %v294_v1  ;;  %v1012_v62 = vcvt.s32.f32 %v295_v27  ;;  %v1361_v40 = vunpack.c.l.b16 %v2864_v60  ;;  %v326_v45 = vshra.s32 %v2849_v38, 2 }
  0x6d   :  { %3929 = vst [vmem:[#allocation56_spill] sm:$0xff] %v2868_v47  ;;  %v327_v49 = vshra.s32 %v2853_v57, 2  ;;  %v356_v8 = vand.u32 1, %v324_v30  ;;  %v1363_v59 = vunpack.c.l.b16 %v2868_v47  ;;  %v2874_v55 = vpack.c.bf16 %v1010_v46, %v1009_v31 }
  0x6e   :  { %v2876_v39 = vpack.c.bf16 %v1012_v62, %v1011_v18  ;;  %v357_v20 = vand.u32 1, %v325_v52  ;;  %v358_v25 = vand.u32 1, %v326_v45  ;;  %v388_v1 = vshra.s32 %v2843_v48, 3 }
  0x6f   :  { %3930 = vst [vmem:[#allocation57_spill] sm:$0xff] %v2874_v55  ;;  %v359_v21 = vand.u32 1, %v327_v49  ;;  %v1057_v58 = vcvt.s32.f32 %v356_v8  ;;  %v1387_v27 = vpack.c.b16 %v1363_v59, %v1361_v40  ;;  %v1441_v19 = vunpack.c.l.b16 %v2874_v55 }
  0x70   :  { %3931 = vst [vmem:[#allocation58_spill] sm:$0xff] %v2876_v39  ;;  %v1443_v29 = vunpack.c.l.b16 %v2876_v39  ;;  %v1058_v2 = vcvt.s32.f32 %v357_v20  ;;  %v1059_v37 = vcvt.s32.f32 %v358_v25  ;;  %v389_v47 = vshra.s32 %v2847_v36, 3 }
  0x71   :  { %v1060_v30 = vcvt.s32.f32 %v359_v21  ;;  %v390_v46 = vshra.s32 %v2849_v38, 3  ;;  %1985 = vmatpush.bf16.msra.mxu0 %v1387_v27  ;;  %v391_v52 = vshra.s32 %v2853_v57, 3  ;;  %v420_v62 = vand.u32 1, %v388_v1 }
  0x72   :  { %v1467_v18 = vpack.c.b16 %v1443_v29, %v1441_v19  ;;  %v2883_v31 = vpack.c.bf16 %v1058_v2, %v1057_v58  ;;  %v421_v40 = vand.u32 1, %v389_v47  ;;  %v101_v8 = vunpack.c.0.s8 %v2833_v3 }
  0x73   :  { %v2886_v45 = vpack.c.bf16 %v1060_v30, %v1059_v37  ;;  %v422_v49 = vand.u32 1, %v390_v46  ;;  %v423_v20 = vand.u32 1, %v391_v52  ;;  %v1105_v25 = vcvt.s32.f32 %v420_v62 }
  0x74   :  { %3932 = vst [vmem:[#allocation59_spill] sm:$0xff] %v2883_v31  ;;  %2004 = vmatpush.bf16.msra.mxu1 %v1467_v18  ;;  %v1521_v59 = vunpack.c.l.b16 %v2883_v31  ;;  %v102_v21 = vunpack.c.1.s8 %v2824_v51  ;;  %v1106_v58 = vcvt.s32.f32 %v421_v40  ;;  %v103_v29 = vunpack.c.1.s8 %v2833_v3 }
  0x75   :  { %3933 = vst [vmem:[#allocation60_spill] sm:$0xff] %v2886_v45  ;;  %v1523_v27 = vunpack.c.l.b16 %v2886_v45  ;;  %v1107_v19 = vcvt.s32.f32 %v422_v49  ;;  %v1108_v1 = vcvt.s32.f32 %v423_v20  ;;  %v3934_v2 = vunpack.c.0.s8 %v2824_v51 }
  0x76   :  { %v2897_v37 = vand.u32 255, %v101_v8  ;;  %v2899_v30 = vand.u32 255, %v102_v21  ;;  %v2901_v18 = vpack.c.bf16 %v1106_v58, %v1105_v25  ;;  %v2903_v52 = vand.u32 255, %v103_v29 }
  0x77   :  { %v2895_v47 = vand.u32 255, %v3934_v2  ;;  %v1547_v46 = vpack.c.b16 %v1523_v27, %v1521_v59  ;;  %v79_v62 = vunpack.c.3.s8 %v2709_v54  ;;  %v2906_v40 = vpack.c.bf16 %v1108_v1, %v1107_v19 }
  0x78   :  { %3936 = vst [vmem:[#allocation62_spill] sm:$0xff] %v2897_v37  ;;  %v225_v49 = vand.u32 1, %v2897_v37  ;;  %v226_v51 = vand.u32 1, %v2899_v30  ;;  %v1601_v8 = vunpack.c.l.b16 %v2901_v18  ;;  %v227_v20 = vand.u32 1, %v2903_v52 }
  0x79   :  { %3935 = vst [vmem:[#allocation61_spill] sm:$0xff] %v2895_v47  ;;  %v224_v3 = vand.u32 1, %v2895_v47  ;;  %2023 = vmatpush.bf16.msra.mxu2 %v1547_v46  ;;  %v2913_v59 = vand.u32 255, %v79_v62  ;;  %v77_v25 = vunpack.c.1.s8 %v2709_v54  ;;  %v1603_v21 = vunpack.c.l.b16 %v2906_v40 }
  0x7a   :  { %3937 = vst [vmem:[#allocation63_spill] sm:$0xff] %v2899_v30  ;;  %v958_v58 = vcvt.s32.f32 %v225_v49  ;;  %v959_v19 = vcvt.s32.f32 %v226_v51  ;;  %v960_v29 = vcvt.s32.f32 %v227_v20 }
  0x7b   :  { %3938 = vst [vmem:[#allocation64_spill] sm:$0xff] %v2901_v18  ;;  %v957_v27 = vcvt.s32.f32 %v224_v3  ;;  %v3792_v1 = vand.u32 1, %v2913_v59  ;;  %v163_v2 = vshra.s32 %v2913_v59, 1  ;;  %v171_v46 = vshra.s32 %v2913_v59, 2 }
  0x7c   :  { %3939 = vst [vmem:[#allocation65_spill] sm:$0xff] %v2903_v52  ;;  %v1627_v39 = vpack.c.b16 %v1603_v21, %v1601_v8  ;;  %v179_v62 = vshra.s32 %v2913_v59, 3  ;;  %v187_v55 = vshra.s32 %v2913_v59, 4  ;;  %v2924_v54 = vpack.c.bf16 %v960_v29, %v959_v19 }
  0x7d   :  { %3940 = vst [vmem:[#allocation66_spill] sm:$0xff] %v2906_v40  ;;  %v2920_v18 = vpack.c.bf16 %v958_v58, %v957_v27  ;;  %v2926_v40 = vand.u32 1, %v163_v2  ;;  %v2928_v3 = vand.u32 1, %v171_v46  ;;  %v195_v49 = vshra.s32 %v2913_v59, 5 }
  0x7e   :  { %3942 = vst [vmem:[#allocation68_spill] sm:$0xff] %v2924_v54  ;;  %2042 = vmatpush.bf16.msra.mxu3 %v1627_v39  ;;  %v2932_v20 = vand.u32 1, %v179_v62  ;;  %v2934_v8 = vand.u32 1, %v187_v55  ;;  %v203_v21 = vshra.s32 %v2913_v59, 6  ;;  %v1359_v27 = vunpack.c.l.b16 %v2924_v54 }
  0x7f   :  { %3941 = vst [vmem:[#allocation67_spill] sm:$0xff] %v2920_v18  ;;  %v1357_v51 = vunpack.c.l.b16 %v2920_v18  ;;  %v2938_v58 = vand.u32 1, %v195_v49  ;;  %v211_v19 = vshra.s32 %v2913_v59, 7  ;;  %v699_v29 = vadd.s32 %v2926_v40, %v3792_v1 }
  0x80   :  { %3943 = vst [vmem:[#allocation69_spill] sm:$0xff] %v2926_v40  ;;  %v2944_v2 = vand.u32 1, %v203_v21  ;;  %v2946_v39 = vand.u32 255, %v77_v25  ;;  %v256_v46 = vshra.s32 %v2895_v47, 1  ;;  %v257_v55 = vshra.s32 %v2897_v37, 1 }
  0x81   :  { %3944 = vst [vmem:[#allocation70_spill] sm:$0xff] %v2928_v3  ;;  %v1385_v62 = vpack.c.b16 %v1359_v27, %v1357_v51  ;;  %v2950_v18 = vand.u32 1, %v211_v19  ;;  %v703_v49 = vadd.s32 %v699_v29, %v2928_v3  ;;  %v258_v54 = vshra.s32 %v2899_v30, 1 }
  0x82   :  { %3945 = vst [vmem:[#allocation71_spill] sm:$0xff] %v2932_v20  ;;  %v161_v31 = vshra.s32 %v2946_v39, 1  ;;  %v169_v21 = vshra.s32 %v2946_v39, 2  ;;  %v177_v25 = vshra.s32 %v2946_v39, 3  ;;  %v185_v60 = vshra.s32 %v2946_v39, 4 }
  0x83   :  { %3946 = vst [vmem:[#allocation72_spill] sm:$0xff] %v2934_v8  ;;  %1986 = vmatpush.bf16.msra.mxu0 %v1385_v62  ;;  %v707_v1 = vadd.s32 %v703_v49, %v2932_v20  ;;  %v193_v51 = vshra.s32 %v2946_v39, 5  ;;  %v201_v27 = vshra.s32 %v2946_v39, 6  ;;  %v209_v4 = vshra.s32 %v2946_v39, 7 }
  0x84   :  { %3947 = vst [vmem:[#allocation73_spill] sm:$0xff] %v2938_v58  ;;  %v2962_v19 = vand.u32 1, %v161_v31  ;;  %v2964_v29 = vand.u32 1, %v169_v21  ;;  %v2966_v45 = vand.u32 1, %v177_v25  ;;  %v2970_v42 = vand.u32 1, %v185_v60 }
  0x85   :  { %3948 = vst [vmem:[#allocation74_spill] sm:$0xff] %v2944_v2  ;;  %v711_v26 = vadd.s32 %v707_v1, %v2934_v8  ;;  %v2972_v62 = vand.u32 1, %v193_v51  ;;  %v2974_v49 = vand.u32 1, %v201_v27  ;;  %v2976_v5 = vand.u32 1, %v209_v4 }
  0x86   :  { %3949 = vst [vmem:[#allocation75_spill] sm:$0xff] %v2950_v18  ;;  %v3954_v35 = vand.u32 1, %v2946_v39  ;;  %v259_v21 = vshra.s32 %v2903_v52, 1  ;;  %v288_v25 = vand.u32 1, %v256_v46  ;;  %v289_v0 = vand.u32 1, %v257_v55 }
  0x87   :  { %3950 = vst [vmem:[#allocation76_spill] sm:$0xff] %v2970_v42  ;;  %v715_v34 = vadd.s32 %v711_v26, %v2938_v58  ;;  %v290_v20 = vand.u32 1, %v258_v54  ;;  %v320_v60 = vshra.s32 %v2895_v47, 2  ;;  %v321_v4 = vshra.s32 %v2897_v37, 2 }
  0x88   :  { %3951 = vst [vmem:[#allocation77_spill] sm:$0xff] %v2972_v62  ;;  %v697_v31 = vadd.s32 %v2962_v19, %v3954_v35  ;;  %v291_v51 = vand.u32 1, %v259_v21  ;;  %v1005_v27 = vcvt.s32.f32 %v288_v25  ;;  %v1006_v53 = vcvt.s32.f32 %v289_v0 }
  0x89   :  { %3952 = vst [vmem:[#allocation78_spill] sm:$0xff] %v2974_v49  ;;  %v719_v8 = vadd.s32 %v715_v34, %v2944_v2  ;;  %v1007_v3 = vcvt.s32.f32 %v290_v20  ;;  %v322_v35 = vshra.s32 %v2899_v30, 2  ;;  %v323_v26 = vshra.s32 %v2903_v52, 2 }
  0x8a   :  { %3953 = vst [vmem:[#allocation79_spill] sm:$0xff] %v2976_v5  ;;  %v701_v1 = vadd.s32 %v697_v31, %v2964_v29  ;;  %v1008_v50 = vcvt.s32.f32 %v291_v51  ;;  %v352_v54 = vand.u32 1, %v320_v60  ;;  %v2993_v31 = vpack.c.bf16 %v1006_v53, %v1005_v27 }
  0x8b   :  { %v2991_v55 = vadd.s32 %v719_v8, %v2950_v18  ;;  %v353_v21 = vand.u32 1, %v321_v4  ;;  %v354_v25 = vand.u32 1, %v322_v35  ;;  %v355_v0 = vand.u32 1, %v323_v26 }
  0x8c   :  { %v705_v46 = vadd.s32 %v701_v1, %v2966_v45  ;;  %3955 = vst [vmem:[#allocation80_spill] sm:$0xff] %v2993_v31  ;;  %v2996_v34 = vpack.c.bf16 %v1008_v50, %v1007_v3  ;;  %v1053_v20 = vcvt.s32.f32 %v352_v54  ;;  %v1437_v1 = vunpack.c.l.b16 %v2993_v31 }
  0x8d   :  { %v765_v2 = vshrl.u32 %v2991_v55, 16  ;;  %v1054_v51 = vcvt.s32.f32 %v353_v21  ;;  %v1055_v40 = vcvt.s32.f32 %v354_v25  ;;  %v1056_v53 = vcvt.s32.f32 %v355_v0  ;;  %v3013_v25 = vld [vmem:[#allocation6 + $0x8] sm:$0xff] }
  0x8e   :  { %v709_v58 = vadd.s32 %v705_v46, %v2970_v42  ;;  %3956 = vst [vmem:[#allocation81_spill] sm:$0xff] %v2996_v34  ;;  %v1439_v8 = vunpack.c.l.b16 %v2996_v34  ;;  %v384_v27 = vshra.s32 %v2895_v47, 3  ;;  %v385_v50 = vshra.s32 %v2897_v37, 3  ;;  %v3007_v46 = vld [vmem:[#allocation6] sm:$0xff] }
  0x8f   :  { %v767_v4 = vcvt.s32.f32 %v765_v2  ;;  %v3003_v35 = vpack.c.bf16 %v1054_v51, %v1053_v20  ;;  %v386_v3 = vshra.s32 %v2899_v30, 3  ;;  %v3010_v21 = vpack.c.bf16 %v1056_v53, %v1055_v40 }
  0x90   :  { %v713_v60 = vadd.s32 %v709_v58, %v2972_v62  ;;  %v1465_v54 = vpack.c.b16 %v1439_v8, %v1437_v1  ;;  %v387_v58 = vshra.s32 %v2903_v52, 3  ;;  %v416_v0 = vand.u32 1, %v384_v27 }
  0x91   :  { %3957 = vst [vmem:[#allocation82_spill] sm:$0xff] %v3003_v35  ;;  %770 = vadd.xlane.f32.xlu1 %v767_v4  ;;  %v1517_v2 = vunpack.c.l.b16 %v3003_v35  ;;  %v417_v20 = vand.u32 1, %v385_v50  ;;  %v418_v51 = vand.u32 1, %v386_v3  ;;  %v1519_v31 = vunpack.c.l.b16 %v3010_v21 }
  0x92   :  { %v717_v26 = vadd.s32 %v713_v60, %v2974_v49  ;;  %3958 = vst [vmem:[#allocation83_spill] sm:$0xff] %v3010_v21  ;;  %2005 = vmatpush.bf16.msra.mxu1 %v1465_v54  ;;  %v419_v18 = vand.u32 1, %v387_v58  ;;  %v96_v1 = vunpack.c.2.s8 %v3007_v46  ;;  %v1101_v40 = vcvt.s32.f32 %v416_v0 }
  0x93   :  { %v1102_v60 = vcvt.s32.f32 %v417_v20  ;;  %v1103_v8 = vcvt.s32.f32 %v418_v51  ;;  %v97_v53 = vunpack.c.2.s8 %v3013_v25  ;;  %v1545_v4 = vpack.c.b16 %v1519_v31, %v1517_v2 }
  0x94   :  { %v721_v34 = vadd.s32 %v717_v26, %v2976_v5  ;;  %v1104_v62 = vcvt.s32.f32 %v419_v18  ;;  %v98_v50 = vunpack.c.3.s8 %v3007_v46  ;;  %v99_v3 = vunpack.c.3.s8 %v3013_v25 }
  0x95   :  { %v3020_v27 = vpack.c.bf16 %v1102_v60, %v1101_v40  ;;  %v3024_v26 = vand.u32 255, %v96_v1  ;;  %2024 = vmatpush.bf16.msra.mxu2 %v1545_v4  ;;  %v3028_v20 = vand.u32 255, %v97_v53 }
  0x96   :  { %v741_v49 = vshrl.u32 %v721_v34, 16  ;;  %v740_v35 = vand.u32 65535, %v721_v34  ;;  %v3026_v58 = vpack.c.bf16 %v1104_v62, %v1103_v8  ;;  %v3031_v31 = vand.u32 255, %v98_v50 }
  0x97   :  { %3959 = vst [vmem:[#allocation84_spill] sm:$0xff] %v3020_v27  ;;  %v1597_v51 = vunpack.c.l.b16 %v3020_v27  ;;  %v3033_v18 = vand.u32 255, %v99_v3  ;;  %v220_v34 = vand.u32 1, %v3024_v26  ;;  %v252_v62 = vshra.s32 %v3024_v26, 1 }
  0x98   :  { %v743_v54 = vcvt.s32.f32 %v741_v49  ;;  %3960 = vst [vmem:[#allocation85_spill] sm:$0xff] %v3026_v58  ;;  %v742_v0 = vcvt.s32.f32 %v740_v35  ;;  %v1599_v2 = vunpack.c.l.b16 %v3026_v58  ;;  %v221_v49 = vand.u32 1, %v3028_v20 }
  0x99   :  { %v253_v35 = vshra.s32 %v3028_v20, 1  ;;  %v222_v1 = vand.u32 1, %v3031_v31  ;;  %v223_v40 = vand.u32 1, %v3033_v18  ;;  %v953_v60 = vcvt.s32.f32 %v220_v34 }
  0x9a   :  { %746 = vadd.xlane.f32.xlu0 %v743_v54  ;;  %744 = vadd.xlane.f32.xlu2 %v742_v0  ;;  %v254_v8 = vshra.s32 %v3031_v31, 1  ;;  %v1625_v53 = vpack.c.b16 %v1599_v2, %v1597_v51  ;;  %v954_v4 = vcvt.s32.f32 %v221_v49  ;;  %v255_v50 = vshra.s32 %v3033_v18, 1 }
  0x9b   :  { %v284_v3 = vand.u32 1, %v252_v62  ;;  %v955_v54 = vcvt.s32.f32 %v222_v1  ;;  %v956_v0 = vcvt.s32.f32 %v223_v40  ;;  %v285_v58 = vand.u32 1, %v253_v35 }
  0x9c   :  { %v286_v27 = vand.u32 1, %v254_v8  ;;  %2043 = vmatpush.bf16.msra.mxu3 %v1625_v53  ;;  %v3044_v21 = vpack.c.bf16 %v954_v4, %v953_v60  ;;  %v287_v5 = vand.u32 1, %v255_v50  ;;  %v316_v52 = vshra.s32 %v3024_v26, 2 }
  0x9d   :  { %v1001_v42 = vcvt.s32.f32 %v284_v3  ;;  %v3047_v30 = vpack.c.bf16 %v956_v0, %v955_v54  ;;  %v1002_v34 = vcvt.s32.f32 %v285_v58  ;;  %v317_v51 = vshra.s32 %v3028_v20, 2 }
  0x9e   :  { %3961 = vst [vmem:[#allocation86_spill] sm:$0xff] %v3044_v21  ;;  %v1003_v37 = vcvt.s32.f32 %v286_v27  ;;  %v1353_v2 = vunpack.c.l.b16 %v3044_v21  ;;  %v1004_v49 = vcvt.s32.f32 %v287_v5  ;;  %v318_v62 = vshra.s32 %v3031_v31, 2 }
  0x9f   :  { %3962 = vst [vmem:[#allocation87_spill] sm:$0xff] %v3047_v30  ;;  %v319_v35 = vshra.s32 %v3033_v18, 2  ;;  %v1355_v1 = vunpack.c.l.b16 %v3047_v30  ;;  %v3054_v40 = vpack.c.bf16 %v1002_v34, %v1001_v42  ;;  %v348_v60 = vand.u32 1, %v316_v52 }
  0xa0   :  { %v349_v8 = vand.u32 1, %v317_v51  ;;  %v3056_v53 = vpack.c.bf16 %v1004_v49, %v1003_v37  ;;  %v350_v4 = vand.u32 1, %v318_v62  ;;  %v380_v27 = vshra.s32 %v3024_v26, 3 }
  0xa1   :  { %3963 = vst [vmem:[#allocation88_spill] sm:$0xff] %v3054_v40  ;;  %v351_v58 = vand.u32 1, %v319_v35  ;;  %v1383_v50 = vpack.c.b16 %v1355_v1, %v1353_v2  ;;  %v1433_v3 = vunpack.c.l.b16 %v3054_v40  ;;  %v1049_v5 = vcvt.s32.f32 %v348_v60 }
  0xa2   :  { %3964 = vst [vmem:[#allocation89_spill] sm:$0xff] %v3056_v53  ;;  %v1050_v54 = vcvt.s32.f32 %v349_v8  ;;  %v1435_v0 = vunpack.c.l.b16 %v3056_v53  ;;  %v1051_v21 = vcvt.s32.f32 %v350_v4  ;;  %v381_v42 = vshra.s32 %v3028_v20, 3 }
  0xa3   :  { %v1052_v47 = vcvt.s32.f32 %v351_v58  ;;  %1987 = vmatpush.bf16.msra.mxu0 %v1383_v50  ;;  %v382_v37 = vshra.s32 %v3031_v31, 3  ;;  %v383_v34 = vshra.s32 %v3033_v18, 3  ;;  %v412_v51 = vand.u32 1, %v380_v27 }
  0xa4   :  { %v3062_v52 = vpack.c.bf16 %v1050_v54, %v1049_v5  ;;  %v1463_v49 = vpack.c.b16 %v1435_v0, %v1433_v3  ;;  %v413_v62 = vand.u32 1, %v381_v42  ;;  %v92_v35 = vunpack.c.0.s8 %v3007_v46 }
  0xa5   :  { %v3066_v2 = vpack.c.bf16 %v1052_v47, %v1051_v21  ;;  %v414_v60 = vand.u32 1, %v382_v37  ;;  %v415_v8 = vand.u32 1, %v383_v34  ;;  %v1097_v4 = vcvt.s32.f32 %v412_v51 }
  0xa6   :  { %3965 = vst [vmem:[#allocation90_spill] sm:$0xff] %v3062_v52  ;;  %v1513_v1 = vunpack.c.l.b16 %v3062_v52  ;;  %2006 = vmatpush.bf16.msra.mxu1 %v1463_v49  ;;  %v1098_v50 = vcvt.s32.f32 %v413_v62  ;;  %v93_v5 = vunpack.c.0.s8 %v3013_v25  ;;  %v94_v54 = vunpack.c.1.s8 %v3007_v46 }
  0xa7   :  { %3966 = vst [vmem:[#allocation91_spill] sm:$0xff] %v3066_v2  ;;  %v1515_v58 = vunpack.c.l.b16 %v3066_v2  ;;  %v1099_v27 = vcvt.s32.f32 %v414_v60  ;;  %v1100_v3 = vcvt.s32.f32 %v415_v8  ;;  %v95_v47 = vunpack.c.1.s8 %v3013_v25 }
  0xa8   :  { %v3074_v21 = vand.u32 255, %v92_v35  ;;  %v3076_v42 = vpack.c.bf16 %v1098_v50, %v1097_v4  ;;  %v3078_v37 = vand.u32 255, %v93_v5  ;;  %v3080_v34 = vand.u32 255, %v94_v54 }
  0xa9   :  { %v1543_v0 = vpack.c.b16 %v1515_v58, %v1513_v1  ;;  %v3082_v51 = vpack.c.bf16 %v1100_v3, %v1099_v27  ;;  %v3084_v49 = vand.u32 255, %v95_v47  ;;  %v764_v46 = vand.u32 65535, %v2991_v55 }
  0xaa   :  { %3967 = vst [vmem:[#allocation92_spill] sm:$0xff] %v3076_v42  ;;  %v216_v62 = vand.u32 1, %v3074_v21  ;;  %v1593_v25 = vunpack.c.l.b16 %v3076_v42  ;;  %v217_v35 = vand.u32 1, %v3078_v37  ;;  %v218_v1 = vand.u32 1, %v3080_v34 }
  0xab   :  { %3968 = vst [vmem:[#allocation93_spill] sm:$0xff] %v3082_v51  ;;  %2025 = vmatpush.bf16.msra.mxu2 %v1543_v0  ;;  %v752_v60 = vand.u32 65535, %v2813_v32  ;;  %v1595_v8 = vunpack.c.l.b16 %v3082_v51  ;;  %v219_v4 = vand.u32 1, %v3084_v49  ;;  %v766_v50 = vcvt.s32.f32 %v764_v46 }
  0xac   :  { %v949_v58 = vcvt.s32.f32 %v216_v62  ;;  %v950_v5 = vcvt.s32.f32 %v217_v35  ;;  %v951_v54 = vcvt.s32.f32 %v218_v1  ;;  %v248_v55 = vshra.s32 %v3074_v21, 1 }
  0xad   :  { %v754_v27 = vcvt.s32.f32 %v752_v60  ;;  %v1623_v3 = vpack.c.b16 %v1595_v8, %v1593_v25  ;;  %v952_v47 = vcvt.s32.f32 %v219_v4  ;;  %768 = vadd.xlane.f32.xlu1 %v766_v50  ;;  %v249_v0 = vshra.s32 %v3078_v37, 1 }
  0xae   :  { %v250_v42 = vshra.s32 %v3080_v34, 1  ;;  %v3097_v53 = vpack.c.bf16 %v950_v5, %v949_v58  ;;  %v251_v32 = vshra.s32 %v3084_v49, 1  ;;  %v280_v51 = vand.u32 1, %v248_v55 }
  0xaf   :  { %756 = vadd.xlane.f32.xlu0 %v754_v27  ;;  %v312_v62 = vshra.s32 %v3074_v21, 2  ;;  %2044 = vmatpush.bf16.msra.mxu3 %v1623_v3  ;;  %v3101_v46 = vpack.c.bf16 %v952_v47, %v951_v54  ;;  %v281_v35 = vand.u32 1, %v249_v0  ;;  %v313_v25 = vshra.s32 %v3078_v37, 2 }
  0xb0   :  { %3969 = vst [vmem:[#allocation94_spill] sm:$0xff] %v3097_v53  ;;  %v282_v1 = vand.u32 1, %v250_v42  ;;  %v1349_v60 = vunpack.c.l.b16 %v3097_v53  ;;  %v283_v8 = vand.u32 1, %v251_v32  ;;  %v997_v4 = vcvt.s32.f32 %v280_v51 }
  0xb1   :  { %v314_v58 = vshra.s32 %v3080_v34, 2  ;;  %v1351_v50 = vunpack.c.l.b16 %v3101_v46  ;;  %v998_v5 = vcvt.s32.f32 %v281_v35  ;;  %v315_v55 = vshra.s32 %v3084_v49, 2 }
  0xb2   :  { %v999_v27 = vcvt.s32.f32 %v282_v1  ;;  %v1000_v40 = vcvt.s32.f32 %v283_v8  ;;  %v344_v3 = vand.u32 1, %v312_v62  ;;  %v345_v54 = vand.u32 1, %v313_v25 }
  0xb3   :  { %v346_v47 = vand.u32 1, %v314_v58  ;;  %v1381_v0 = vpack.c.b16 %v1351_v50, %v1349_v60  ;;  %v3108_v42 = vpack.c.bf16 %v998_v5, %v997_v4  ;;  %v347_v2 = vand.u32 1, %v315_v55 }
  0xb4   :  { %v376_v53 = vshra.s32 %v3074_v21, 3  ;;  %v3111_v32 = vpack.c.bf16 %v1000_v40, %v999_v27  ;;  %v1045_v51 = vcvt.s32.f32 %v344_v3  ;;  %v1046_v52 = vcvt.s32.f32 %v345_v54 }
  0xb5   :  { %3970 = vst [vmem:[#allocation95_spill] sm:$0xff] %v3108_v42  ;;  %v1047_v30 = vcvt.s32.f32 %v346_v47  ;;  %1988 = vmatpush.bf16.msra.mxu0 %v1381_v0  ;;  %v1429_v35 = vunpack.c.l.b16 %v3108_v42  ;;  %v1048_v1 = vcvt.s32.f32 %v347_v2  ;;  %v377_v8 = vshra.s32 %v3078_v37, 3 }
  0xb6   :  { %3971 = vst [vmem:[#allocation96_spill] sm:$0xff] %v3111_v32  ;;  %v378_v62 = vshra.s32 %v3080_v34, 3  ;;  %v1431_v25 = vunpack.c.l.b16 %v3111_v32  ;;  %v3117_v60 = vpack.c.bf16 %v1046_v52, %v1045_v51  ;;  %v379_v4 = vshra.s32 %v3084_v49, 3 }
  0xb7   :  { %v408_v58 = vand.u32 1, %v376_v53  ;;  %v3120_v40 = vpack.c.bf16 %v1048_v1, %v1047_v30  ;;  %v409_v50 = vand.u32 1, %v377_v8  ;;  %v3972_v27 = vand.u32 1, %v2735_v44 }
  0xb8   :  { %v410_v5 = vand.u32 1, %v378_v62  ;;  %v1461_v3 = vpack.c.b16 %v1431_v25, %v1429_v35  ;;  %v1509_v2 = vunpack.c.l.b16 %v3117_v60  ;;  %v411_v54 = vand.u32 1, %v379_v4 }
  0xb9   :  { %v789_v55 = vcvt.s32.f32 %v3972_v27  ;;  %v1093_v47 = vcvt.s32.f32 %v408_v58  ;;  %v1511_v0 = vunpack.c.l.b16 %v3120_v40  ;;  %v1094_v32 = vcvt.s32.f32 %v409_v50 }
  0xba   :  { %v1095_v52 = vcvt.s32.f32 %v410_v5  ;;  %v3973_v51 = vand.u32 1, %v2946_v39  ;;  %2007 = vmatpush.bf16.msra.mxu1 %v1461_v3  ;;  %v1096_v30 = vcvt.s32.f32 %v411_v54  ;;  %v468_v1 = vshra.s32 %v2551_v10, 4 }
  0xbb   :  { %v793_v53 = vpack.c.bf16 %v789_v55, %v789_v55  ;;  %v469_v44 = vshra.s32 %v2553_v11, 4  ;;  %v1541_v8 = vpack.c.b16 %v1511_v0, %v1509_v2  ;;  %v3130_v35 = vpack.c.bf16 %v1094_v32, %v1093_v47 }
  0xbc   :  { %v790_v42 = vcvt.s32.f32 %v3973_v51  ;;  %v470_v25 = vshra.s32 %v2555_v12, 4  ;;  %v3133_v4 = vpack.c.bf16 %v1096_v30, %v1095_v52  ;;  %v471_v50 = vshra.s32 %v2557_v13, 4 }
  0xbd   :  { %v857_v58 = vunpack.c.l.b16 %v793_v53  ;;  %v500_v39 = vand.u32 1, %v468_v1  ;;  %2026 = vmatpush.bf16.msra.mxu2 %v1541_v8  ;;  %v1589_v5 = vunpack.c.l.b16 %v3130_v35  ;;  %v501_v55 = vand.u32 1, %v469_v44 }
  0xbe   :  { %v794_v62 = vpack.c.bf16 %v790_v42, %v790_v42  ;;  %v502_v3 = vand.u32 1, %v470_v25  ;;  %v1591_v54 = vunpack.c.l.b16 %v3133_v4  ;;  %v503_v2 = vand.u32 1, %v471_v50 }
  0xbf   :  { %v1169_v32 = vcvt.s32.f32 %v500_v39  ;;  %v797_v42 = vcvt.s32.f32 %v2775_v41  ;;  %v1170_v0 = vcvt.s32.f32 %v501_v55  ;;  %v798_v51 = vcvt.s32.f32 %v2962_v19 }
  0xc0   :  { %v858_v27 = vunpack.c.l.b16 %v794_v62  ;;  %v1171_v52 = vcvt.s32.f32 %v502_v3  ;;  %v1621_v30 = vpack.c.b16 %v1591_v54, %v1589_v5  ;;  %v1172_v53 = vcvt.s32.f32 %v503_v2 }
  0xc1   :  { %v801_v1 = vpack.c.bf16 %v797_v42, %v797_v42  ;;  %v805_v8 = vcvt.s32.f32 %v2777_v28  ;;  %v3144_v44 = vpack.c.bf16 %v1170_v0, %v1169_v32  ;;  %v802_v62 = vpack.c.bf16 %v798_v51, %v798_v51 }
  0xc2   :  { %v3139_v47 = vpack.c.b16 %v858_v27, %v857_v58  ;;  %v806_v25 = vcvt.s32.f32 %v2964_v29  ;;  %v813_v41 = vcvt.s32.f32 %v2782_v43  ;;  %2045 = vmatpush.bf16.msra.mxu3 %v1621_v30  ;;  %v3148_v58 = vpack.c.bf16 %v1172_v53, %v1171_v52 }
  0xc3   :  { %v869_v50 = vunpack.c.l.b16 %v801_v1  ;;  %v809_v39 = vpack.c.bf16 %v805_v8, %v805_v8  ;;  %v814_v19 = vcvt.s32.f32 %v2966_v45  ;;  %v1697_v5 = vunpack.c.l.b16 %v3144_v44 }
  0xc4   :  { %3974 = vst [vmem:[#allocation97_spill] sm:$0xff] %v3139_v47  ;;  %1989 = vmatmul.bf16.vlgmr.msra.gmra.mxu0 %v3139_v47  ;;  %v870_v27 = vunpack.c.l.b16 %v802_v62  ;;  %v810_v55 = vpack.c.bf16 %v806_v25, %v806_v25  ;;  %v1699_v3 = vunpack.c.l.b16 %v3148_v58  ;;  %v817_v2 = vpack.c.bf16 %v813_v41, %v813_v41 }
  0xc5   :  { %v881_v29 = vunpack.c.l.b16 %v809_v39  ;;  %v818_v42 = vpack.c.bf16 %v814_v19, %v814_v19  ;;  %v596_v0 = vshra.s32 %v2551_v10, 6  ;;  %v597_v51 = vshra.s32 %v2553_v11, 6 }
  0xc6   :  { %v3155_v43 = vpack.c.b16 %v870_v27, %v869_v50  ;;  %v882_v32 = vunpack.c.l.b16 %v810_v55  ;;  %v1715_v52 = vpack.c.b16 %v1699_v3, %v1697_v5  ;;  %v893_v45 = vunpack.c.l.b16 %v817_v2 }
  0xc7   :  { %v598_v30 = vshra.s32 %v2555_v12, 6  ;;  %v894_v1 = vunpack.c.l.b16 %v818_v42  ;;  %v599_v8 = vshra.s32 %v2557_v13, 6  ;;  %v628_v62 = vand.u32 1, %v596_v0 }
  0xc8   :  { %3975 = vst [vmem:[#allocation98_spill] sm:$0xff] %v3155_v43  ;;  %2008 = vmatmul.bf16.vlgmr.msra.gmra.mxu1 %v3155_v43  ;;  %v3161_v53 = vpack.c.b16 %v882_v32, %v881_v29  ;;  %2057 = vmatpush.bf16.msrb.mxu0 %v1715_v52  ;;  %v629_v25 = vand.u32 1, %v597_v51  ;;  %v532_v50 = vshra.s32 %v2551_v10, 5  ;;  %v533_v39 = vshra.s32 %v2553_v11, 5 }
  0xc9   :  { %v630_v41 = vand.u32 1, %v598_v30  ;;  %v3167_v19 = vpack.c.b16 %v894_v1, %v893_v45  ;;  %v631_v5 = vand.u32 1, %v599_v8  ;;  %v1265_v27 = vcvt.s32.f32 %v628_v62 }
  0xca   :  { %3976 = vst [vmem:[#allocation99_spill] sm:$0xff] %v3161_v53  ;;  %2027 = vmatmul.bf16.vlgmr.msra.gmra.mxu2 %v3161_v53  ;;  %v534_v55 = vshra.s32 %v2555_v12, 5  ;;  %v1266_v3 = vcvt.s32.f32 %v629_v25  ;;  %v535_v2 = vshra.s32 %v2557_v13, 5  ;;  %v564_v32 = vand.u32 1, %v532_v50 }
  0xcb   :  { %3977 = vst [vmem:[#allocation100_spill] sm:$0xff] %v3167_v19  ;;  %v1267_v29 = vcvt.s32.f32 %v630_v41  ;;  %2046 = vmatmul.bf16.vlgmr.msra.gmra.mxu3 %v3167_v19  ;;  %v1268_v42 = vcvt.s32.f32 %v631_v5  ;;  %v565_v0 = vand.u32 1, %v533_v39  ;;  %v660_v51 = vshra.s32 %v2551_v10, 7 }
  0xcc   :  { %v566_v52 = vand.u32 1, %v534_v55  ;;  %v3173_v30 = vpack.c.bf16 %v1266_v3, %v1265_v27  ;;  %v567_v45 = vand.u32 1, %v535_v2  ;;  %v1217_v1 = vcvt.s32.f32 %v564_v32 }
  0xcd   :  { %v661_v8 = vshra.s32 %v2553_v11, 7  ;;  %v3176_v62 = vpack.c.bf16 %v1268_v42, %v1267_v29  ;;  %v1218_v25 = vcvt.s32.f32 %v565_v0  ;;  %v662_v54 = vshra.s32 %v2555_v12, 7 }
  0xce   :  { %v1219_v41 = vcvt.s32.f32 %v566_v52  ;;  %v1857_v50 = vunpack.c.l.b16 %v3173_v30  ;;  %v1220_v39 = vcvt.s32.f32 %v567_v45  ;;  %v663_v55 = vshra.s32 %v2557_v13, 7 }
  0xcf   :  { %v1859_v10 = vunpack.c.l.b16 %v3176_v62  ;;  %v3184_v3 = vpack.c.bf16 %v1218_v25, %v1217_v1  ;;  %v692_v11 = vand.u32 1, %v660_v51  ;;  %v693_v2 = vand.u32 1, %v661_v8 }
  0xd0   :  { %v3186_v29 = vpack.c.bf16 %v1220_v39, %v1219_v41  ;;  %v694_v32 = vand.u32 1, %v662_v54  ;;  %v695_v42 = vand.u32 1, %v663_v55  ;;  %v464_v51 = vshra.s32 %v2559_v14, 4 }
  0xd1   :  { %v1875_v12 = vpack.c.b16 %v1859_v10, %v1857_v50  ;;  %v1777_v0 = vunpack.c.l.b16 %v3184_v3  ;;  %v1313_v45 = vcvt.s32.f32 %v692_v11  ;;  %v1314_v28 = vcvt.s32.f32 %v693_v2 }
  0xd2   :  { %v1779_v13 = vunpack.c.l.b16 %v3186_v29  ;;  %v1315_v27 = vcvt.s32.f32 %v694_v32  ;;  %v1316_v1 = vcvt.s32.f32 %v695_v42  ;;  %v465_v8 = vshra.s32 %v2561_v15, 4 }
  0xd3   :  { %2095 = vmatpush.bf16.msrb.mxu2 %v1875_v12  ;;  %v466_v54 = vshra.s32 %v2563_v16, 4  ;;  %v3195_v41 = vpack.c.bf16 %v1314_v28, %v1313_v45  ;;  %v467_v50 = vshra.s32 %v2565_v17, 4  ;;  %v592_v39 = vshra.s32 %v2559_v14, 6 }
  0xd4   :  { %v1795_v25 = vpack.c.b16 %v1779_v13, %v1777_v0  ;;  %v3199_v55 = vpack.c.bf16 %v1316_v1, %v1315_v27  ;;  %v496_v10 = vand.u32 1, %v464_v51  ;;  %v497_v11 = vand.u32 1, %v465_v8 }
  0xd5   :  { %v498_v2 = vand.u32 1, %v466_v54  ;;  %v1937_v32 = vunpack.c.l.b16 %v3195_v41  ;;  %v499_v12 = vand.u32 1, %v467_v50  ;;  %v593_v5 = vshra.s32 %v2561_v15, 6 }
  0xd6   :  { %2076 = vmatpush.bf16.msrb.mxu1 %v1795_v25  ;;  %v1939_v28 = vunpack.c.l.b16 %v3199_v55  ;;  %v1165_v45 = vcvt.s32.f32 %v496_v10  ;;  %v1166_v13 = vcvt.s32.f32 %v497_v11  ;;  %v594_v1 = vshra.s32 %v2563_v16, 6 }
  0xd7   :  { %v1167_v52 = vcvt.s32.f32 %v498_v2  ;;  %v1168_v27 = vcvt.s32.f32 %v499_v12  ;;  %v595_v51 = vshra.s32 %v2565_v17, 6  ;;  %v624_v25 = vand.u32 1, %v592_v39 }
  0xd8   :  { %v1955_v8 = vpack.c.b16 %v1939_v28, %v1937_v32  ;;  %v3208_v54 = vpack.c.bf16 %v1166_v13, %v1165_v45  ;;  %v625_v42 = vand.u32 1, %v593_v5  ;;  %v626_v19 = vand.u32 1, %v594_v1 }
  0xd9   :  { %v3210_v50 = vpack.c.bf16 %v1168_v27, %v1167_v52  ;;  %v627_v53 = vand.u32 1, %v595_v51  ;;  %v528_v43 = vshra.s32 %v2559_v14, 5  ;;  %v1261_v11 = vcvt.s32.f32 %v624_v25 }
  0xda   :  { %2114 = vmatpush.bf16.msrb.mxu3 %v1955_v8  ;;  %v1693_v10 = vunpack.c.l.b16 %v3208_v54  ;;  %v1262_v2 = vcvt.s32.f32 %v625_v42  ;;  %v529_v12 = vshra.s32 %v2561_v15, 5  ;;  %v1263_v32 = vcvt.s32.f32 %v626_v19 }
  0xdb   :  { %v1695_v0 = vunpack.c.l.b16 %v3210_v50  ;;  %v1264_v28 = vcvt.s32.f32 %v627_v53  ;;  %v530_v39 = vshra.s32 %v2563_v16, 5  ;;  %v531_v52 = vshra.s32 %v2565_v17, 5 }
  0xdc   :  { %v3217_v5 = vpack.c.bf16 %v1262_v2, %v1261_v11  ;;  %v560_v45 = vand.u32 1, %v528_v43  ;;  %v561_v13 = vand.u32 1, %v529_v12  ;;  %v656_v42 = vshra.s32 %v2559_v14, 7 }
  0xdd   :  { %v1713_v27 = vpack.c.b16 %v1695_v0, %v1693_v10  ;;  %v3220_v1 = vpack.c.bf16 %v1264_v28, %v1263_v32  ;;  %v562_v51 = vand.u32 1, %v530_v39  ;;  %v563_v25 = vand.u32 1, %v531_v52 }
  0xde   :  { %v1853_v8 = vunpack.c.l.b16 %v3217_v5  ;;  %v1213_v47 = vcvt.s32.f32 %v560_v45  ;;  %v1214_v19 = vcvt.s32.f32 %v561_v13  ;;  %v657_v2 = vshra.s32 %v2561_v15, 7 }
  0xdf   :  { %2058 = vmatpush.bf16.msrb.mxu0 %v1713_v27  ;;  %v1855_v53 = vunpack.c.l.b16 %v3220_v1  ;;  %v1215_v11 = vcvt.s32.f32 %v562_v51  ;;  %v658_v43 = vshra.s32 %v2563_v16, 7  ;;  %v1216_v12 = vcvt.s32.f32 %v563_v25 }
  0xe0   :  { %v3227_v0 = vpack.c.bf16 %v1214_v19, %v1213_v47  ;;  %v659_v10 = vshra.s32 %v2565_v17, 7  ;;  %v688_v32 = vand.u32 1, %v656_v42  ;;  %v689_v28 = vand.u32 1, %v657_v2 }
  0xe1   :  { %v1873_v14 = vpack.c.b16 %v1855_v53, %v1853_v8  ;;  %v690_v39 = vand.u32 1, %v658_v43  ;;  %v460_v52 = vshra.s32 %v2659_v6, 4  ;;  %v3231_v45 = vpack.c.bf16 %v1216_v12, %v1215_v11 }
  0xe2   :  { %3978 = vst [vmem:[#allocation101_spill] sm:$0xff] %v3227_v0  ;;  %v1773_v13 = vunpack.c.l.b16 %v3227_v0  ;;  %v691_v27 = vand.u32 1, %v659_v10  ;;  %v1309_v51 = vcvt.s32.f32 %v688_v32  ;;  %v1310_v15 = vcvt.s32.f32 %v689_v28 }
  0xe3   :  { %2096 = vmatpush.bf16.msrb.mxu2 %v1873_v14  ;;  %v1311_v16 = vcvt.s32.f32 %v690_v39  ;;  %v461_v47 = vshra.s32 %v2663_v9, 4  ;;  %v462_v25 = vshra.s32 %v2667_v23, 4  ;;  %v1775_v17 = vunpack.c.l.b16 %v3231_v45 }
  0xe4   :  { %v1312_v42 = vcvt.s32.f32 %v691_v27  ;;  %v463_v8 = vshra.s32 %v2669_v24, 4  ;;  %v492_v19 = vand.u32 1, %v460_v52  ;;  %v3238_v53 = vpack.c.bf16 %v1310_v15, %v1309_v51 }
  0xe5   :  { %v493_v11 = vand.u32 1, %v461_v47  ;;  %v494_v2 = vand.u32 1, %v462_v25  ;;  %v588_v43 = vshra.s32 %v2659_v6, 6  ;;  %v1793_v12 = vpack.c.b16 %v1775_v17, %v1773_v13 }
  0xe6   :  { %3979 = vst [vmem:[#allocation102_spill] sm:$0xff] %v3238_v53  ;;  %v3241_v10 = vpack.c.bf16 %v1312_v42, %v1311_v16  ;;  %v495_v32 = vand.u32 1, %v463_v8  ;;  %v1161_v14 = vcvt.s32.f32 %v492_v19  ;;  %v1933_v28 = vunpack.c.l.b16 %v3238_v53 }
  0xe7   :  { %v1162_v39 = vcvt.s32.f32 %v493_v11  ;;  %v1163_v0 = vcvt.s32.f32 %v494_v2  ;;  %v589_v27 = vshra.s32 %v2663_v9, 6  ;;  %2077 = vmatpush.bf16.msrb.mxu1 %v1793_v12  ;;  %v590_v15 = vshra.s32 %v2667_v23, 6 }
  0xe8   :  { %3980 = vst [vmem:[#allocation103_spill] sm:$0xff] %v3241_v10  ;;  %v1935_v52 = vunpack.c.l.b16 %v3241_v10  ;;  %v1164_v51 = vcvt.s32.f32 %v495_v32  ;;  %v591_v47 = vshra.s32 %v2669_v24, 6  ;;  %v620_v13 = vand.u32 1, %v588_v43 }
  0xe9   :  { %v3248_v25 = vpack.c.bf16 %v1162_v39, %v1161_v14  ;;  %v621_v16 = vand.u32 1, %v589_v27  ;;  %v524_v17 = vshra.s32 %v2659_v6, 5  ;;  %v622_v19 = vand.u32 1, %v590_v15 }
  0xea   :  { %v1953_v42 = vpack.c.b16 %v1935_v52, %v1933_v28  ;;  %v3251_v8 = vpack.c.bf16 %v1164_v51, %v1163_v0  ;;  %v623_v11 = vand.u32 1, %v591_v47  ;;  %v1257_v12 = vcvt.s32.f32 %v620_v13 }
  0xeb   :  { %v1689_v2 = vunpack.c.l.b16 %v3248_v25  ;;  %v1258_v10 = vcvt.s32.f32 %v621_v16  ;;  %v525_v32 = vshra.s32 %v2663_v9, 5  ;;  %v1259_v14 = vcvt.s32.f32 %v622_v19 }
  0xec   :  { %3981 = vst [vmem:[#allocation104_spill] sm:$0xff] %v3251_v8  ;;  %2115 = vmatpush.bf16.msrb.mxu3 %v1953_v42  ;;  %v1691_v53 = vunpack.c.l.b16 %v3251_v8  ;;  %v1260_v39 = vcvt.s32.f32 %v623_v11  ;;  %v526_v43 = vshra.s32 %v2667_v23, 5  ;;  %v527_v0 = vshra.s32 %v2669_v24, 5 }
  0xed   :  { %v3257_v27 = vpack.c.bf16 %v1258_v10, %v1257_v12  ;;  %v556_v28 = vand.u32 1, %v524_v17  ;;  %v557_v52 = vand.u32 1, %v525_v32  ;;  %v652_v13 = vshra.s32 %v2659_v6, 7 }
  0xee   :  { %v1711_v51 = vpack.c.b16 %v1691_v53, %v1689_v2  ;;  %v3260_v15 = vpack.c.bf16 %v1260_v39, %v1259_v14  ;;  %v558_v47 = vand.u32 1, %v526_v43  ;;  %v559_v42 = vand.u32 1, %v527_v0 }
  0xef   :  { %v1849_v16 = vunpack.c.l.b16 %v3257_v27  ;;  %v1209_v8 = vcvt.s32.f32 %v556_v28  ;;  %v1210_v19 = vcvt.s32.f32 %v557_v52  ;;  %v653_v12 = vshra.s32 %v2663_v9, 7 }
  0xf0   :  { %2059 = vmatpush.bf16.msrb.mxu0 %v1711_v51  ;;  %v1851_v11 = vunpack.c.l.b16 %v3260_v15  ;;  %v1211_v10 = vcvt.s32.f32 %v558_v47  ;;  %v654_v17 = vshra.s32 %v2667_v23, 7  ;;  %v1212_v32 = vcvt.s32.f32 %v559_v42 }
  0xf1   :  { %v3267_v53 = vpack.c.bf16 %v1210_v19, %v1209_v8  ;;  %v655_v2 = vshra.s32 %v2669_v24, 7  ;;  %v684_v14 = vand.u32 1, %v652_v13  ;;  %v685_v39 = vand.u32 1, %v653_v12 }
  0xf2   :  { %v1871_v6 = vpack.c.b16 %v1851_v11, %v1849_v16  ;;  %v686_v43 = vand.u32 1, %v654_v17  ;;  %v456_v0 = vshra.s32 %v2713_v61, 4  ;;  %v3271_v28 = vpack.c.bf16 %v1212_v32, %v1211_v10 }
  0xf3   :  { %3982 = vst [vmem:[#allocation105_spill] sm:$0xff] %v3267_v53  ;;  %v1769_v52 = vunpack.c.l.b16 %v3267_v53  ;;  %v687_v51 = vand.u32 1, %v655_v2  ;;  %v1305_v47 = vcvt.s32.f32 %v684_v14  ;;  %v1306_v9 = vcvt.s32.f32 %v685_v39 }
  0xf4   :  { %2097 = vmatpush.bf16.msrb.mxu2 %v1871_v6  ;;  %v1307_v23 = vcvt.s32.f32 %v686_v43  ;;  %v457_v8 = vshra.s32 %v2715_v63, 4  ;;  %v458_v42 = vshra.s32 %v2719_v7, 4  ;;  %v1771_v24 = vunpack.c.l.b16 %v3271_v28 }
  0xf5   :  { %v1308_v13 = vcvt.s32.f32 %v687_v51  ;;  %v459_v16 = vshra.s32 %v2721_v22, 4  ;;  %v488_v19 = vand.u32 1, %v456_v0  ;;  %v3278_v11 = vpack.c.bf16 %v1306_v9, %v1305_v47 }
  0xf6   :  { %v489_v10 = vand.u32 1, %v457_v8  ;;  %v490_v12 = vand.u32 1, %v458_v42  ;;  %v584_v17 = vshra.s32 %v2713_v61, 6  ;;  %v1791_v32 = vpack.c.b16 %v1771_v24, %v1769_v52 }
  0xf7   :  { %3983 = vst [vmem:[#allocation106_spill] sm:$0xff] %v3278_v11  ;;  %v3281_v2 = vpack.c.bf16 %v1308_v13, %v1307_v23  ;;  %v491_v14 = vand.u32 1, %v459_v16  ;;  %v1157_v6 = vcvt.s32.f32 %v488_v19  ;;  %v1929_v39 = vunpack.c.l.b16 %v3278_v11 }
  0xf8   :  { %v1158_v43 = vcvt.s32.f32 %v489_v10  ;;  %v1159_v53 = vcvt.s32.f32 %v490_v12  ;;  %v585_v51 = vshra.s32 %v2715_v63, 6  ;;  %2078 = vmatpush.bf16.msrb.mxu1 %v1791_v32  ;;  %v586_v9 = vshra.s32 %v2719_v7, 6 }
  0xf9   :  { %3984 = vst [vmem:[#allocation107_spill] sm:$0xff] %v3281_v2  ;;  %v1931_v0 = vunpack.c.l.b16 %v3281_v2  ;;  %v1160_v47 = vcvt.s32.f32 %v491_v14  ;;  %v587_v8 = vshra.s32 %v2721_v22, 6  ;;  %v616_v52 = vand.u32 1, %v584_v17 }
  0xfa   :  { %v3288_v42 = vpack.c.bf16 %v1158_v43, %v1157_v6  ;;  %v617_v23 = vand.u32 1, %v585_v51  ;;  %v520_v24 = vshra.s32 %v2713_v61, 5  ;;  %v618_v19 = vand.u32 1, %v586_v9 }
  0xfb   :  { %v1951_v13 = vpack.c.b16 %v1931_v0, %v1929_v39  ;;  %v3291_v16 = vpack.c.bf16 %v1160_v47, %v1159_v53  ;;  %v619_v10 = vand.u32 1, %v587_v8  ;;  %v1253_v32 = vcvt.s32.f32 %v616_v52 }
  0xfc   :  { %v1685_v12 = vunpack.c.l.b16 %v3288_v42  ;;  %v1254_v2 = vcvt.s32.f32 %v617_v23  ;;  %v521_v14 = vshra.s32 %v2715_v63, 5  ;;  %v1255_v6 = vcvt.s32.f32 %v618_v19 }
  0xfd   :  { %3985 = vst [vmem:[#allocation108_spill] sm:$0xff] %v3291_v16  ;;  %2116 = vmatpush.bf16.msrb.mxu3 %v1951_v13  ;;  %v1687_v11 = vunpack.c.l.b16 %v3291_v16  ;;  %v1256_v43 = vcvt.s32.f32 %v619_v10  ;;  %v522_v17 = vshra.s32 %v2719_v7, 5  ;;  %v523_v53 = vshra.s32 %v2721_v22, 5 }
  0xfe   :  { %v3297_v51 = vpack.c.bf16 %v1254_v2, %v1253_v32  ;;  %v552_v39 = vand.u32 1, %v520_v24  ;;  %v553_v0 = vand.u32 1, %v521_v14  ;;  %v648_v52 = vshra.s32 %v2713_v61, 7 }
  0xff   :  { %v1709_v47 = vpack.c.b16 %v1687_v11, %v1685_v12  ;;  %v3300_v9 = vpack.c.bf16 %v1256_v43, %v1255_v6  ;;  %v554_v8 = vand.u32 1, %v522_v17  ;;  %v555_v13 = vand.u32 1, %v523_v53 }
 0x100   :  { %v1845_v23 = vunpack.c.l.b16 %v3297_v51  ;;  %v1205_v16 = vcvt.s32.f32 %v552_v39  ;;  %v1206_v19 = vcvt.s32.f32 %v553_v0  ;;  %v649_v32 = vshra.s32 %v2715_v63, 7 }
 0x101   :  { %2060 = vmatpush.bf16.msrb.mxu0 %v1709_v47  ;;  %v1847_v10 = vunpack.c.l.b16 %v3300_v9  ;;  %v1207_v2 = vcvt.s32.f32 %v554_v8  ;;  %v650_v24 = vshra.s32 %v2719_v7, 7  ;;  %v1208_v14 = vcvt.s32.f32 %v555_v13 }
 0x102   :  { %v3307_v11 = vpack.c.bf16 %v1206_v19, %v1205_v16  ;;  %v651_v12 = vshra.s32 %v2721_v22, 7  ;;  %v680_v6 = vand.u32 1, %v648_v52  ;;  %v681_v43 = vand.u32 1, %v649_v32 }
 0x103   :  { %v1869_v61 = vpack.c.b16 %v1847_v10, %v1845_v23  ;;  %v682_v17 = vand.u32 1, %v650_v24  ;;  %v3986_v53 = vand.u32 1, %v2733_v56  ;;  %v3312_v0 = vpack.c.bf16 %v1208_v14, %v1207_v2 }
 0x104   :  { %v1765_v47 = vunpack.c.l.b16 %v3307_v11  ;;  %v683_v8 = vand.u32 1, %v651_v12  ;;  %v1301_v63 = vcvt.s32.f32 %v680_v6  ;;  %v1302_v7 = vcvt.s32.f32 %v681_v43 }
 0x105   :  { %v791_v39 = vcvt.s32.f32 %v3986_v53  ;;  %3987 = vst [vmem:[#allocation109_spill] sm:$0xff] %v3312_v0  ;;  %2098 = vmatpush.bf16.msrb.mxu2 %v1869_v61  ;;  %v1303_v13 = vcvt.s32.f32 %v682_v17  ;;  %v3988_v16 = vand.u32 1, %v2913_v59  ;;  %v1767_v52 = vunpack.c.l.b16 %v3312_v0 }
 0x106   :  { %v1304_v23 = vcvt.s32.f32 %v683_v8  ;;  %v452_v10 = vshra.s32 %v2843_v48, 4  ;;  %v453_v56 = vshra.s32 %v2847_v36, 4  ;;  %v3320_v2 = vpack.c.bf16 %v1302_v7, %v1301_v63 }
 0x107   :  { %v792_v19 = vcvt.s32.f32 %v3988_v16  ;;  %v795_v22 = vpack.c.bf16 %v791_v39, %v791_v39  ;;  %v454_v14 = vshra.s32 %v2849_v38, 4  ;;  %v1789_v12 = vpack.c.b16 %v1767_v52, %v1765_v47 }
 0x108   :  { %3989 = vst [vmem:[#allocation110_spill] sm:$0xff] %v3320_v2  ;;  %v3323_v6 = vpack.c.bf16 %v1304_v23, %v1303_v13  ;;  %v455_v59 = vshra.s32 %v2853_v57, 4  ;;  %v484_v61 = vand.u32 1, %v452_v10  ;;  %v1925_v43 = vunpack.c.l.b16 %v3320_v2  ;;  %v3992_v2 = vld [vmem:[#allocation39_spill] sm:$0xff] }
 0x109   :  { %v796_v32 = vpack.c.bf16 %v792_v19, %v792_v19  ;;  %v859_v24 = vunpack.c.l.b16 %v795_v22  ;;  %v485_v53 = vand.u32 1, %v453_v56  ;;  %v486_v39 = vand.u32 1, %v454_v14  ;;  %2079 = vmatpush.bf16.msrb.mxu1 %v1789_v12  ;;  %v3991_v22 = vld [vmem:[#allocation69_spill] sm:$0xff]  ;;  %v3993_v12 = vld [vmem:[#allocation70_spill] sm:$0xff] }
 0x10a   :  { %v1927_v8 = vunpack.c.l.b16 %v3323_v6  ;;  %v487_v63 = vand.u32 1, %v455_v59  ;;  %v1153_v7 = vcvt.s32.f32 %v484_v61  ;;  %v799_v16 = vcvt.s32.f32 %v2748_v33  ;;  %v3994_v61 = vld [vmem:[#allocation40_spill] sm:$0xff] }
 0x10b   :  { %v860_v17 = vunpack.c.l.b16 %v796_v32  ;;  %v1154_v47 = vcvt.s32.f32 %v485_v53  ;;  %v1155_v13 = vcvt.s32.f32 %v486_v39  ;;  %v800_v52 = vcvt.s32.f32 %v3991_v22  ;;  %v3996_v39 = vld [vmem:[#allocation71_spill] sm:$0xff] }
 0x10c   :  { %v1949_v23 = vpack.c.b16 %v1927_v8, %v1925_v43  ;;  %v1156_v10 = vcvt.s32.f32 %v487_v63  ;;  %v803_v0 = vpack.c.bf16 %v799_v16, %v799_v16  ;;  %v807_v32 = vcvt.s32.f32 %v3992_v2 }
 0x10d   :  { %v3329_v19 = vpack.c.b16 %v860_v17, %v859_v24  ;;  %v3334_v56 = vpack.c.bf16 %v1154_v47, %v1153_v7  ;;  %v804_v14 = vpack.c.bf16 %v800_v52, %v800_v52  ;;  %v808_v59 = vcvt.s32.f32 %v3993_v12 }
 0x10e   :  { %v815_v33 = vcvt.s32.f32 %v3994_v61  ;;  %2117 = vmatpush.bf16.msrb.mxu3 %v1949_v23  ;;  %v3338_v24 = vpack.c.bf16 %v1156_v10, %v1155_v13  ;;  %v871_v17 = vunpack.c.l.b16 %v803_v0  ;;  %v811_v53 = vpack.c.bf16 %v807_v32, %v807_v32 }
 0x10f   :  { %3990 = vst [vmem:[#allocation111_spill] sm:$0xff] %v3329_v19  ;;  %1994 = vmatmul.bf16.gmra.mxu0 %v3329_v19  ;;  %v816_v43 = vcvt.s32.f32 %v3996_v39  ;;  %v1681_v8 = vunpack.c.l.b16 %v3334_v56  ;;  %v872_v63 = vunpack.c.l.b16 %v804_v14  ;;  %v812_v2 = vpack.c.bf16 %v808_v59, %v808_v59 }
 0x110   :  { %3995 = vst [vmem:[#allocation69_spill] sm:$0xff] %v3338_v24  ;;  %v819_v16 = vpack.c.bf16 %v815_v33, %v815_v33  ;;  %v1683_v7 = vunpack.c.l.b16 %v3338_v24  ;;  %v883_v47 = vunpack.c.l.b16 %v811_v53  ;;  %v580_v52 = vshra.s32 %v2843_v48, 6 }
 0x111   :  { %v820_v22 = vpack.c.bf16 %v816_v43, %v816_v43  ;;  %v3344_v12 = vpack.c.b16 %v872_v63, %v871_v17  ;;  %v884_v23 = vunpack.c.l.b16 %v812_v2  ;;  %v581_v0 = vshra.s32 %v2847_v36, 6 }
 0x112   :  { %v895_v13 = vunpack.c.l.b16 %v819_v16  ;;  %v1707_v10 = vpack.c.b16 %v1683_v7, %v1681_v8  ;;  %v582_v61 = vshra.s32 %v2849_v38, 6  ;;  %v583_v14 = vshra.s32 %v2853_v57, 6 }
 0x113   :  { %3997 = vst [vmem:[#allocation39_spill] sm:$0xff] %v3344_v12  ;;  %v896_v32 = vunpack.c.l.b16 %v820_v22  ;;  %2013 = vmatmul.bf16.gmra.mxu1 %v3344_v12  ;;  %v3350_v59 = vpack.c.b16 %v884_v23, %v883_v47  ;;  %v612_v33 = vand.u32 1, %v580_v52  ;;  %v613_v53 = vand.u32 1, %v581_v0 }
 0x114   :  { %v516_v39 = vshra.s32 %v2843_v48, 5  ;;  %2061 = vmatpush.bf16.msrb.mxu0 %v1707_v10  ;;  %v614_v43 = vand.u32 1, %v582_v61  ;;  %v615_v63 = vand.u32 1, %v583_v14  ;;  %v517_v8 = vshra.s32 %v2847_v36, 5 }
 0x115   :  { %3998 = vst [vmem:[#allocation70_spill] sm:$0xff] %v3350_v59  ;;  %v3353_v17 = vpack.c.b16 %v896_v32, %v895_v13  ;;  %2032 = vmatmul.bf16.gmra.mxu2 %v3350_v59  ;;  %v1249_v2 = vcvt.s32.f32 %v612_v33  ;;  %v1250_v16 = vcvt.s32.f32 %v613_v53  ;;  %v518_v7 = vshra.s32 %v2849_v38, 5 }
 0x116   :  { %v519_v47 = vshra.s32 %v2853_v57, 5  ;;  %v1251_v22 = vcvt.s32.f32 %v614_v43  ;;  %v1252_v52 = vcvt.s32.f32 %v615_v63  ;;  %v548_v23 = vand.u32 1, %v516_v39 }
 0x117   :  { %3999 = vst [vmem:[#allocation40_spill] sm:$0xff] %v3353_v17  ;;  %2051 = vmatmul.bf16.gmra.mxu3 %v3353_v17  ;;  %v549_v0 = vand.u32 1, %v517_v8  ;;  %v3360_v13 = vpack.c.bf16 %v1250_v16, %v1249_v2  ;;  %v550_v10 = vand.u32 1, %v518_v7  ;;  %v644_v61 = vshra.s32 %v2843_v48, 7 }
 0x118   :  { %v551_v32 = vand.u32 1, %v519_v47  ;;  %v3363_v14 = vpack.c.bf16 %v1252_v52, %v1251_v22  ;;  %v1201_v33 = vcvt.s32.f32 %v548_v23  ;;  %v645_v59 = vshra.s32 %v2847_v36, 7  ;;  %v4004_v47 = vld [vmem:[#allocation61_spill] sm:$0xff] }
 0x119   :  { %4000 = vst [vmem:[#allocation71_spill] sm:$0xff] %v3360_v13  ;;  %v1202_v53 = vcvt.s32.f32 %v549_v0  ;;  %v1841_v12 = vunpack.c.l.b16 %v3360_v13  ;;  %v1203_v19 = vcvt.s32.f32 %v550_v10  ;;  %v646_v43 = vshra.s32 %v2849_v38, 7 }
 0x11a   :  { %4001 = vst [vmem:[#allocation112_spill] sm:$0xff] %v3363_v14  ;;  %v1204_v17 = vcvt.s32.f32 %v551_v32  ;;  %v1843_v39 = vunpack.c.l.b16 %v3363_v14  ;;  %v647_v8 = vshra.s32 %v2853_v57, 7  ;;  %v676_v2 = vand.u32 1, %v644_v61  ;;  %v4006_v61 = vld [vmem:[#allocation63_spill] sm:$0xff] }
 0x11b   :  { %v3369_v63 = vpack.c.bf16 %v1202_v53, %v1201_v33  ;;  %v677_v16 = vand.u32 1, %v645_v59  ;;  %v678_v7 = vand.u32 1, %v646_v43  ;;  %v448_v22 = vshra.s32 %v4004_v47, 4  ;;  %v4005_v33 = vld [vmem:[#allocation62_spill] sm:$0xff] }
 0x11c   :  { %v3372_v48 = vpack.c.bf16 %v1204_v17, %v1203_v19  ;;  %v1867_v36 = vpack.c.b16 %v1843_v39, %v1841_v12  ;;  %v679_v23 = vand.u32 1, %v647_v8  ;;  %v1297_v0 = vcvt.s32.f32 %v676_v2  ;;  %v4007_v17 = vld [vmem:[#allocation65_spill] sm:$0xff] }
 0x11d   :  { %4002 = vst [vmem:[#allocation113_spill] sm:$0xff] %v3369_v63  ;;  %v1761_v52 = vunpack.c.l.b16 %v3369_v63  ;;  %v1298_v10 = vcvt.s32.f32 %v677_v16  ;;  %v1299_v32 = vcvt.s32.f32 %v678_v7  ;;  %v449_v53 = vshra.s32 %v4005_v33, 4 }
 0x11e   :  { %4003 = vst [vmem:[#allocation114_spill] sm:$0xff] %v3372_v48  ;;  %v1763_v38 = vunpack.c.l.b16 %v3372_v48  ;;  %2099 = vmatpush.bf16.msrb.mxu2 %v1867_v36  ;;  %v1300_v57 = vcvt.s32.f32 %v679_v23  ;;  %v450_v19 = vshra.s32 %v4006_v61, 4  ;;  %v451_v59 = vshra.s32 %v4007_v17, 4 }
 0x11f   :  { %v480_v43 = vand.u32 1, %v448_v22  ;;  %v3380_v13 = vpack.c.bf16 %v1298_v10, %v1297_v0  ;;  %v481_v12 = vand.u32 1, %v449_v53  ;;  %v576_v39 = vshra.s32 %v4004_v47, 6 }
 0x120   :  { %v1787_v14 = vpack.c.b16 %v1763_v38, %v1761_v52  ;;  %v3383_v8 = vpack.c.bf16 %v1300_v57, %v1299_v32  ;;  %v482_v2 = vand.u32 1, %v450_v19  ;;  %v483_v16 = vand.u32 1, %v451_v59 }
 0x121   :  { %4008 = vst [vmem:[#allocation61_spill] sm:$0xff] %v3380_v13  ;;  %v1149_v7 = vcvt.s32.f32 %v480_v43  ;;  %v1921_v36 = vunpack.c.l.b16 %v3380_v13  ;;  %v1150_v23 = vcvt.s32.f32 %v481_v12  ;;  %v577_v48 = vshra.s32 %v4005_v33, 6 }
 0x122   :  { %4009 = vst [vmem:[#allocation62_spill] sm:$0xff] %v3383_v8  ;;  %2080 = vmatpush.bf16.msrb.mxu1 %v1787_v14  ;;  %v578_v63 = vshra.s32 %v4006_v61, 6  ;;  %v1923_v22 = vunpack.c.l.b16 %v3383_v8  ;;  %v1151_v52 = vcvt.s32.f32 %v482_v2  ;;  %v1152_v0 = vcvt.s32.f32 %v483_v16 }
 0x123   :  { %v579_v38 = vshra.s32 %v4007_v17, 6  ;;  %v3390_v10 = vpack.c.bf16 %v1150_v23, %v1149_v7  ;;  %v608_v32 = vand.u32 1, %v576_v39  ;;  %v609_v53 = vand.u32 1, %v577_v48 }
 0x124   :  { %v610_v57 = vand.u32 1, %v578_v63  ;;  %v1947_v19 = vpack.c.b16 %v1923_v22, %v1921_v36  ;;  %v3392_v14 = vpack.c.bf16 %v1152_v0, %v1151_v52  ;;  %v512_v43 = vshra.s32 %v4004_v47, 5 }
 0x125   :  { %v611_v59 = vand.u32 1, %v579_v38  ;;  %v1677_v12 = vunpack.c.l.b16 %v3390_v10  ;;  %v1245_v13 = vcvt.s32.f32 %v608_v32  ;;  %v1246_v24 = vcvt.s32.f32 %v609_v53 }
 0x126   :  { %4010 = vst [vmem:[#allocation63_spill] sm:$0xff] %v3392_v14  ;;  %v1247_v8 = vcvt.s32.f32 %v610_v57  ;;  %2118 = vmatpush.bf16.msrb.mxu3 %v1947_v19  ;;  %v1679_v2 = vunpack.c.l.b16 %v3392_v14  ;;  %v513_v7 = vshra.s32 %v4005_v33, 5  ;;  %v514_v48 = vshra.s32 %v4006_v61, 5 }
 0x127   :  { %v1248_v16 = vcvt.s32.f32 %v611_v59  ;;  %v3399_v63 = vpack.c.bf16 %v1246_v24, %v1245_v13  ;;  %v515_v39 = vshra.s32 %v4007_v17, 5  ;;  %v544_v36 = vand.u32 1, %v512_v43 }
 0x128   :  { %v640_v23 = vshra.s32 %v4004_v47, 7  ;;  %v1705_v22 = vpack.c.b16 %v1679_v2, %v1677_v12  ;;  %v545_v0 = vand.u32 1, %v513_v7  ;;  %v546_v38 = vand.u32 1, %v514_v48 }
 0x129   :  { %v3403_v52 = vpack.c.bf16 %v1248_v16, %v1247_v8  ;;  %v1837_v32 = vunpack.c.l.b16 %v3399_v63  ;;  %v547_v53 = vand.u32 1, %v515_v39  ;;  %v1197_v57 = vcvt.s32.f32 %v544_v36 }
 0x12a   :  { %v641_v19 = vshra.s32 %v4005_v33, 7  ;;  %2062 = vmatpush.bf16.msrb.mxu0 %v1705_v22  ;;  %v1198_v13 = vcvt.s32.f32 %v545_v0  ;;  %v1199_v59 = vcvt.s32.f32 %v546_v38  ;;  %v642_v43 = vshra.s32 %v4006_v61, 7 }
 0x12b   :  { %v1839_v24 = vunpack.c.l.b16 %v3403_v52  ;;  %v1200_v14 = vcvt.s32.f32 %v547_v53  ;;  %v643_v47 = vshra.s32 %v4007_v17, 7  ;;  %v672_v8 = vand.u32 1, %v640_v23 }
 0x12c   :  { %v673_v12 = vand.u32 1, %v641_v19  ;;  %v3410_v16 = vpack.c.bf16 %v1198_v13, %v1197_v57  ;;  %v674_v7 = vand.u32 1, %v642_v43  ;;  %v444_v48 = vshra.s32 %v3024_v26, 4 }
 0x12d   :  { %v1865_v2 = vpack.c.b16 %v1839_v24, %v1837_v32  ;;  %v3413_v39 = vpack.c.bf16 %v1200_v14, %v1199_v59  ;;  %v675_v33 = vand.u32 1, %v643_v47  ;;  %v1293_v36 = vcvt.s32.f32 %v672_v8 }
 0x12e   :  { %v1294_v22 = vcvt.s32.f32 %v673_v12  ;;  %v1757_v0 = vunpack.c.l.b16 %v3410_v16  ;;  %v1295_v61 = vcvt.s32.f32 %v674_v7  ;;  %v445_v38 = vshra.s32 %v3028_v20, 4 }
 0x12f   :  { %2100 = vmatpush.bf16.msrb.mxu2 %v1865_v2  ;;  %v446_v17 = vshra.s32 %v3031_v31, 4  ;;  %v1759_v23 = vunpack.c.l.b16 %v3413_v39  ;;  %v1296_v32 = vcvt.s32.f32 %v675_v33  ;;  %v447_v57 = vshra.s32 %v3033_v18, 4 }
 0x130   :  { %v3419_v53 = vpack.c.bf16 %v1294_v22, %v1293_v36  ;;  %v476_v14 = vand.u32 1, %v444_v48  ;;  %v477_v19 = vand.u32 1, %v445_v38  ;;  %v572_v13 = vshra.s32 %v3024_v26, 6 }
 0x131   :  { %v478_v24 = vand.u32 1, %v446_v17  ;;  %v1785_v59 = vpack.c.b16 %v1759_v23, %v1757_v0  ;;  %v3423_v43 = vpack.c.bf16 %v1296_v32, %v1295_v61  ;;  %v479_v8 = vand.u32 1, %v447_v57 }
 0x132   :  { %4011 = vst [vmem:[#allocation65_spill] sm:$0xff] %v3419_v53  ;;  %v1917_v47 = vunpack.c.l.b16 %v3419_v53  ;;  %v1145_v12 = vcvt.s32.f32 %v476_v14  ;;  %v1146_v2 = vcvt.s32.f32 %v477_v19  ;;  %v573_v33 = vshra.s32 %v3028_v20, 6 }
 0x133   :  { %4012 = vst [vmem:[#allocation115_spill] sm:$0xff] %v3423_v43  ;;  %v1147_v7 = vcvt.s32.f32 %v478_v24  ;;  %2081 = vmatpush.bf16.msrb.mxu1 %v1785_v59  ;;  %v1919_v36 = vunpack.c.l.b16 %v3423_v43  ;;  %v1148_v22 = vcvt.s32.f32 %v479_v8  ;;  %v574_v48 = vshra.s32 %v3031_v31, 6 }
 0x134   :  { %v575_v38 = vshra.s32 %v3033_v18, 6  ;;  %v3430_v17 = vpack.c.bf16 %v1146_v2, %v1145_v12  ;;  %v604_v0 = vand.u32 1, %v572_v13  ;;  %v605_v61 = vand.u32 1, %v573_v33 }
 0x135   :  { %v508_v23 = vshra.s32 %v3024_v26, 5  ;;  %v1945_v32 = vpack.c.b16 %v1919_v36, %v1917_v47  ;;  %v3433_v57 = vpack.c.bf16 %v1148_v22, %v1147_v7  ;;  %v606_v14 = vand.u32 1, %v574_v48 }
 0x136   :  { %v607_v19 = vand.u32 1, %v575_v38  ;;  %v1673_v24 = vunpack.c.l.b16 %v3430_v17  ;;  %v1241_v59 = vcvt.s32.f32 %v604_v0  ;;  %v1242_v43 = vcvt.s32.f32 %v605_v61 }
 0x137   :  { %4013 = vst [vmem:[#allocation116_spill] sm:$0xff] %v3433_v57  ;;  %v509_v8 = vshra.s32 %v3028_v20, 5  ;;  %2119 = vmatpush.bf16.msrb.mxu3 %v1945_v32  ;;  %v1675_v53 = vunpack.c.l.b16 %v3433_v57  ;;  %v1243_v12 = vcvt.s32.f32 %v606_v14  ;;  %v510_v13 = vshra.s32 %v3031_v31, 5 }
 0x138   :  { %v1244_v2 = vcvt.s32.f32 %v607_v19  ;;  %v3439_v33 = vpack.c.bf16 %v1242_v43, %v1241_v59  ;;  %v511_v47 = vshra.s32 %v3033_v18, 5  ;;  %v540_v7 = vand.u32 1, %v508_v23 }
 0x139   :  { %v541_v36 = vand.u32 1, %v509_v8  ;;  %v1703_v22 = vpack.c.b16 %v1675_v53, %v1673_v24  ;;  %v542_v38 = vand.u32 1, %v510_v13  ;;  %v636_v0 = vshra.s32 %v3024_v26, 7 }
 0x13a   :  { %v3442_v48 = vpack.c.bf16 %v1244_v2, %v1243_v12  ;;  %v1833_v61 = vunpack.c.l.b16 %v3439_v33  ;;  %v543_v32 = vand.u32 1, %v511_v47  ;;  %v1193_v57 = vcvt.s32.f32 %v540_v7 }
 0x13b   :  { %v1194_v14 = vcvt.s32.f32 %v541_v36  ;;  %2063 = vmatpush.bf16.msrb.mxu0 %v1703_v22  ;;  %v1195_v43 = vcvt.s32.f32 %v542_v38  ;;  %v637_v59 = vshra.s32 %v3028_v20, 7  ;;  %v638_v23 = vshra.s32 %v3031_v31, 7 }
 0x13c   :  { %v1835_v19 = vunpack.c.l.b16 %v3442_v48  ;;  %v1196_v8 = vcvt.s32.f32 %v543_v32  ;;  %v639_v24 = vshra.s32 %v3033_v18, 7  ;;  %v668_v12 = vand.u32 1, %v636_v0 }
 0x13d   :  { %v3449_v53 = vpack.c.bf16 %v1194_v14, %v1193_v57  ;;  %v669_v2 = vand.u32 1, %v637_v59  ;;  %v670_v13 = vand.u32 1, %v638_v23  ;;  %v440_v47 = vshra.s32 %v3074_v21, 4 }
 0x13e   :  { %v1863_v26 = vpack.c.b16 %v1835_v19, %v1833_v61  ;;  %v3453_v7 = vpack.c.bf16 %v1196_v8, %v1195_v43  ;;  %v671_v22 = vand.u32 1, %v639_v24  ;;  %v1289_v38 = vcvt.s32.f32 %v668_v12 }
 0x13f   :  { %4014 = vst [vmem:[#allocation117_spill] sm:$0xff] %v3449_v53  ;;  %v1753_v36 = vunpack.c.l.b16 %v3449_v53  ;;  %v1290_v20 = vcvt.s32.f32 %v669_v2  ;;  %v1291_v31 = vcvt.s32.f32 %v670_v13  ;;  %v441_v57 = vshra.s32 %v3078_v37, 4 }
 0x140   :  { %4015 = vst [vmem:[#allocation118_spill] sm:$0xff] %v3453_v7  ;;  %2101 = vmatpush.bf16.msrb.mxu2 %v1863_v26  ;;  %v442_v32 = vshra.s32 %v3080_v34, 4  ;;  %v1755_v18 = vunpack.c.l.b16 %v3453_v7  ;;  %v1292_v0 = vcvt.s32.f32 %v671_v22  ;;  %v443_v61 = vshra.s32 %v3084_v49, 4 }
 0x141   :  { %v472_v14 = vand.u32 1, %v440_v47  ;;  %v3460_v19 = vpack.c.bf16 %v1290_v20, %v1289_v38  ;;  %v473_v43 = vand.u32 1, %v441_v57  ;;  %v568_v23 = vshra.s32 %v3074_v21, 6 }
 0x142   :  { %v474_v59 = vand.u32 1, %v442_v32  ;;  %v1783_v8 = vpack.c.b16 %v1755_v18, %v1753_v36  ;;  %v3463_v24 = vpack.c.bf16 %v1292_v0, %v1291_v31  ;;  %v475_v12 = vand.u32 1, %v443_v61 }
 0x143   :  { %4016 = vst [vmem:[#allocation119_spill] sm:$0xff] %v3460_v19  ;;  %v1141_v26 = vcvt.s32.f32 %v472_v14  ;;  %v1913_v2 = vunpack.c.l.b16 %v3460_v19  ;;  %v1142_v13 = vcvt.s32.f32 %v473_v43  ;;  %v569_v22 = vshra.s32 %v3078_v37, 6 }
 0x144   :  { %4017 = vst [vmem:[#allocation120_spill] sm:$0xff] %v3463_v24  ;;  %v1143_v53 = vcvt.s32.f32 %v474_v59  ;;  %2082 = vmatpush.bf16.msrb.mxu1 %v1783_v8  ;;  %v1915_v47 = vunpack.c.l.b16 %v3463_v24  ;;  %v1144_v38 = vcvt.s32.f32 %v475_v12  ;;  %v570_v20 = vshra.s32 %v3080_v34, 6 }
 0x145   :  { %v571_v57 = vshra.s32 %v3084_v49, 6  ;;  %v3470_v32 = vpack.c.bf16 %v1142_v13, %v1141_v26  ;;  %v600_v36 = vand.u32 1, %v568_v23  ;;  %v601_v31 = vand.u32 1, %v569_v22 }
 0x146   :  { %v504_v18 = vshra.s32 %v3074_v21, 5  ;;  %v1943_v0 = vpack.c.b16 %v1915_v47, %v1913_v2  ;;  %v3473_v61 = vpack.c.bf16 %v1144_v38, %v1143_v53  ;;  %v602_v14 = vand.u32 1, %v570_v20 }
 0x147   :  { %4018 = vst [vmem:[#allocation121_spill] sm:$0xff] %v3470_v32  ;;  %v603_v43 = vand.u32 1, %v571_v57  ;;  %v1669_v59 = vunpack.c.l.b16 %v3470_v32  ;;  %v1237_v8 = vcvt.s32.f32 %v600_v36  ;;  %v1238_v24 = vcvt.s32.f32 %v601_v31 }
 0x148   :  { %4019 = vst [vmem:[#allocation122_spill] sm:$0xff] %v3473_v61  ;;  %v505_v12 = vshra.s32 %v3078_v37, 5  ;;  %2120 = vmatpush.bf16.msrb.mxu3 %v1943_v0  ;;  %v1671_v19 = vunpack.c.l.b16 %v3473_v61  ;;  %v1239_v26 = vcvt.s32.f32 %v602_v14  ;;  %v506_v23 = vshra.s32 %v3080_v34, 5 }
 0x149   :  { %v1240_v13 = vcvt.s32.f32 %v603_v43  ;;  %v3479_v22 = vpack.c.bf16 %v1238_v24, %v1237_v8  ;;  %v507_v53 = vshra.s32 %v3084_v49, 5  ;;  %v536_v2 = vand.u32 1, %v504_v18 }
 0x14a   :  { %v537_v47 = vand.u32 1, %v505_v12  ;;  %v1701_v38 = vpack.c.b16 %v1671_v19, %v1669_v59  ;;  %v538_v57 = vand.u32 1, %v506_v23  ;;  %v632_v36 = vshra.s32 %v3074_v21, 7 }
 0x14b   :  { %4020 = vst [vmem:[#allocation123_spill] sm:$0xff] %v3479_v22  ;;  %v3482_v20 = vpack.c.bf16 %v1240_v13, %v1239_v26  ;;  %v1829_v31 = vunpack.c.l.b16 %v3479_v22  ;;  %v539_v0 = vand.u32 1, %v507_v53  ;;  %v1189_v61 = vcvt.s32.f32 %v536_v2  ;;  %v4023_v53 = vld [vmem:[#allocation45_spill] sm:$0xff] }
 0x14c   :  { %v1190_v14 = vcvt.s32.f32 %v537_v47  ;;  %2064 = vmatpush.bf16.msrb.mxu0 %v1701_v38  ;;  %v1191_v24 = vcvt.s32.f32 %v538_v57  ;;  %v633_v8 = vshra.s32 %v3078_v37, 7  ;;  %v634_v18 = vshra.s32 %v3080_v34, 7 }
 0x14d   :  { %4021 = vst [vmem:[#allocation124_spill] sm:$0xff] %v3482_v20  ;;  %v1831_v43 = vunpack.c.l.b16 %v3482_v20  ;;  %v1192_v12 = vcvt.s32.f32 %v539_v0  ;;  %v635_v59 = vshra.s32 %v3084_v49, 7  ;;  %v664_v26 = vand.u32 1, %v632_v36  ;;  %v4025_v0 = vld [vmem:[#allocation76_spill] sm:$0xff] }
 0x14e   :  { %v3489_v19 = vpack.c.bf16 %v1190_v14, %v1189_v61  ;;  %v665_v13 = vand.u32 1, %v633_v8  ;;  %v666_v23 = vand.u32 1, %v634_v18  ;;  %v821_v2 = vcvt.s32.f32 %v4023_v53  ;;  %v4028_v8 = vld [vmem:[#allocation14_spill] sm:$0xff] }
 0x14f   :  { %v1861_v21 = vpack.c.b16 %v1831_v43, %v1829_v31  ;;  %v3493_v47 = vpack.c.bf16 %v1192_v12, %v1191_v24  ;;  %v667_v57 = vand.u32 1, %v635_v59  ;;  %v1285_v32 = vcvt.s32.f32 %v664_v26  ;;  %v4026_v31 = vld [vmem:[#allocation13_spill] sm:$0xff]  ;;  %v4030_v24 = vld [vmem:[#allocation46_spill] sm:$0xff] }
 0x150   :  { %4022 = vst [vmem:[#allocation125_spill] sm:$0xff] %v3489_v19  ;;  %v1749_v38 = vunpack.c.l.b16 %v3489_v19  ;;  %v1286_v37 = vcvt.s32.f32 %v665_v13  ;;  %v1287_v34 = vcvt.s32.f32 %v666_v23  ;;  %v822_v61 = vcvt.s32.f32 %v4025_v0  ;;  %v4034_v0 = vld [vmem:[#allocation47_spill] sm:$0xff] }
 0x151   :  { %4024 = vst [vmem:[#allocation45_spill] sm:$0xff] %v3493_v47  ;;  %2102 = vmatpush.bf16.msrb.mxu2 %v1861_v21  ;;  %v825_v14 = vpack.c.bf16 %v821_v2, %v821_v2  ;;  %v1751_v49 = vunpack.c.l.b16 %v3493_v47  ;;  %v1288_v36 = vcvt.s32.f32 %v667_v57  ;;  %v4027_v43 = vunpack.c.h.b16 %v4026_v31  ;;  %v4032_v21 = vld [vmem:[#allocation77_spill] sm:$0xff] }
 0x152   :  { %v4029_v18 = vunpack.c.h.b16 %v4028_v8  ;;  %v829_v12 = vcvt.s32.f32 %v4030_v24  ;;  %v3503_v20 = vpack.c.bf16 %v1286_v37, %v1285_v32  ;;  %v826_v59 = vpack.c.bf16 %v822_v61, %v822_v61 }
 0x153   :  { %v905_v26 = vunpack.c.l.b16 %v825_v14  ;;  %v830_v13 = vcvt.s32.f32 %v4032_v21  ;;  %v1781_v23 = vpack.c.b16 %v1751_v49, %v1749_v38  ;;  %v3506_v19 = vpack.c.bf16 %v1288_v36, %v1287_v34  ;;  %v4036_v14 = vld [vmem:[#allocation79_spill] sm:$0xff]  ;;  %v4038_v36 = vld [vmem:[#allocation48_spill] sm:$0xff] }
 0x154   :  { %v1396_v53 = vpack.c.b16 %v4029_v18, %v4027_v43  ;;  %4031 = vst [vmem:[#allocation76_spill] sm:$0xff] %v3503_v20  ;;  %v833_v2 = vpack.c.bf16 %v829_v12, %v829_v12  ;;  %v837_v57 = vcvt.s32.f32 %v4034_v0  ;;  %v1909_v31 = vunpack.c.l.b16 %v3503_v20  ;;  %v4035_v43 = vld [vmem:[#allocation78_spill] sm:$0xff]  ;;  %v4040_v0 = vld [vmem:[#allocation17_spill] sm:$0xff] }
 0x155   :  { %4033 = vst [vmem:[#allocation13_spill] sm:$0xff] %v3506_v19  ;;  %v906_v47 = vunpack.c.l.b16 %v826_v59  ;;  %v834_v8 = vpack.c.bf16 %v830_v13, %v830_v13  ;;  %v838_v18 = vcvt.s32.f32 %v4035_v43  ;;  %2083 = vmatpush.bf16.msrb.mxu1 %v1781_v23  ;;  %v1911_v32 = vunpack.c.l.b16 %v3506_v19  ;;  %v4042_v23 = vld [vmem:[#allocation18_spill] sm:$0xff] }
 0x156   :  { %2133 = vmatpush.bf16.msra.mxu0 %v1396_v53  ;;  %v917_v37 = vunpack.c.l.b16 %v833_v2  ;;  %v841_v61 = vpack.c.bf16 %v837_v57, %v837_v57  ;;  %v846_v24 = vcvt.s32.f32 %v4036_v14  ;;  %v4039_v53 = vcvt.s32.f32 %v4038_v36  ;;  %v4045_v57 = vld [vmem:[#allocation15_spill] sm:$0xff] }
 0x157   :  { %v3513_v38 = vpack.c.b16 %v906_v47, %v905_v26  ;;  %v918_v34 = vunpack.c.l.b16 %v834_v8  ;;  %v842_v49 = vpack.c.bf16 %v838_v18, %v838_v18  ;;  %v1941_v21 = vpack.c.b16 %v1911_v32, %v1909_v31  ;;  %v4047_v18 = vld [vmem:[#allocation16_spill] sm:$0xff]  ;;  %v4049_v32 = vld [vmem:[#allocation19_spill] sm:$0xff] }
 0x158   :  { %v849_v12 = vpack.c.bf16 %v4039_v53, %v4039_v53  ;;  %v929_v59 = vunpack.c.l.b16 %v841_v61  ;;  %v850_v13 = vpack.c.bf16 %v846_v24, %v846_v24  ;;  %v4041_v43 = vunpack.c.h.b16 %v4040_v0  ;;  %v4051_v24 = vld [vmem:[#allocation20_spill] sm:$0xff] }
 0x159   :  { %4037 = vst [vmem:[#allocation14_spill] sm:$0xff] %v3513_v38  ;;  %v4043_v20 = vunpack.c.h.b16 %v4042_v23  ;;  %2065 = vmatmul.bf16.vlgmr.msrb.gmra.mxu0 %v3513_v38  ;;  %v3523_v2 = vpack.c.b16 %v918_v34, %v917_v37  ;;  %v930_v47 = vunpack.c.l.b16 %v842_v49  ;;  %v4046_v8 = vunpack.c.h.b16 %v4045_v57  ;;  %2121 = vmatpush.bf16.msrb.mxu3 %v1941_v21  ;;  %v4054_v23 = vld [vmem:[#allocation22_spill] sm:$0xff]  ;;  %v4056_v49 = vld [vmem:[#allocation25_spill] sm:$0xff]  ;;  %v4058_v21 = vld [vmem:[#allocation23_spill] sm:$0xff] }
 0x15a   :  { %v941_v26 = vunpack.c.l.b16 %v849_v12  ;;  %v4048_v14 = vunpack.c.h.b16 %v4047_v18  ;;  %v942_v31 = vunpack.c.l.b16 %v850_v13  ;;  %v4050_v61 = vunpack.c.h.b16 %v4049_v32  ;;  %v4057_v57 = vld [vmem:[#allocation26_spill] sm:$0xff] }
 0x15b   :  { %v1556_v19 = vpack.c.b16 %v4043_v20, %v4041_v43  ;;  %4044 = vst [vmem:[#allocation46_spill] sm:$0xff] %v3523_v2  ;;  %v4052_v53 = vunpack.c.h.b16 %v4051_v24  ;;  %v4053_v20 = vld [vmem:[#allocation21_spill] sm:$0xff]  ;;  %v1376_v37 = vunpack.c.h.b16 %v4054_v23  ;;  %2084 = vmatmul.bf16.vlgmr.msrb.gmra.mxu1 %v3523_v2  ;;  %v3536_v34 = vpack.c.b16 %v930_v47, %v929_v59  ;;  %v4062_v59 = vld [vmem:[#allocation28_spill] sm:$0xff] }
 0x15c   :  { %v1476_v36 = vpack.c.b16 %v4048_v14, %v4046_v8  ;;  %v1374_v43 = vunpack.c.h.b16 %v4053_v20  ;;  %v1534_v12 = vunpack.c.h.b16 %v4056_v49  ;;  %v1536_v8 = vunpack.c.h.b16 %v4057_v57  ;;  %v4060_v14 = vld [vmem:[#allocation24_spill] sm:$0xff]  ;;  %v4063_v20 = vld [vmem:[#allocation29_spill] sm:$0xff]  ;;  %v4064_v49 = vld [vmem:[#allocation30_spill] sm:$0xff] }
 0x15d   :  { %2171 = vmatpush.bf16.msra.mxu2 %v1556_v19  ;;  %v1636_v0 = vpack.c.b16 %v4052_v53, %v4050_v61  ;;  %4055 = vst [vmem:[#allocation77_spill] sm:$0xff] %v3536_v34  ;;  %v1454_v13 = vunpack.c.h.b16 %v4058_v21  ;;  %v3541_v19 = vpack.c.b16 %v942_v31, %v941_v26  ;;  %v1456_v32 = vunpack.c.h.b16 %v4060_v14  ;;  %v4061_v61 = vld [vmem:[#allocation27_spill] sm:$0xff] }
 0x15e   :  { %2152 = vmatpush.bf16.msra.mxu1 %v1476_v36  ;;  %v1394_v18 = vpack.c.b16 %v1376_v37, %v1374_v43  ;;  %v1614_v24 = vunpack.c.h.b16 %v4061_v61  ;;  %2103 = vmatmul.bf16.vlgmr.msrb.gmra.mxu2 %v3536_v34  ;;  %v1554_v53 = vpack.c.b16 %v1536_v8, %v1534_v12  ;;  %v1616_v47 = vunpack.c.h.b16 %v4062_v59  ;;  %v4065_v36 = vld [vmem:[#allocation33_spill] sm:$0xff]  ;;  %v4067_v37 = vld [vmem:[#allocation31_spill] sm:$0xff]  ;;  %v4068_v12 = vld [vmem:[#allocation32_spill] sm:$0xff] }
 0x15f   :  { %4059 = vst [vmem:[#allocation47_spill] sm:$0xff] %v3541_v19  ;;  %2190 = vmatpush.bf16.msra.mxu3 %v1636_v0  ;;  %v1370_v23 = vunpack.c.h.b16 %v4063_v20  ;;  %v1372_v57 = vunpack.c.h.b16 %v4064_v49  ;;  %v1474_v26 = vpack.c.b16 %v1456_v32, %v1454_v13  ;;  %v1530_v31 = vunpack.c.h.b16 %v4065_v36  ;;  %v4066_v0 = vld [vmem:[#allocation34_spill] sm:$0xff]  ;;  %v4069_v59 = vld [vmem:[#allocation35_spill] sm:$0xff]  ;;  %v4070_v49 = vld [vmem:[#allocation36_spill] sm:$0xff] }
 0x160   :  { %2122 = vmatmul.bf16.vlgmr.msrb.gmra.mxu3 %v3541_v19  ;;  %2134 = vmatpush.bf16.msra.mxu0 %v1394_v18  ;;  %v1532_v43 = vunpack.c.h.b16 %v4066_v0  ;;  %v1450_v21 = vunpack.c.h.b16 %v4067_v37  ;;  %v1634_v14 = vpack.c.b16 %v1616_v47, %v1614_v24  ;;  %v1452_v8 = vunpack.c.h.b16 %v4068_v12  ;;  %v4071_v19 = vld [vmem:[#allocation37_spill] sm:$0xff]  ;;  %v4072_v13 = vld [vmem:[#allocation38_spill] sm:$0xff]  ;;  %v4073_v0 = vld [vmem:[#allocation51_spill] sm:$0xff] }
 0x161   :  { %2172 = vmatpush.bf16.msra.mxu2 %v1554_v53  ;;  %v1392_v61 = vpack.c.b16 %v1372_v57, %v1370_v23  ;;  %v1610_v34 = vunpack.c.h.b16 %v4069_v59  ;;  %v1612_v2 = vunpack.c.h.b16 %v4070_v49  ;;  %v1366_v18 = vunpack.c.h.b16 %v4071_v19  ;;  %v4074_v37 = vld [vmem:[#allocation52_spill] sm:$0xff]  ;;  %v4075_v24 = vld [vmem:[#allocation49_spill] sm:$0xff]  ;;  %v4076_v12 = vld [vmem:[#allocation50_spill] sm:$0xff] }
 0x162   :  { %2153 = vmatpush.bf16.msra.mxu1 %v1474_v26  ;;  %v1552_v20 = vpack.c.b16 %v1532_v43, %v1530_v31  ;;  %v1368_v32 = vunpack.c.h.b16 %v4072_v13  ;;  %v1472_v36 = vpack.c.b16 %v1452_v8, %v1450_v21  ;;  %v1526_v38 = vunpack.c.h.b16 %v4073_v0  ;;  %v4077_v31 = vld [vmem:[#allocation53_spill] sm:$0xff]  ;;  %v4078_v19 = vld [vmem:[#allocation54_spill] sm:$0xff]  ;;  %v4080_v21 = vld [vmem:[#allocation72_spill] sm:$0xff] }
 0x163   :  { %2191 = vmatpush.bf16.msra.mxu3 %v1634_v14  ;;  %v1528_v53 = vunpack.c.h.b16 %v4074_v37  ;;  %v1446_v47 = vunpack.c.h.b16 %v4075_v24  ;;  %v1632_v23 = vpack.c.b16 %v1612_v2, %v1610_v34  ;;  %v1448_v26 = vunpack.c.h.b16 %v4076_v12  ;;  %v4079_v13 = vld [vmem:[#allocation41_spill] sm:$0xff]  ;;  %v4081_v37 = vld [vmem:[#allocation55_spill] sm:$0xff]  ;;  %v4082_v24 = vld [vmem:[#allocation56_spill] sm:$0xff] }
 0x164   :  { %2135 = vmatpush.bf16.msra.mxu0 %v1392_v61  ;;  %v1390_v57 = vpack.c.b16 %v1368_v32, %v1366_v18  ;;  %v1606_v43 = vunpack.c.h.b16 %v4077_v31  ;;  %v1608_v49 = vunpack.c.h.b16 %v4078_v19  ;;  %v823_v14 = vcvt.s32.f32 %v4079_v13  ;;  %v4083_v2 = vld [vmem:[#allocation42_spill] sm:$0xff]  ;;  %v4085_v19 = vld [vmem:[#allocation43_spill] sm:$0xff] }
 0x165   :  { %2173 = vmatpush.bf16.msra.mxu2 %v1552_v20  ;;  %v1550_v59 = vpack.c.b16 %v1528_v53, %v1526_v38  ;;  %v824_v8 = vcvt.s32.f32 %v4080_v21  ;;  %v1470_v0 = vpack.c.b16 %v1448_v26, %v1446_v47  ;;  %v1362_v22 = vunpack.c.h.b16 %v4081_v37  ;;  %v4084_v20 = vld [vmem:[#allocation73_spill] sm:$0xff]  ;;  %v4086_v21 = vld [vmem:[#allocation74_spill] sm:$0xff] }
 0x166   :  { %2154 = vmatpush.bf16.msra.mxu1 %v1472_v36  ;;  %v1364_v61 = vunpack.c.h.b16 %v4082_v24  ;;  %v831_v34 = vcvt.s32.f32 %v4083_v2  ;;  %v1630_v18 = vpack.c.b16 %v1608_v49, %v1606_v43  ;;  %v827_v32 = vpack.c.bf16 %v823_v14, %v823_v14  ;;  %v4087_v24 = vld [vmem:[#allocation44_spill] sm:$0xff]  ;;  %v4088_v14 = vld [vmem:[#allocation75_spill] sm:$0xff] }
 0x167   :  { %2192 = vmatpush.bf16.msra.mxu3 %v1632_v23  ;;  %v828_v12 = vpack.c.bf16 %v824_v8, %v824_v8  ;;  %v832_v38 = vcvt.s32.f32 %v4084_v20  ;;  %v839_v13 = vcvt.s32.f32 %v4085_v19  ;;  %v840_v36 = vcvt.s32.f32 %v4086_v21  ;;  %v4089_v2 = vld [vmem:[#allocation59_spill] sm:$0xff]  ;;  %v4090_v20 = vld [vmem:[#allocation60_spill] sm:$0xff]  ;;  %v4091_v19 = vld [vmem:[#allocation57_spill] sm:$0xff] }
 0x168   :  { %2136 = vmatpush.bf16.msra.mxu0 %v1390_v57  ;;  %v1388_v53 = vpack.c.b16 %v1364_v61, %v1362_v22  ;;  %v835_v31 = vpack.c.bf16 %v831_v34, %v831_v34  ;;  %v907_v47 = vunpack.c.l.b16 %v827_v32  ;;  %v847_v7 = vcvt.s32.f32 %v4087_v24  ;;  %v4094_v24 = vld [vmem:[#allocation66_spill] sm:$0xff] }
 0x169   :  { %2174 = vmatpush.bf16.msra.mxu2 %v1550_v59  ;;  %v908_v26 = vunpack.c.l.b16 %v828_v12  ;;  %v836_v37 = vpack.c.bf16 %v832_v38, %v832_v38  ;;  %v843_v43 = vpack.c.bf16 %v839_v13, %v839_v13  ;;  %v844_v49 = vpack.c.bf16 %v840_v36, %v840_v36 }
 0x16a   :  { %2155 = vmatpush.bf16.msra.mxu1 %v1470_v0  ;;  %v919_v23 = vunpack.c.l.b16 %v835_v31  ;;  %v848_v8 = vcvt.s32.f32 %v4088_v14  ;;  %v851_v61 = vpack.c.bf16 %v847_v7, %v847_v7  ;;  %v1522_v34 = vunpack.c.h.b16 %v4089_v2 }
 0x16b   :  { %2193 = vmatpush.bf16.msra.mxu3 %v1630_v18  ;;  %v3574_v57 = vpack.c.b16 %v908_v26, %v907_v47  ;;  %v920_v22 = vunpack.c.l.b16 %v836_v37  ;;  %v931_v59 = vunpack.c.l.b16 %v843_v43  ;;  %v932_v32 = vunpack.c.l.b16 %v844_v49  ;;  %v4092_v18 = vld [vmem:[#allocation58_spill] sm:$0xff]  ;;  %v4093_v26 = vld [vmem:[#allocation64_spill] sm:$0xff]  ;;  %v4095_v49 = vld [vmem:[#allocation67_spill] sm:$0xff] }
 0x16c   :  { %2137 = vmatpush.bf16.msra.mxu0 %v1388_v53  ;;  %v852_v12 = vpack.c.bf16 %v848_v8, %v848_v8  ;;  %v1524_v38 = vunpack.c.h.b16 %v4090_v20  ;;  %v943_v31 = vunpack.c.l.b16 %v851_v61  ;;  %v1442_v13 = vunpack.c.h.b16 %v4091_v19  ;;  %v4098_v61 = vld [vmem:[#allocation82_spill] sm:$0xff]  ;;  %v4101_v19 = vld [vmem:[#allocation81_spill] sm:$0xff] }
 0x16d   :  { %2070 = vmatmul.bf16.gmra.mxu0 %v3574_v57  ;;  %v3579_v0 = vpack.c.b16 %v920_v22, %v919_v23  ;;  %v1444_v21 = vunpack.c.h.b16 %v4092_v18  ;;  %v3583_v36 = vpack.c.b16 %v932_v32, %v931_v59  ;;  %v1602_v53 = vunpack.c.h.b16 %v4093_v26  ;;  %v4096_v23 = vld [vmem:[#allocation68_spill] sm:$0xff]  ;;  %v4099_v59 = vld [vmem:[#allocation83_spill] sm:$0xff] }
 0x16e   :  { %v944_v7 = vunpack.c.l.b16 %v852_v12  ;;  %v1548_v47 = vpack.c.b16 %v1524_v38, %v1522_v34  ;;  %v1604_v43 = vunpack.c.h.b16 %v4094_v24  ;;  %v1358_v14 = vunpack.c.h.b16 %v4095_v49  ;;  %v4100_v34 = vld [vmem:[#allocation80_spill] sm:$0xff]  ;;  %v4103_v24 = vld [vmem:[#allocation85_spill] sm:$0xff] }
 0x16f   :  { %2089 = vmatmul.bf16.gmra.mxu1 %v3579_v0  ;;  %v1468_v37 = vpack.c.b16 %v1444_v21, %v1442_v13  ;;  %v1360_v8 = vunpack.c.h.b16 %v4096_v23  ;;  %2108 = vmatmul.bf16.gmra.mxu2 %v3583_v36  ;;  %v1518_v2 = vunpack.c.h.b16 %v4098_v61  ;;  %v1520_v32 = vunpack.c.h.b16 %v4099_v59  ;;  %v4102_v18 = vld [vmem:[#allocation84_spill] sm:$0xff]  ;;  %v4105_v23 = vld [vmem:[#allocation87_spill] sm:$0xff] }
 0x170   :  { %v3591_v22 = vpack.c.b16 %v944_v7, %v943_v31  ;;  %v1438_v12 = vunpack.c.h.b16 %v4100_v34  ;;  %2175 = vmatpush.bf16.msra.mxu2 %v1548_v47  ;;  %v1628_v20 = vpack.c.b16 %v1604_v43, %v1602_v53  ;;  %v1440_v13 = vunpack.c.h.b16 %v4101_v19  ;;  %v4104_v7 = vld [vmem:[#allocation86_spill] sm:$0xff]  ;;  %v4107_v53 = vld [vmem:[#allocation91_spill] sm:$0xff] }
 0x171   :  { %2156 = vmatpush.bf16.msra.mxu1 %v1468_v37  ;;  %v1386_v38 = vpack.c.b16 %v1360_v8, %v1358_v14  ;;  %v1598_v21 = vunpack.c.h.b16 %v4102_v18  ;;  %v1546_v26 = vpack.c.b16 %v1520_v32, %v1518_v2  ;;  %v1600_v31 = vunpack.c.h.b16 %v4103_v24  ;;  %v4106_v47 = vld [vmem:[#allocation90_spill] sm:$0xff]  ;;  %v4108_v14 = vld [vmem:[#allocation88_spill] sm:$0xff]  ;;  %v4109_v18 = vld [vmem:[#allocation89_spill] sm:$0xff] }
 0x172   :  { %4097 = vst [vmem:[#allocation78_spill] sm:$0xff] %v3591_v22  ;;  %2127 = vmatmul.bf16.gmra.mxu3 %v3591_v22  ;;  %v1354_v49 = vunpack.c.h.b16 %v4104_v7  ;;  %v1356_v61 = vunpack.c.h.b16 %v4105_v23  ;;  %v1466_v59 = vpack.c.b16 %v1440_v13, %v1438_v12  ;;  %v1514_v37 = vunpack.c.h.b16 %v4106_v47  ;;  %v4110_v2 = vld [vmem:[#allocation92_spill] sm:$0xff]  ;;  %v4111_v7 = vld [vmem:[#allocation93_spill] sm:$0xff] }
 0x173   :  { %2194 = vmatpush.bf16.msra.mxu3 %v1628_v20  ;;  %2138 = vmatpush.bf16.msra.mxu0 %v1386_v38  ;;  %v1516_v43 = vunpack.c.h.b16 %v4107_v53  ;;  %v1434_v8 = vunpack.c.h.b16 %v4108_v14  ;;  %v1626_v34 = vpack.c.b16 %v1600_v31, %v1598_v21  ;;  %v1436_v22 = vunpack.c.h.b16 %v4109_v18  ;;  %v4112_v20 = vld [vmem:[#allocation94_spill] sm:$0xff]  ;;  %v4113_v21 = vld [vmem:[#allocation95_spill] sm:$0xff] }
 0x174   :  { %v1384_v19 = vpack.c.b16 %v1356_v61, %v1354_v49  ;;  %v1594_v32 = vunpack.c.h.b16 %v4110_v2  ;;  %2176 = vmatpush.bf16.msra.mxu2 %v1546_v26  ;;  %v1596_v23 = vunpack.c.h.b16 %v4111_v7  ;;  %v1350_v38 = vunpack.c.h.b16 %v4112_v20  ;;  %v4114_v26 = vld [vmem:[#allocation96_spill] sm:$0xff]  ;;  %v4124_v20 = vld [vmem:[#allocation102_spill] sm:$0xff] }
 0x175   :  { %2157 = vmatpush.bf16.msra.mxu1 %v1466_v59  ;;  %v1544_v24 = vpack.c.b16 %v1516_v43, %v1514_v37  ;;  %v1352_v12 = vunpack.c.h.b16 %v3101_v46  ;;  %v1464_v13 = vpack.c.b16 %v1436_v22, %v1434_v8  ;;  %v1510_v47 = vunpack.c.h.b16 %v3117_v60 }
 0x176   :  { %v1512_v53 = vunpack.c.h.b16 %v3120_v40  ;;  %v1430_v31 = vunpack.c.h.b16 %v4113_v21  ;;  %v1624_v49 = vpack.c.b16 %v1596_v23, %v1594_v32  ;;  %v1432_v59 = vunpack.c.h.b16 %v4114_v26  ;;  %v4128_v21 = vld [vmem:[#allocation105_spill] sm:$0xff] }
 0x177   :  { %2195 = vmatpush.bf16.msra.mxu3 %v1626_v34  ;;  %2139 = vmatpush.bf16.msra.mxu0 %v1384_v19  ;;  %v1382_v61 = vpack.c.b16 %v1352_v12, %v1350_v38  ;;  %v1590_v37 = vunpack.c.h.b16 %v3130_v35  ;;  %v1592_v14 = vunpack.c.h.b16 %v3133_v4  ;;  %v4115_v46 = vunpack.c.h.b16 %v3144_v44  ;;  %v4125_v38 = vld [vmem:[#allocation103_spill] sm:$0xff] }
 0x178   :  { %v1542_v43 = vpack.c.b16 %v1512_v53, %v1510_v47  ;;  %v4116_v22 = vunpack.c.h.b16 %v3148_v58  ;;  %v4117_v40 = vunpack.c.h.b16 %v3173_v30  ;;  %v4118_v8 = vunpack.c.h.b16 %v3176_v62  ;;  %2177 = vmatpush.bf16.msra.mxu2 %v1544_v24  ;;  %v3644_v47 = vpop.xlane.xlu1 %758  ;;  %v4127_v53 = vld [vmem:[#allocation97_spill] sm:$0xff] }
 0x179   :  { %2158 = vmatpush.bf16.msra.mxu1 %v1464_v13  ;;  %v1462_v19 = vpack.c.b16 %v1432_v59, %v1430_v31  ;;  %v4119_v18 = vunpack.c.h.b16 %v3184_v3  ;;  %v4120_v35 = vunpack.c.h.b16 %v3186_v29  ;;  %v4121_v4 = vunpack.c.h.b16 %v3195_v41  ;;  %v4123_v3 = vld [vmem:[#allocation101_spill] sm:$0xff]  ;;  %v3650_v59 = vpop.xlane.xlu0 %734 }
 0x17a   :  { %v1716_v60 = vpack.c.b16 %v4116_v22, %v4115_v46  ;;  %v1876_v34 = vpack.c.b16 %v4118_v8, %v4117_v40  ;;  %v4122_v44 = vunpack.c.h.b16 %v3199_v55  ;;  %v1694_v58 = vunpack.c.h.b16 %v3208_v54  ;;  %v4132_v46 = vld [vmem:[#allocation98_spill] sm:$0xff]  ;;  %v4133_v22 = vld [vmem:[#allocation99_spill] sm:$0xff] }
 0x17b   :  { %v1796_v2 = vpack.c.b16 %v4120_v35, %v4119_v18  ;;  %v1696_v30 = vunpack.c.h.b16 %v3210_v50  ;;  %v1854_v62 = vunpack.c.h.b16 %v3217_v5  ;;  %v1856_v24 = vunpack.c.h.b16 %v3220_v1  ;;  %2196 = vmatpush.bf16.msra.mxu3 %v1624_v49  ;;  %2140 = vmatpush.bf16.msra.mxu0 %v1382_v61  ;;  %v4126_v50 = vld [vmem:[#allocation104_spill] sm:$0xff]  ;;  %v4129_v61 = vld [vmem:[#allocation106_spill] sm:$0xff]  ;;  %v4134_v35 = vld [vmem:[#allocation109_spill] sm:$0xff] }
 0x17c   :  { %v1956_v32 = vpack.c.b16 %v4122_v44, %v4121_v4  ;;  %v1622_v7 = vpack.c.b16 %v1592_v14, %v1590_v37  ;;  %v1774_v23 = vunpack.c.h.b16 %v4123_v3  ;;  %v1776_v29 = vunpack.c.h.b16 %v3231_v45  ;;  %2178 = vmatpush.bf16.msra.mxu2 %v1542_v43  ;;  %v4131_v43 = vld [vmem:[#allocation108_spill] sm:$0xff] }
 0x17d   :  { %v1714_v41 = vpack.c.b16 %v1696_v30, %v1694_v58  ;;  %v1934_v55 = vunpack.c.h.b16 %v4124_v20  ;;  %v1936_v12 = vunpack.c.h.b16 %v4125_v38  ;;  %2159 = vmatpush.bf16.msra.mxu1 %v1462_v19  ;;  %v1690_v54 = vunpack.c.h.b16 %v3248_v25  ;;  %v4136_v58 = vld [vmem:[#allocation110_spill] sm:$0xff]  ;;  %v4140_v20 = vld [vmem:[#allocation113_spill] sm:$0xff] }
 0x17e   :  { %v1692_v5 = vunpack.c.h.b16 %v4126_v50  ;;  %v1850_v1 = vunpack.c.h.b16 %v3257_v27  ;;  %v1852_v13 = vunpack.c.h.b16 %v3260_v15  ;;  %2141 = vmatmul.bf16.vlgmr.msra.gmra.mxu0 %v4127_v53  ;;  %v1874_v45 = vpack.c.b16 %v1856_v24, %v1854_v62  ;;  %v4130_v27 = vld [vmem:[#allocation107_spill] sm:$0xff]  ;;  %v4141_v38 = vld [vmem:[#allocation114_spill] sm:$0xff] }
 0x17f   :  { %2209 = vmatpush.bf16.msrb.mxu0 %v1716_v60  ;;  %v1770_v31 = vunpack.c.h.b16 %v4128_v21  ;;  %v1772_v49 = vunpack.c.h.b16 %v3271_v28  ;;  %v1930_v26 = vunpack.c.h.b16 %v4129_v61  ;;  %2197 = vmatpush.bf16.msra.mxu3 %v1622_v7  ;;  %v1794_v25 = vpack.c.b16 %v1776_v29, %v1774_v23  ;;  %v4138_v62 = vld [vmem:[#allocation71_spill] sm:$0xff]  ;;  %v4139_v7 = vld [vmem:[#allocation112_spill] sm:$0xff]  ;;  %v3668_v23 = vpop.xlane.xlu2 %732  ;;  %v4143_v50 = vld [vmem:[#allocation62_spill] sm:$0xff] }
 0x180   :  { %2247 = vmatpush.bf16.msrb.mxu2 %v1876_v34  ;;  %v1932_v37 = vunpack.c.h.b16 %v4130_v27  ;;  %v1686_v15 = vunpack.c.h.b16 %v3288_v42  ;;  %v1688_v14 = vunpack.c.h.b16 %v4131_v43  ;;  %2160 = vmatmul.bf16.vlgmr.msra.gmra.mxu1 %v4132_v46  ;;  %v1954_v60 = vpack.c.b16 %v1936_v12, %v1934_v55  ;;  %v3676_v53 = vpop.xlane.xlu1 %770  ;;  %v4146_v43 = vld [vmem:[#allocation115_spill] sm:$0xff] }
 0x181   :  { %2228 = vmatpush.bf16.msrb.mxu1 %v1796_v2  ;;  %2179 = vmatmul.bf16.vlgmr.msra.gmra.mxu2 %v4133_v22  ;;  %v1846_v28 = vunpack.c.h.b16 %v3297_v51  ;;  %v1848_v40 = vunpack.c.h.b16 %v3300_v9  ;;  %v1766_v8 = vunpack.c.h.b16 %v3307_v11  ;;  %v1712_v34 = vpack.c.b16 %v1692_v5, %v1690_v54  ;;  %v4135_v2 = vld [vmem:[#allocation100_spill] sm:$0xff]  ;;  %v4137_v11 = vld [vmem:[#allocation69_spill] sm:$0xff]  ;;  %v3681_v61 = vpop.xlane.xlu0 %746 }
 0x182   :  { %v1872_v19 = vpack.c.b16 %v1852_v13, %v1850_v1  ;;  %v1792_v18 = vpack.c.b16 %v1772_v49, %v1770_v31  ;;  %v1768_v42 = vunpack.c.h.b16 %v4134_v35  ;;  %2198 = vmatmul.bf16.vlgmr.msra.gmra.mxu3 %v4135_v2  ;;  %v1952_v4 = vpack.c.b16 %v1932_v37, %v1930_v26  ;;  %v4144_v1 = vld [vmem:[#allocation63_spill] sm:$0xff]  ;;  %v4147_v22 = vld [vmem:[#allocation116_spill] sm:$0xff]  ;;  %v4149_v35 = vld [vmem:[#allocation118_spill] sm:$0xff] }
 0x183   :  { %2266 = vmatpush.bf16.msrb.mxu3 %v1956_v32  ;;  %2210 = vmatpush.bf16.msrb.mxu0 %v1714_v41  ;;  %v1710_v44 = vpack.c.b16 %v1688_v14, %v1686_v15  ;;  %v1926_v30 = vunpack.c.h.b16 %v4136_v58  ;;  %v1928_v51 = vunpack.c.h.b16 %v3323_v6  ;;  %v1682_v9 = vunpack.c.h.b16 %v3334_v56  ;;  %v4142_v6 = vld [vmem:[#allocation61_spill] sm:$0xff]  ;;  %v4152_v58 = vld [vmem:[#allocation123_spill] sm:$0xff] }
 0x184   :  { %2248 = vmatpush.bf16.msrb.mxu2 %v1874_v45  ;;  %v1684_v32 = vunpack.c.h.b16 %v4137_v11  ;;  %v1842_v24 = vunpack.c.h.b16 %v4138_v62  ;;  %v1844_v3 = vunpack.c.h.b16 %v4139_v7  ;;  %v1870_v29 = vpack.c.b16 %v1848_v40, %v1846_v28  ;;  %v4154_v11 = vld [vmem:[#allocation125_spill] sm:$0xff]  ;;  %v4156_v62 = vld [vmem:[#allocation122_spill] sm:$0xff] }
 0x185   :  { %2229 = vmatpush.bf16.msrb.mxu1 %v1794_v25  ;;  %v1790_v41 = vpack.c.b16 %v1768_v42, %v1766_v8  ;;  %v1762_v55 = vunpack.c.h.b16 %v4140_v20  ;;  %v1764_v12 = vunpack.c.h.b16 %v4141_v38  ;;  %v1922_v54 = vunpack.c.h.b16 %v4142_v6  ;;  %v4148_v8 = vld [vmem:[#allocation117_spill] sm:$0xff]  ;;  %v4150_v42 = vld [vmem:[#allocation119_spill] sm:$0xff] }
 0x186   :  { %v1924_v56 = vunpack.c.h.b16 %v4143_v50  ;;  %v1678_v5 = vunpack.c.h.b16 %v3390_v10  ;;  %v1680_v13 = vunpack.c.h.b16 %v4144_v1  ;;  %v1950_v45 = vpack.c.b16 %v1928_v51, %v1926_v30  ;;  %v4145_v10 = vld [vmem:[#allocation65_spill] sm:$0xff]  ;;  %v4153_v51 = vld [vmem:[#allocation124_spill] sm:$0xff] }
 0x187   :  { %2267 = vmatpush.bf16.msrb.mxu3 %v1954_v60  ;;  %2211 = vmatpush.bf16.msrb.mxu0 %v1712_v34  ;;  %v1838_v21 = vunpack.c.h.b16 %v3399_v63  ;;  %v1840_v31 = vunpack.c.h.b16 %v3403_v52  ;;  %v1758_v49 = vunpack.c.h.b16 %v3410_v16  ;;  %v1708_v26 = vpack.c.b16 %v1684_v32, %v1682_v9  ;;  %v4157_v7 = vld [vmem:[#allocation45_spill] sm:$0xff]  ;;  %v745_v20 = vpop.xlane.xlu2 %744 }
 0x188   :  { %2249 = vmatpush.bf16.msrb.mxu2 %v1872_v19  ;;  %v1868_v25 = vpack.c.b16 %v1844_v3, %v1842_v24  ;;  %v1760_v27 = vunpack.c.h.b16 %v3413_v39  ;;  %v1918_v37 = vunpack.c.h.b16 %v4145_v10  ;;  %v1788_v15 = vpack.c.b16 %v1764_v12, %v1762_v55  ;;  %v4159_v55 = vld [vmem:[#allocation111_spill] sm:$0xff]  ;;  %v4160_v12 = vld [vmem:[#allocation13_spill] sm:$0xff] }
 0x189   :  { %2230 = vmatpush.bf16.msrb.mxu1 %v1792_v18  ;;  %v1920_v14 = vunpack.c.h.b16 %v4146_v43  ;;  %v1674_v46 = vunpack.c.h.b16 %v3430_v17  ;;  %v1676_v63 = vunpack.c.h.b16 %v4147_v22  ;;  %v1948_v52 = vpack.c.b16 %v1924_v56, %v1922_v54  ;;  %v769_v56 = vpop.xlane.xlu1 %768 }
 0x18a   :  { %v1706_v16 = vpack.c.b16 %v1680_v13, %v1678_v5  ;;  %v1866_v60 = vpack.c.b16 %v1840_v31, %v1838_v21  ;;  %v1786_v28 = vpack.c.b16 %v1760_v27, %v1758_v49  ;;  %v1834_v40 = vunpack.c.h.b16 %v3439_v33  ;;  %v4155_v33 = vld [vmem:[#allocation121_spill] sm:$0xff]  ;;  %v757_v5 = vpop.xlane.xlu0 %756  ;;  %v4162_v21 = vld [vmem:[#allocation70_spill] sm:$0xff] }
 0x18b   :  { %2268 = vmatpush.bf16.msrb.mxu3 %v1952_v4  ;;  %2212 = vmatpush.bf16.msrb.mxu0 %v1710_v44  ;;  %v1836_v39 = vunpack.c.h.b16 %v3442_v48  ;;  %v1754_v34 = vunpack.c.h.b16 %v4148_v8  ;;  %v1946_v19 = vpack.c.b16 %v1920_v14, %v1918_v37  ;;  %v1704_v18 = vpack.c.b16 %v1676_v63, %v1674_v46  ;;  %v4151_v4 = vld [vmem:[#allocation120_spill] sm:$0xff] }
 0x18c   :  { %2250 = vmatpush.bf16.msrb.mxu2 %v1870_v29  ;;  %v1756_v17 = vunpack.c.h.b16 %v4149_v35  ;;  %v1914_v2 = vunpack.c.h.b16 %v4150_v42  ;;  %v1916_v44 = vunpack.c.h.b16 %v4151_v4  ;;  %v1830_v30 = vunpack.c.h.b16 %v4152_v58  ;;  %v4158_v29 = vld [vmem:[#allocation76_spill] sm:$0xff]  ;;  %v4165_v58 = vld [vmem:[#allocation46_spill] sm:$0xff] }
 0x18d   :  { %2231 = vmatpush.bf16.msrb.mxu1 %v1790_v41  ;;  %v1832_v9 = vunpack.c.h.b16 %v4153_v51  ;;  %v1750_v32 = vunpack.c.h.b16 %v4154_v11  ;;  %v1670_v48 = vunpack.c.h.b16 %v4155_v33  ;;  %v1672_v24 = vunpack.c.h.b16 %v4156_v62  ;;  %v4163_v37 = vld [vmem:[#allocation40_spill] sm:$0xff] }
 0x18e   :  { %v1752_v3 = vunpack.c.h.b16 %v4157_v7  ;;  %v1910_v41 = vunpack.c.h.b16 %v4158_v29  ;;  %2146 = vmatmul.bf16.gmra.mxu0 %v4159_v55  ;;  %v1912_v6 = vunpack.c.h.b16 %v4160_v12  ;;  %v761_v54 = vcvt.f32.s32 %v3644_v47  ;;  %v4168_v29 = vld [vmem:[#allocation78_spill] sm:$0xff]  ;;  %v2028_v55 = vpop.f32.mrf.mxu2 }
 0x18f   :  { %2269 = vmatpush.bf16.msrb.mxu3 %v1950_v45  ;;  %2213 = vmatpush.bf16.msrb.mxu0 %v1708_v26  ;;  %v1862_v38 = vpack.c.b16 %v1832_v9, %v1830_v30  ;;  %v737_v50 = vcvt.f32.s32 %v3650_v59  ;;  %v736_v13 = vcvt.f32.s32 %v3668_v23  ;;  %v4161_v45 = vld [vmem:[#allocation39_spill] sm:$0xff]  ;;  %v773_v47 = vcvt.f32.s32 %v3676_v53  ;;  %v4166_v30 = vld [vmem:[#allocation77_spill] sm:$0xff] }
 0x190   :  { %2251 = vmatpush.bf16.msrb.mxu2 %v1868_v25  ;;  %v1782_v1 = vpack.c.b16 %v1752_v3, %v1750_v32  ;;  %2165 = vmatmul.bf16.gmra.mxu1 %v4161_v45  ;;  %v1942_v31 = vpack.c.b16 %v1912_v6, %v1910_v41  ;;  %v762_v49 = vshll.u32 %v761_v54, 16  ;;  %v2516_v25 = vmov 0.0   ;;  %v4167_v9 = vld [vmem:[#allocation47_spill] sm:$0xff]  ;;  %v1990_v3 = vpop.f32.mrf.mxu0  ;;  %v2009_v41 = vpop.f32.mrf.mxu1 }
 0x191   :  { %2232 = vmatpush.bf16.msrb.mxu1 %v1788_v15  ;;  %2184 = vmatmul.bf16.gmra.mxu2 %v4162_v21  ;;  %v738_v26 = vshll.u32 %v737_v50, 16  ;;  %71 = vst.msk [vmem:[#allocation2] sm:$0xff] %vm70_vm0, %v2516_v25  ;;  %v749_v59 = vcvt.f32.s32 %v3681_v61  ;;  %v748_v27 = vcvt.f32.s32 %v745_v20  ;;  %v772_v23 = vcvt.f32.s32 %v769_v56 }
 0x192   :  { %72 = vst.msk [vmem:[#allocation2 + $0x8] sm:$0xff] %vm70_vm0, %v2516_v25  ;;  %v760_v10 = vcvt.f32.s32 %v757_v5  ;;  %2203 = vmatmul.bf16.gmra.mxu3 %v4163_v37  ;;  %v1864_v15 = vpack.c.b16 %v1836_v39, %v1834_v40  ;;  %v774_v14 = vshll.u32 %v773_v47, 16  ;;  %v1784_v46 = vpack.c.b16 %v1756_v17, %v1754_v34 }
 0x193   :  { %2270 = vmatpush.bf16.msrb.mxu3 %v1948_v52  ;;  %2214 = vmatpush.bf16.msrb.mxu0 %v1706_v16  ;;  %v739_v43 = vadd.s32 %v738_v26, %v736_v13  ;;  %73 = vst.msk [vmem:[#allocation2 + $0x10] sm:$0xff] %vm70_vm0, %v2516_v25  ;;  %v750_v53 = vshll.u32 %v749_v59, 16  ;;  %v2517_v63 = vmov 0   ;;  %v1944_v16 = vpack.c.b16 %v1916_v44, %v1914_v2  ;;  %v4164_v44 = vld [vmem:[#allocation14_spill] sm:$0xff] }
 0x194   :  { %2252 = vmatpush.bf16.msrb.mxu2 %v1866_v60  ;;  %74 = vst.msk [vmem:[#allocation2 + $0x18] sm:$0xff] %vm70_vm0, %v2516_v25  ;;  %v763_v22 = vadd.s32 %v762_v49, %v760_v10  ;;  %2406 = vset.pattern.permute.xlu2 %v2517_v63  ;;  %v775_v52 = vadd.s32 %v774_v14, %v772_v23 }
 0x195   :  { %2233 = vmatpush.bf16.msrb.mxu1 %v1786_v28  ;;  %v776_v61 = vcvt.s32.f32 %v739_v43  ;;  %2407 = vset.pattern.permute.xlu0 %v2517_v63  ;;  %v1702_v60 = vpack.c.b16 %v1672_v24, %v1670_v48  ;;  %v751_v40 = vadd.s32 %v750_v53, %v748_v27  ;;  %v2010_v25 = vadd.f32 %v2009_v41, %v1990_v3 }
 0x196   :  { %2408 = vset.pattern.permute.xlu1 %v2517_v63  ;;  %v778_v39 = vcvt.s32.f32 %v763_v22  ;;  %v779_v34 = vcvt.s32.f32 %v775_v52  ;;  %v2030_v54 = vpop.f32.mrf.mxu2 }
 0x197   :  { %2271 = vmatpush.bf16.msrb.mxu3 %v1946_v19  ;;  %2215 = vmatpush.bf16.msrb.mxu0 %v1704_v18  ;;  %v777_v8 = vcvt.s32.f32 %v751_v40  ;;  %v2029_v59 = vadd.f32 %v2028_v55, %v2010_v25 }
 0x198   :  { %2253 = vmatpush.bf16.msrb.mxu2 %v1864_v15  ;;  %v724_v28 = vld [vmem:[#allocation2] sm:$0xff]  ;;  %v1992_v20 = vpop.f32.mrf.mxu0  ;;  %v2011_v12 = vpop.f32.mrf.mxu1 }
 0x199   :  { %2234 = vmatpush.bf16.msrb.mxu1 %v1784_v46  ;;  %v780_v35 = vadd.f32 %v776_v61, %v724_v28  ;;  %v725_v17 = vld [vmem:[#allocation2 + $0x8] sm:$0xff] }
 0x19a   :  { %v781_v42 = vadd.f32 %v777_v8, %v725_v17  ;;  %v726_v4 = vld [vmem:[#allocation2 + $0x10] sm:$0xff]  ;;  %v3727_v8 = vld [vmem:[#allocation8] sm:$0x3]  ;;  %v2012_v17 = vadd.f32 %v2011_v12, %v1992_v20 }
 0x19b   :  { %2272 = vmatpush.bf16.msrb.mxu3 %v1944_v16  ;;  %2216 = vmatpush.bf16.msrb.mxu0 %v1702_v60  ;;  %785 = vst.msk [vmem:[#allocation2] sm:$0xff] %vm70_vm0, %v780_v35  ;;  %v727_v19 = vld [vmem:[#allocation2 + $0x18] sm:$0xff]  ;;  %v782_v18 = vadd.f32 %v778_v39, %v726_v4 }
 0x19c   :  { %2254 = vmatpush.bf16.msrb.mxu2 %v1862_v38  ;;  %786 = vst.msk [vmem:[#allocation2 + $0x8] sm:$0xff] %vm70_vm0, %v781_v42  ;;  %v783_v2 = vadd.f32 %v779_v34, %v727_v19  ;;  %v2047_v38 = vpop.f32.mrf.mxu3 }
 0x19d   :  { %2235 = vmatpush.bf16.msrb.mxu1 %v1782_v1  ;;  %787 = vst.msk [vmem:[#allocation2 + $0x10] sm:$0xff] %vm70_vm0, %v782_v18  ;;  %v2048_v27 = vadd.f32 %v2047_v38, %v2029_v59 }
 0x19e   :  { %788 = vst.msk [vmem:[#allocation2 + $0x18] sm:$0xff] %vm70_vm0, %v783_v2  ;;  %2217 = vmatmul.bf16.vlgmr.msrb.gmra.mxu0 %v4164_v44  ;;  %v2033_v1 = vpop.f32.mrf.mxu2  ;;  %v2358_v2 = vperm.slane %v3727_v8, 0 }
 0x19f   :  { %2273 = vmatpush.bf16.msrb.mxu3 %v1942_v31 }
 0x1a0   :  { %2236 = vmatmul.bf16.vlgmr.msrb.gmra.mxu1 %v4165_v58  ;;  %v1995_v6 = vpop.f32.mrf.mxu0  ;;  %v2014_v56 = vpop.f32.mrf.mxu1  ;;  %v2031_v58 = vadd.f32 %v2030_v54, %v2012_v17 }
 0x1a1   :  { %2255 = vmatmul.bf16.vlgmr.msrb.gmra.mxu2 %v4166_v30  ;;  %v2015_v4 = vadd.f32 %v2014_v56, %v1995_v6 }
 0x1a2   :  { %v2320_v51 = vld [vmem:[#allocation2] sm:$0xff]  ;;  %2274 = vmatmul.bf16.vlgmr.msrb.gmra.mxu3 %v4167_v9 }
 0x1a3   :  { %v2324_v11 = vmul.f32 2.0, %v2320_v51  ;;  %v2321_v32 = vld [vmem:[#allocation2 + $0x8] sm:$0xff]  ;;  %v2034_v9 = vadd.f32 %v2033_v1, %v2015_v4 }
 0x1a4   :  { %v2325_v33 = vmul.f32 2.0, %v2321_v32  ;;  %v2322_v48 = vld [vmem:[#allocation2 + $0x10] sm:$0xff]  ;;  %v2049_v50 = vpop.f32.mrf.mxu3 }
 0x1a5   :  { %2330 = vperm.xlu2 %2406, %v2324_v11   ;;  %v2326_v62 = vmul.f32 2.0, %v2322_v48  ;;  %v2323_v24 = vld [vmem:[#allocation2 + $0x18] sm:$0xff] }
 0x1a6   :  { %2335 = vperm.xlu0 %2407, %v2325_v33   ;;  %v2327_v7 = vmul.f32 2.0, %v2323_v24  ;;  %v2035_v45 = vpop.f32.mrf.mxu2  ;;  %v2050_v33 = vadd.f32 %v2049_v50, %v2031_v58 }
 0x1a7   :  { %2340 = vperm.xlu1 %2408, %v2326_v62  }
 0x1a8   :  { %v1997_v5 = vpop.f32.mrf.mxu0 }
 0x1ac   :  { %v2052_v13 = vpop.f32.mrf.mxu3 }
 0x1ad   :  { %2345 = vperm.xlu2 %2406, %v2327_v7   ;;  %v2053_v48 = vadd.f32 %v2052_v13, %v2034_v9 }
 0x1ae   :  { %2222 = vmatmul.bf16.gmra.mxu0 %v3574_v57  ;;  %v2016_v57 = vpop.f32.mrf.mxu1 }
 0x1af   :  { %v2017_v14 = vadd.f32 %v2016_v57, %v1997_v5 }
 0x1b0   :  { %2241 = vmatmul.bf16.gmra.mxu1 %v3579_v0 }
 0x1b1   :  { %2260 = vmatmul.bf16.gmra.mxu2 %v3583_v36  ;;  %v2036_v53 = vadd.f32 %v2035_v45, %v2017_v14 }
 0x1b2   :  { %2279 = vmatmul.bf16.gmra.mxu3 %v4168_v29 }
 0x1b4   :  { %v2054_v21 = vpop.f32.mrf.mxu3 }
 0x1b5   :  { %v2055_v52 = vadd.f32 %v2054_v21, %v2036_v53 }
 0x1d6   :  { %v2066_v0 = vpop.f32.mrf.mxu0 }
 0x1d7   :  { %v2067_v37 = vadd.f32 %v2066_v0, %v2048_v27 }
 0x1d8   :  { %v2085_v36 = vpop.f32.mrf.mxu1 }
 0x1d9   :  { %v2086_v46 = vadd.f32 %v2085_v36, %v2067_v37 }
 0x1de   :  { %v2068_v31 = vpop.f32.mrf.mxu0 }
 0x1df   :  { %v2069_v7 = vadd.f32 %v2068_v31, %v2050_v33 }
 0x1e0   :  { %v2087_v26 = vpop.f32.mrf.mxu1 }
 0x1e1   :  { %v2104_v49 = vpop.f32.mrf.mxu2  ;;  %v2088_v12 = vadd.f32 %v2087_v26, %v2069_v7 }
 0x1e2   :  { %v2105_v22 = vadd.f32 %v2104_v49, %v2086_v46 }
 0x1e3   :  { %v2123_v47 = vpop.f32.mrf.mxu3 }
 0x1e4   :  { %v2124_v60 = vadd.f32 %v2123_v47, %v2105_v22 }
 0x1e6   :  { %v2312_v44 = vmul.f32 4.0, %v2124_v60 }
 0x1e9   :  { %v2106_v10 = vpop.f32.mrf.mxu2 }
 0x1ea   :  { %v2071_v23 = vpop.f32.mrf.mxu0  ;;  %v2107_v56 = vadd.f32 %v2106_v10, %v2088_v12 }
 0x1eb   :  { %v2125_v15 = vpop.f32.mrf.mxu3  ;;  %v2072_v3 = vadd.f32 %v2071_v23, %v2053_v48 }
 0x1ec   :  { %v2090_v43 = vpop.f32.mrf.mxu1  ;;  %v2126_v45 = vadd.f32 %v2125_v15, %v2107_v56 }
 0x1ed   :  { %v2091_v6 = vadd.f32 %v2090_v43, %v2072_v3 }
 0x1ee   :  { %v2314_v47 = vmul.f32 4.0, %v2126_v45 }
 0x1f2   :  { %v2073_v63 = vpop.f32.mrf.mxu0  ;;  %v2109_v61 = vpop.f32.mrf.mxu2 }
 0x1f3   :  { %v2074_v39 = vadd.f32 %v2073_v63, %v2055_v52  ;;  %v2110_v5 = vadd.f32 %v2109_v61, %v2091_v6 }
 0x1f4   :  { %v2092_v16 = vpop.f32.mrf.mxu1 }
 0x1f5   :  { %v2128_v40 = vpop.f32.mrf.mxu3  ;;  %v2093_v28 = vadd.f32 %v2092_v16, %v2074_v39 }
 0x1f6   :  { %v2129_v0 = vadd.f32 %v2128_v40, %v2110_v5 }
 0x1f8   :  { %v2316_v27 = vmul.f32 4.0, %v2129_v0 }
 0x1fa   :  { %v2111_v34 = vpop.f32.mrf.mxu2 }
 0x1fb   :  { %v2142_v35 = vpop.f32.mrf.mxu0  ;;  %v2112_v42 = vadd.f32 %v2111_v34, %v2093_v28 }
 0x1fd   :  { %v2130_v19 = vpop.f32.mrf.mxu3  ;;  %v2161_v18 = vpop.f32.mrf.mxu1 }
 0x1fe   :  { %v2131_v30 = vadd.f32 %v2130_v19, %v2112_v42  ;;  %v2162_v25 = vadd.f32 %v2161_v18, %v2142_v35 }
 0x1ff   :  { %v3730_v51 = vpop.permute.xlu2 %2330 }
 0x200   :  { %v2348_v11 = vsub.f32 %v2312_v44, %v3730_v51  ;;  %v2318_v20 = vmul.f32 4.0, %v2131_v30  ;;  %v2359_v44 = vperm.slane %v3727_v8, 1 }
 0x202   :  { %v2362_v32 = vadd.f32 %v2358_v2, %v2348_v11 }
 0x203   :  { %v2144_v62 = vpop.f32.mrf.mxu0 }
 0x204   :  { %v2180_v24 = vpop.f32.mrf.mxu2  ;;  %2370 = vst [vmem:[#allocation9] sm:$0xff] %v2362_v32 }
 0x205   :  { %v2199_v29 = vpop.f32.mrf.mxu3  ;;  %v2163_v41 = vpop.f32.mrf.mxu1  ;;  %v2181_v26 = vadd.f32 %v2180_v24, %v2162_v25 }
 0x206   :  { %v2164_v61 = vadd.f32 %v2163_v41, %v2144_v62 }
 0x207   :  { %v3733_v55 = vpop.permute.xlu2 %2345  ;;  %v2200_v22 = vadd.f32 %v2199_v29, %v2181_v26 }
 0x208   :  { %v2354_v38 = vsub.f32 %v2318_v20, %v3733_v55 }
 0x20a   :  { %v2368_v54 = vadd.f32 %v2358_v2, %v2354_v38 }
 0x20b   :  { %v2147_v1 = vpop.f32.mrf.mxu0 }
 0x20c   :  { %v2182_v50 = vpop.f32.mrf.mxu2  ;;  %2376 = vst [vmem:[#allocation9 + $0x30] sm:$0xff] %v2368_v54 }
 0x20d   :  { %v2201_v13 = vpop.f32.mrf.mxu3  ;;  %v2166_v57 = vpop.f32.mrf.mxu1  ;;  %v2183_v16 = vadd.f32 %v2182_v50, %v2164_v61 }
 0x20e   :  { %v2167_v42 = vadd.f32 %v2166_v57, %v2147_v1 }
 0x20f   :  { %v2202_v28 = vadd.f32 %v2201_v13, %v2183_v16 }
 0x213   :  { %v2149_v21 = vpop.f32.mrf.mxu0 }
 0x214   :  { %v2185_v36 = vpop.f32.mrf.mxu2 }
 0x215   :  { %v2204_v31 = vpop.f32.mrf.mxu3  ;;  %v2168_v49 = vpop.f32.mrf.mxu1  ;;  %v2186_v18 = vadd.f32 %v2185_v36, %v2167_v42 }
 0x216   :  { %v2169_v24 = vadd.f32 %v2168_v49, %v2149_v21 }
 0x217   :  { %v2205_v11 = vadd.f32 %v2204_v31, %v2186_v18 }
 0x218   :  { %v2336_v59 = vpop.permute.xlu0 %2335 }
 0x219   :  { %v2350_v23 = vsub.f32 %v2314_v47, %v2336_v59  ;;  %v2341_v37 = vpop.permute.xlu1 %2340 }
 0x21a   :  { %v2352_v10 = vsub.f32 %v2316_v27, %v2341_v37 }
 0x21b   :  { %v2364_v43 = vadd.f32 %v2358_v2, %v2350_v23  ;;  %v2218_v46 = vpop.f32.mrf.mxu0 }
 0x21c   :  { %v2187_v14 = vpop.f32.mrf.mxu2  ;;  %v2366_v53 = vadd.f32 %v2358_v2, %v2352_v10  ;;  %v2219_v52 = vadd.f32 %v2218_v46, %v2200_v22 }
 0x21d   :  { %2372 = vst [vmem:[#allocation9 + $0x10] sm:$0xff] %v2364_v43  ;;  %v2206_v15 = vpop.f32.mrf.mxu3  ;;  %v2237_v63 = vpop.f32.mrf.mxu1  ;;  %v2188_v41 = vadd.f32 %v2187_v14, %v2169_v24 }
 0x21e   :  { %2374 = vst [vmem:[#allocation9 + $0x20] sm:$0xff] %v2366_v53  ;;  %v2238_v60 = vadd.f32 %v2237_v63, %v2219_v52 }
 0x21f   :  { %v2207_v8 = vadd.f32 %v2206_v15, %v2188_v41 }
 0x223   :  { %v2220_v40 = vpop.f32.mrf.mxu0 }
 0x224   :  { %v2256_v39 = vpop.f32.mrf.mxu2  ;;  %v2221_v4 = vadd.f32 %v2220_v40, %v2202_v28 }
 0x225   :  { %v2257_v34 = vadd.f32 %v2256_v39, %v2238_v60  ;;  %v2275_v35 = vpop.f32.mrf.mxu3  ;;  %v2239_v17 = vpop.f32.mrf.mxu1 }
 0x226   :  { %v2240_v2 = vadd.f32 %v2239_v17, %v2221_v4 }
 0x227   :  { %v2276_v19 = vadd.f32 %v2275_v35, %v2257_v34 }
 0x229   :  { %v2313_v58 = vmul.f32 4.0, %v2276_v19 }
 0x22b   :  { %v2223_v30 = vpop.f32.mrf.mxu0  ;;  %v2349_v33 = vsub.f32 %v2313_v58, %v3730_v51 }
 0x22c   :  { %v2258_v9 = vpop.f32.mrf.mxu2  ;;  %v2224_v7 = vadd.f32 %v2223_v30, %v2205_v11 }
 0x22d   :  { %v2259_v32 = vadd.f32 %v2258_v9, %v2240_v2  ;;  %v2277_v48 = vpop.f32.mrf.mxu3  ;;  %v2242_v62 = vpop.f32.mrf.mxu1  ;;  %v2363_v29 = vadd.f32 %v2359_v44, %v2349_v33 }
 0x22e   :  { %v2243_v20 = vadd.f32 %v2242_v62, %v2224_v7 }
 0x22f   :  { %v2278_v3 = vadd.f32 %v2277_v48, %v2259_v32  ;;  %2371 = vst [vmem:[#allocation9 + $0x8] sm:$0xff] %v2363_v29 }
 0x231   :  { %v2315_v38 = vmul.f32 4.0, %v2278_v3 }
 0x233   :  { %v2225_v12 = vpop.f32.mrf.mxu0  ;;  %v2351_v54 = vsub.f32 %v2315_v38, %v2336_v59 }
 0x234   :  { %v2261_v6 = vpop.f32.mrf.mxu2  ;;  %v2226_v50 = vadd.f32 %v2225_v12, %v2207_v8 }
 0x235   :  { %v2262_v56 = vadd.f32 %v2261_v6, %v2243_v20  ;;  %v2280_v5 = vpop.f32.mrf.mxu3  ;;  %v2365_v1 = vadd.f32 %v2359_v44, %v2351_v54  ;;  %v2244_v51 = vpop.f32.mrf.mxu1 }
 0x236   :  { %v2245_v45 = vadd.f32 %v2244_v51, %v2226_v50 }
 0x237   :  { %v2281_v13 = vadd.f32 %v2280_v5, %v2262_v56  ;;  %2373 = vst [vmem:[#allocation9 + $0x18] sm:$0xff] %v2365_v1 }
 0x239   :  { %v2317_v57 = vmul.f32 4.0, %v2281_v13 }
 0x23b   :  { %v2353_v21 = vsub.f32 %v2317_v57, %v2341_v37 }
 0x23c   :  { %v2263_v0 = vpop.f32.mrf.mxu2 }
 0x23d   :  { %v2264_v36 = vadd.f32 %v2263_v0, %v2245_v45  ;;  %v2282_v31 = vpop.f32.mrf.mxu3  ;;  %v2367_v49 = vadd.f32 %v2359_v44, %v2353_v21 }
 0x23f   :  { %v2283_v25 = vadd.f32 %v2282_v31, %v2264_v36  ;;  %2375 = vst [vmem:[#allocation9 + $0x28] sm:$0xff] %v2367_v49 }
 0x241   :  { %v2319_v47 = vmul.f32 4.0, %v2283_v25 }
 0x243   :  { %v2355_v59 = vsub.f32 %v2319_v47, %v3733_v55 }
 0x245   :  { %v2369_v27 = vadd.f32 %v2359_v44, %v2355_v59 }
 0x247   :  { %2377 = vst [vmem:[#allocation9 + $0x38] sm:$0xff] %v2369_v27 }
 0x248   :  { %2390 = dma.vmem_to_hbm [thread:$0]  %s2383_s2, 1024, %s2385_s30, [#allocation5], %s2512_s20, %s2512_s20, %s2513_s21  }
 0x249   :  { %2509 = dma.done.wait [#allocation5], 1024  }
 0x24a   :  { %2510 = vsyncadd [#allocation5], 4294966272 }
 0x24b   :  { %2395 = vsyncpa [#allocation4], 1 }
 0x24c   :  { %2396 = vsyncpa [#allocation7], 1 }
 0x24d   :  { %2397 = vsyncpa [#allocation5], 1 }

</bundles_post_ra>
